<compile_context>
chip_gen: v5e
topology: v5e:2x2
jax: 0.10.0
libtpu: 0.0.40
codegen_flags: <defaults>
</compile_context>

<pallas_src>
import jax
import jax.numpy as jnp
from jax.experimental import pallas as pl
from jax.experimental.pallas import tpu as pltpu


def _critic_kernel(obs_ref, act_ref, w1o_ref, w1a_ref, b1_ref,
                   w2_ref, b2_ref, w3_ref, b3_ref, o_ref):
    # Activations are DMA'd as f32 and cast to bf16 on the VPU (no wrapper-side
    # cast pass over HBM).
    obs = obs_ref[...].astype(jnp.bfloat16)
    act = act_ref[...].astype(jnp.bfloat16)

    # Layer 1: Linear(obs_dim + act_dim -> 512) as two MXU dots summed in f32
    # (the concatenated activation never touches HBM).
    h = jnp.dot(obs, w1o_ref[...], preferred_element_type=jnp.float32)
    h = h + jnp.dot(act, w1a_ref[...], preferred_element_type=jnp.float32)
    h = jnp.maximum(h + b1_ref[...], 0.0)

    # Layer 2: Linear(512 -> 512) + ReLU (bf16 operands, f32 accumulation).
    h = jnp.dot(h.astype(jnp.bfloat16), w2_ref[...],
                preferred_element_type=jnp.float32)
    h = jnp.maximum(h + b2_ref[...], 0.0)

    # Layer 3: Linear(512 -> 1) on the VPU + XLU lane reduction (an N=1 MXU
    # matmul would use 1/256 of the systolic array). b3 is a scalar from SMEM.
    q = jnp.sum(h * w3_ref[...], axis=-1, keepdims=True) + b3_ref[0]
    o_ref[...] = q.astype(o_ref.dtype)


def _round_up(x, m):
    return ((x + m - 1) // m) * m


def _pick_tm(batch, tm_max=1024):
    """Pick the batch tile: as large as possible (<= tm_max) while keeping the
    tile count >= 2 and even so v7x's two TensorCores both get work."""
    if batch <= 16:
        return batch                      # one tiny tile == full batch dim
    n = pl.cdiv(batch, tm_max)
    n = max(2, n + (n % 2))               # even tile count, at least 2
    return min(tm_max, _round_up(pl.cdiv(batch, n), 8))


def prepare_params(params, obs_dim):
    """One-time conversion of PyTorch-style f32 params into kernel-ready form.

    Hoists the bf16 weight casts and the W1 split out of the per-call path so
    the forward pass does not re-read/re-write the weights through HBM on
    every call.
    """
    w1, b1, w2, b2, w3, b3 = params
    hidden = w1.shape[1]
    w1o = w1[:obs_dim].astype(jnp.bfloat16)          # (obs_dim, 512)
    w1a = w1[obs_dim:].astype(jnp.bfloat16)          # (act_dim, 512)
    w2_bf = w2.astype(jnp.bfloat16)                  # (512, 512)
    w3_row = w3.reshape(1, hidden).astype(jnp.float32)   # (1, 512), VPU path
    b3_s = b3.reshape(1).astype(jnp.float32)         # scalar, lives in SMEM
    return (w1o, w1a, b1.reshape(1, hidden).astype(jnp.float32),
            w2_bf, b2.reshape(1, hidden).astype(jnp.float32),
            w3_row, b3_s)


def ddpg_critic_forward(obs, act, kparams, *, tm_max=1024):
    """obs: (B, obs_dim) f32, act: (B, act_dim) f32, kparams from prepare_params.
    Returns (B, 1) f32 Q-values."""
    w1o, w1a, b1, w2, b2, w3_row, b3 = kparams
    B, obs_dim = obs.shape
    act_dim = act.shape[1]
    hidden = w2.shape[1]

    tm = _pick_tm(B, tm_max)
    n_tiles = pl.cdiv(B, tm)

    def resident(shape):  # weight/bias block pinned in VMEM across all tiles
        return pl.BlockSpec(shape, lambda i: (0, 0))

    out = pl.pallas_call(
        _critic_kernel,
        out_shape=jax.ShapeDtypeStruct((B, 1), jnp.float32),
        grid=(n_tiles,),
        in_specs=[
            pl.BlockSpec((tm, obs_dim), lambda i: (i, 0)),   # obs tile (f32)
            pl.BlockSpec((tm, act_dim), lambda i: (i, 0)),   # act tile (f32)
            resident((obs_dim, hidden)),                     # W1_obs (bf16)
            resident((act_dim, hidden)),                     # W1_act (bf16)
            resident((1, hidden)),                           # b1 (f32)
            resident((hidden, hidden)),                      # W2 (bf16)
            resident((1, hidden)),                           # b2 (f32)
            resident((1, hidden)),                           # w3 row (f32)
            pl.BlockSpec(memory_space=pltpu.MemorySpace.SMEM),  # b3 scalar
        ],
        out_specs=pl.BlockSpec((tm, 1), lambda i: (i, 0)),
        compiler_params=pltpu.CompilerParams(
            dimension_semantics=("parallel",),
        ),
    )(obs, act, w1o, w1a, b1, w2, b2, w3_row, b3)

    return out


def init_params(obs_dim, act_dim, hidden=512, key=None):
    """Deterministic synthetic parameters matching the module's shapes."""
    if key is None:
        key = jax.random.PRNGKey(42)
    ks = jax.random.split(key, 6)
    in_dim = obs_dim + act_dim

    # PyTorch Linear default init: U(-1/sqrt(fan_in), 1/sqrt(fan_in)).
    def lin(kw, kb, fan_in, fan_out):
        bound = 1.0 / jnp.sqrt(fan_in)
        w = jax.random.uniform(kw, (fan_in, fan_out), jnp.float32, -bound, bound)
        b = jax.random.uniform(kb, (1, fan_out), jnp.float32, -bound, bound)
        return w, b

    w1, b1 = lin(ks[0], ks[1], in_dim, hidden)
    w2, b2 = lin(ks[2], ks[3], hidden, hidden)
    w3, b3 = lin(ks[4], ks[5], hidden, 1)
    b3 = b3.reshape(1)
    return (w1, b1, w2, b2, w3, b3)


def _reference(obs, act, params):
    """Plain-JAX reference with the same bf16-operand / f32-accumulate recipe."""
    w1, b1, w2, b2, w3, b3 = params
    x = jnp.concatenate([obs, act], axis=-1).astype(jnp.bfloat16)
    h = jnp.dot(x, w1.astype(jnp.bfloat16), preferred_element_type=jnp.float32)
    h = jnp.maximum(h + b1, 0.0)
    h = jnp.dot(h.astype(jnp.bfloat16), w2.astype(jnp.bfloat16),
                preferred_element_type=jnp.float32)
    h = jnp.maximum(h + b2, 0.0)
    return h @ w3 + b3


if __name__ == "__main__":
    key = jax.random.PRNGKey(0)
    k_obs, k_act, k_par = jax.random.split(key, 3)

    # Small shapes; B=384 exercises the batch grid (2 parallel tiles of 192).
    B, obs_dim, act_dim = 384, 16, 8
    obs = jax.random.normal(k_obs, (B, obs_dim), jnp.float32)
    act = jax.random.normal(k_act, (B, act_dim), jnp.float32)

    params = init_params(obs_dim, act_dim, key=k_par)
    kparams = prepare_params(params, obs_dim)      # one-time bf16 split/cast

    q = ddpg_critic_forward(obs, act, kparams)
    q = jax.block_until_ready(q)

    q_ref = _reference(obs, act, params)
    assert q.shape == (B, 1), q.shape
    assert jnp.allclose(q, q_ref, atol=2e-3, rtol=2e-3), "mismatch vs JAX reference"

    print("KERNEL_OK")
</pallas_src>

<mosaic_0001>
module attributes {stable_mosaic.version = 11 : i64} {
  func.func @_critic_kernel(%arg0: i32, %arg1: memref<192x16xf32, #tpu.memory_space<vmem>>, %arg2: memref<192x8xf32, #tpu.memory_space<vmem>>, %arg3: memref<16x512xbf16, #tpu.memory_space<vmem>>, %arg4: memref<8x512xbf16, #tpu.memory_space<vmem>>, %arg5: memref<1x512xf32, #tpu.memory_space<vmem>>, %arg6: memref<512x512xbf16, #tpu.memory_space<vmem>>, %arg7: memref<1x512xf32, #tpu.memory_space<vmem>>, %arg8: memref<1x512xf32, #tpu.memory_space<vmem>>, %arg9: memref<1xf32, #tpu.memory_space<smem>>, %arg10: memref<192x1xf32, #tpu.memory_space<vmem>>) attributes {dimension_semantics = [#tpu.dimension_semantics<parallel>], iteration_bounds = array<i64: 2>, scalar_prefetch = 0 : i64, scratch_operands = 0 : i64, tpu.core_type = #tpu.core_type<tc>, window_params = [{transform_indices = @transform_0, window_bounds = array<i64: 192, 16>}, {transform_indices = @transform_1, window_bounds = array<i64: 192, 8>}, {pipeline_mode = #tpu.pipeline_mode<synchronous>, transform_indices = @transform_2, window_bounds = array<i64: 16, 512>}, {pipeline_mode = #tpu.pipeline_mode<synchronous>, transform_indices = @transform_3, window_bounds = array<i64: 8, 512>}, {pipeline_mode = #tpu.pipeline_mode<synchronous>, transform_indices = @transform_4, window_bounds = array<i64: 1, 512>}, {pipeline_mode = #tpu.pipeline_mode<synchronous>, transform_indices = @transform_5, window_bounds = array<i64: 512, 512>}, {pipeline_mode = #tpu.pipeline_mode<synchronous>, transform_indices = @transform_6, window_bounds = array<i64: 1, 512>}, {pipeline_mode = #tpu.pipeline_mode<synchronous>, transform_indices = @transform_7, window_bounds = array<i64: 1, 512>}, {transform_indices = @transform_8, window_bounds = array<i64: 1>}, {transform_indices = @transform_9, window_bounds = array<i64: 192, 1>}]} {
    %c0 = arith.constant 0 : index
    %c0_0 = arith.constant 0 : index
    %0 = vector.load %arg1[%c0, %c0_0] : memref<192x16xf32, #tpu.memory_space<vmem>>, vector<192x16xf32>
    %1 = arith.truncf %0 : vector<192x16xf32> to vector<192x16xbf16>
    %c0_1 = arith.constant 0 : index
    %c0_2 = arith.constant 0 : index
    %2 = vector.load %arg2[%c0_1, %c0_2] : memref<192x8xf32, #tpu.memory_space<vmem>>, vector<192x8xf32>
    %3 = arith.truncf %2 : vector<192x8xf32> to vector<192x8xbf16>
    %c0_3 = arith.constant 0 : index
    %c0_4 = arith.constant 0 : index
    %4 = vector.load %arg3[%c0_3, %c0_4] : memref<16x512xbf16, #tpu.memory_space<vmem>>, vector<16x512xbf16>
    %cst = arith.constant dense<0.000000e+00> : vector<192x512xf32>
    %5 = tpu.matmul %1, %4, %cst {dimension_numbers = #tpu.dot_dimension_numbers<[1], [0], [0], [1], [0, 0, 1, 1], [], []>} : vector<192x16xbf16>, vector<16x512xbf16>, vector<192x512xf32> -> vector<192x512xf32>
    %c0_5 = arith.constant 0 : index
    %c0_6 = arith.constant 0 : index
    %6 = vector.load %arg4[%c0_5, %c0_6] : memref<8x512xbf16, #tpu.memory_space<vmem>>, vector<8x512xbf16>
    %cst_7 = arith.constant dense<0.000000e+00> : vector<192x512xf32>
    %7 = tpu.matmul %3, %6, %cst_7 {dimension_numbers = #tpu.dot_dimension_numbers<[1], [0], [0], [1], [0, 0, 1, 1], [], []>} : vector<192x8xbf16>, vector<8x512xbf16>, vector<192x512xf32> -> vector<192x512xf32>
    %8 = arith.addf %5, %7 : vector<192x512xf32>
    %c0_8 = arith.constant 0 : index
    %c0_9 = arith.constant 0 : index
    %9 = vector.load %arg5[%c0_8, %c0_9] : memref<1x512xf32, #tpu.memory_space<vmem>>, vector<1x512xf32>
    %10 = vector.broadcast %9 : vector<1x512xf32> to vector<192x512xf32>
    %11 = arith.addf %8, %10 : vector<192x512xf32>
    %cst_10 = arith.constant 0.000000e+00 : f32
    %12 = vector.broadcast %cst_10 : f32 to vector<192x512xf32>
    %13 = arith.maximumf %11, %12 : vector<192x512xf32>
    %14 = arith.truncf %13 : vector<192x512xf32> to vector<192x512xbf16>
    %c0_11 = arith.constant 0 : index
    %c0_12 = arith.constant 0 : index
    %15 = vector.load %arg6[%c0_11, %c0_12] : memref<512x512xbf16, #tpu.memory_space<vmem>>, vector<512x512xbf16>
    %cst_13 = arith.constant dense<0.000000e+00> : vector<192x512xf32>
    %16 = tpu.matmul %14, %15, %cst_13 {dimension_numbers = #tpu.dot_dimension_numbers<[1], [0], [0], [1], [0, 0, 1, 1], [], []>} : vector<192x512xbf16>, vector<512x512xbf16>, vector<192x512xf32> -> vector<192x512xf32>
    %c0_14 = arith.constant 0 : index
    %c0_15 = arith.constant 0 : index
    %17 = vector.load %arg7[%c0_14, %c0_15] : memref<1x512xf32, #tpu.memory_space<vmem>>, vector<1x512xf32>
    %18 = vector.broadcast %17 : vector<1x512xf32> to vector<192x512xf32>
    %19 = arith.addf %16, %18 : vector<192x512xf32>
    %cst_16 = arith.constant 0.000000e+00 : f32
    %20 = vector.broadcast %cst_16 : f32 to vector<192x512xf32>
    %21 = arith.maximumf %19, %20 : vector<192x512xf32>
    %c0_17 = arith.constant 0 : index
    %c0_18 = arith.constant 0 : index
    %22 = vector.load %arg8[%c0_17, %c0_18] : memref<1x512xf32, #tpu.memory_space<vmem>>, vector<1x512xf32>
    %23 = vector.broadcast %22 : vector<1x512xf32> to vector<192x512xf32>
    %24 = arith.mulf %21, %23 : vector<192x512xf32>
    %cst_19 = arith.constant dense<0.000000e+00> : vector<192xf32>
    %25 = vector.multi_reduction <add>, %24, %cst_19 [1] : vector<192x512xf32> to vector<192xf32>
    %26 = vector.shape_cast %25 : vector<192xf32> to vector<192x1xf32>
    %c0_20 = arith.constant 0 : index
    %27 = memref.load %arg9[%c0_20] : memref<1xf32, #tpu.memory_space<smem>>
    %28 = vector.broadcast %27 : f32 to vector<192x1xf32>
    %29 = arith.addf %26, %28 : vector<192x1xf32>
    %c0_21 = arith.constant 0 : index
    %c0_22 = arith.constant 0 : index
    %30 = vector.load %arg10[%c0_21, %c0_22] : memref<192x1xf32, #tpu.memory_space<vmem>>, vector<192x1xf32>
    tpu.vector_store %arg10[%c0_21, %c0_22], %29 {strides = array<i32>} : memref<192x1xf32, #tpu.memory_space<vmem>>, vector<192x1xf32>,
    return
  }
  func.func @transform_0(%arg0: i32) -> (i32, i32) {
    %c0_i32 = arith.constant 0 : i32
    %c0_i32_0 = arith.constant 0 : i32
    return %arg0, %c0_i32 : i32, i32
  }
  func.func @transform_1(%arg0: i32) -> (i32, i32) {
    %c0_i32 = arith.constant 0 : i32
    %c0_i32_0 = arith.constant 0 : i32
    return %arg0, %c0_i32 : i32, i32
  }
  func.func @transform_2(%arg0: i32) -> (i32, i32) {
    %c0_i32 = arith.constant 0 : i32
    %c0_i32_0 = arith.constant 0 : i32
    %c0_i32_1 = arith.constant 0 : i32
    return %c0_i32, %c0_i32_0 : i32, i32
  }
  func.func @transform_3(%arg0: i32) -> (i32, i32) {
    %c0_i32 = arith.constant 0 : i32
    %c0_i32_0 = arith.constant 0 : i32
    %c0_i32_1 = arith.constant 0 : i32
    return %c0_i32, %c0_i32_0 : i32, i32
  }
  func.func @transform_4(%arg0: i32) -> (i32, i32) {
    %c0_i32 = arith.constant 0 : i32
    %c0_i32_0 = arith.constant 0 : i32
    %c0_i32_1 = arith.constant 0 : i32
    return %c0_i32, %c0_i32_0 : i32, i32
  }
  func.func @transform_5(%arg0: i32) -> (i32, i32) {
    %c0_i32 = arith.constant 0 : i32
    %c0_i32_0 = arith.constant 0 : i32
    %c0_i32_1 = arith.constant 0 : i32
    return %c0_i32, %c0_i32_0 : i32, i32
  }
  func.func @transform_6(%arg0: i32) -> (i32, i32) {
    %c0_i32 = arith.constant 0 : i32
    %c0_i32_0 = arith.constant 0 : i32
    %c0_i32_1 = arith.constant 0 : i32
    return %c0_i32, %c0_i32_0 : i32, i32
  }
  func.func @transform_7(%arg0: i32) -> (i32, i32) {
    %c0_i32 = arith.constant 0 : i32
    %c0_i32_0 = arith.constant 0 : i32
    %c0_i32_1 = arith.constant 0 : i32
    return %c0_i32, %c0_i32_0 : i32, i32
  }
  func.func @transform_8(%arg0: i32) -> i32 {
    %c0_i32 = arith.constant 0 : i32
    %c0_i32_0 = arith.constant 0 : i32
    return %c0_i32 : i32
  }
  func.func @transform_9(%arg0: i32) -> (i32, i32) {
    %c0_i32 = arith.constant 0 : i32
    %c0_i32_0 = arith.constant 0 : i32
    return %arg0, %c0_i32 : i32, i32
  }
}

</mosaic_0001>

<bundles_post_ra>
// kernel: tpu_custom_call.1
= control target key start
LH: loop header
LB: loop body
LE: loop exit
PB: predicated region body
PF: predicated region fallthrough
CT: control target
= control target key end

     0   :  { %s6304_s0 = inlined_call_operand.vmem [shape: f32[384,16], index: 0, kind: input, shape index: {}]   ;;  %s6305_s1 = inlined_call_operand.vmem [shape: f32[384,8], index: 1, kind: input, shape index: {}]   ;;  %s6306_s2 = inlined_call_operand.vmem [shape: bf16[16,512], index: 2, kind: input, shape index: {}]   ;;  %s6307_s3 = inlined_call_operand.vmem [shape: bf16[8,512], index: 3, kind: input, shape index: {}]   ;;  %s6308_s4 = inlined_call_operand.vmem [shape: f32[1,512], index: 4, kind: input, shape index: {}]   ;;  %s6309_s5 = inlined_call_operand.hbm [shape: bf16[512,512], index: 5, kind: input, shape index: {}]   ;;  %s6310_s6 = inlined_call_operand.vmem [shape: f32[1,512], index: 6, kind: input, shape index: {}]   ;;  %s6311_s7 = inlined_call_operand.vmem [shape: f32[1,512], index: 7, kind: input, shape index: {}]   ;;  %s6312_s8 = inlined_call_operand.<no memory space> [shape: f32[1], index: 8, kind: input, shape index: {}]   ;;  %s6313_s9 = inlined_call_operand.vmem [shape: f32[384,1], index: 9, kind: output, shape index: {}]  }
   0x1   :  { %14 = sst [smem:[#allocation2]] %s6312_s8 }
   0x2   :  { %15 = vsyncpa [#allocation4], 0  ;;  %s4598_s11 = smov 0  }
   0x3 LB: > { %s271_s14 = sshll.u32 %s6309_s5, 4  ;;  %s3709_s15 = sadd.s32 4294967295, %s4540_s11   ;;  %s4540_s11 = sphi %s4598_s11, %s21_s11   ;;  %s272_s14 = int_to_ptr.hbm [resolvable:$true] %s271_s14 }
   0x4   : > { %p3711_p0 = scmp.ge.s32.totalorder %s4540_s11, 1  ;;  %p251_p1 = scmp.lt.s32.totalorder %s4540_s11, 3 }
   0x5   : > { %p4485_p2 = scmp.eq.s32.totalorder %s3709_s15, 0  ;;  %s4542_s8 = smov [#allocation3]  }
   0x6   : > { %p252_p3 = pnand %p3711_p0, %p251_p1  ;;  %s273_s16 = sshll.u32 %s4542_s8, 4  ;;  %s274_s16 = int_to_ptr.vmem [resolvable:$true] %s273_s16 }
   0x7   : > { %s4543_s17 = smov 256   ;;  %s4544_s18 = smov 16  }
   0x8   : > { %p4481_p4 = pneg %p252_p3  ;;  %316 = sbr.rel (%p252_p3) target bundleno = 1431 (0x597), region = 56 }
   0xa   : > { %p4482_p5 = pnand %p4485_p2, %p4481_p4 }
   0xc   : > { %4484 = dma.hbm_to_vmem [thread:$0]  (!%p4482_p5), %s272_s14, 16384, %s274_s16, [#allocation4], %s4543_s17, %s4543_s17, %s4544_s18  }
   0xd   : > { %4535 = dma.done.wait (%p4485_p2), [#allocation4], 16384  }
   0xe   : > { %4537 = vsyncadd (%p4485_p2), [#allocation4], 4294950912  ;;  %s358_s19 = smul.u32 24, %s3709_s15  ;;  %v453_v0 = vld [vmem:[%s6307_s3] sm:$0xff]  ;;  %v454_v1 = vld [vmem:[%s6307_s3 + $0x8] sm:$0xff]  ;;  %vm502_vm0 = vcmask 1043456  }
   0xf   : > { %v3777_v2 = vld [vmem:[%s6306_s2 + $0x8] sm:$0xf]  ;;  %v457_v3 = vunpack.c.l.b16 %v453_v0  ;;  %v458_v4 = vunpack.c.h.b16 %v453_v0  ;;  %v459_v5 = vunpack.c.l.b16 %v454_v1  ;;  %v460_v6 = vunpack.c.h.b16 %v454_v1  ;;  %v4348_v9 = vld [vmem:[%s6306_s2 + $0x14] sm:$0xf0]  ;;  %v3769_v10 = vld [vmem:[%s6306_s2] sm:$0xf] }
  0x10   : > { %p359_p6 = scmp.lt.s32.totalorder %s358_s19, 47  ;;  %v4347_v11 = vld [vmem:[%s6306_s2 + $0xc] sm:$0xf0]  ;;  %v4346_v16 = vld [vmem:[%s6306_s2 + $0xc] sm:$0xf]  ;;  %v3778_v18 = vor.u32 %v4348_v9, %v3777_v2  ;;  %vm465_vm1 = vcmask 64512  }
  0x11   : > { %v461_v12 = vpack.c.b16 %v457_v3, %v457_v3  ;;  %v462_v13 = vpack.c.b16 %v458_v4, %v458_v4  ;;  %v463_v14 = vpack.c.b16 %v459_v5, %v459_v5  ;;  %v464_v15 = vpack.c.b16 %v460_v6, %v460_v6  ;;  %v3779_v20 = vld [vmem:[%s6306_s2 + $0x18] sm:$0xf0]  ;;  %v4345_v21 = vld [vmem:[%s6306_s2 + $0x4] sm:$0xf]  ;;  %v3771_v22 = vld [vmem:[%s6306_s2 + $0x10] sm:$0xf0] }
  0x12   : > { %s6651_s19 = smov (!%p359_p6, %s358_s19), 47  ;;  %v3770_v19 = vor.u32 %v4347_v11, %v3769_v10  ;;  %v3782_v27 = vor.u32 %v4346_v16, %v3779_v20  ;;  %v3774_v28 = vor.u32 %v4345_v21, %v3771_v22  ;;  %vm811_vm2 = vcmask 130048   ;;  %s3578_s16 = sld [smem:[#allocation2]] }
  0x13   : > { %s4609_s20 = sshll.u32 %s6651_s19, 3  ;;  %v504_v23 = vsel %vm502_vm0, %v461_v12, 0  ;;  %v507_v24 = vsel %vm502_vm0, %v462_v13, 0  ;;  %v510_v25 = vsel %vm502_vm0, %v463_v14, 0  ;;  %v513_v26 = vsel %vm502_vm0, %v464_v15, 0 }
  0x14   : > { %s4621_s27 = scalar_lea.vmem %s6305_s1, %s4609_s20  ;;  %522 = vmatpush.bf16.msra.mxu0 %v504_v23  ;;  %591 = vmatpush.bf16.msra.mxu1 %v507_v24  ;;  %v4201_v13 = vld [vmem:[#allocation3 + $0x2e0] sm:$0xf]  ;;  %v4443_v14 = vld [vmem:[#allocation3 + $0x2ec] sm:$0xf0]  ;;  %s4787_s26 = scalar_lea.vmem %s6304_s0, %s4609_s20  ;;  %vm3604_vm3 = vcmask 7168  }
  0x15   : > { %v413_v7 = vld [vmem:[%s4621_s27] sm:$0xff]  ;;  %v414_v8 = vld [vmem:[%s4621_s27 + $0x8] sm:$0xff]  ;;  %660 = vmatpush.bf16.msra.mxu2 %v510_v25  ;;  %729 = vmatpush.bf16.msra.mxu3 %v513_v26  ;;  %v415_v29 = vld [vmem:[%s4621_s27 + $0x10] sm:$0xff]  ;;  %v4202_v16 = vor.u32 %v4443_v14, %v4201_v13  ;;  %s6202_s19 = scalar_lea.vmem %s6313_s9, %s4609_s20 }
  0x16   : > { %v437_v17 = vpack.c.bf16 %v414_v8, %v413_v7  ;;  %v416_v30 = vld [vmem:[%s4621_s27 + $0x18] sm:$0xff]  ;;  %v417_v32 = vld [vmem:[%s4621_s27 + $0x20] sm:$0xff]  ;;  %v418_v33 = vld [vmem:[%s4621_s27 + $0x28] sm:$0xff] }
  0x17   : > { %v438_v31 = vpack.c.bf16 %v416_v30, %v415_v29  ;;  %v439_v34 = vpack.c.bf16 %v418_v33, %v417_v32  ;;  %v419_v35 = vld [vmem:[%s4621_s27 + $0x30] sm:$0xff]  ;;  %v420_v36 = vld [vmem:[%s4621_s27 + $0x38] sm:$0xff]  ;;  %v421_v38 = vld [vmem:[%s4621_s27 + $0x40] sm:$0xff] }
  0x18   : > { %855 = vmatpush.bf16.msrb.mxu0 %v3770_v19  ;;  %3731 = vmatmul.msk.bf16.vlgmr.msra.gmra.mxu1 %vm465_vm1, %v437_v17  ;;  %v440_v37 = vpack.c.bf16 %v420_v36, %v419_v35  ;;  %v422_v39 = vld [vmem:[%s4621_s27 + $0x48] sm:$0xff]  ;;  %v423_v41 = vld [vmem:[%s4621_s27 + $0x50] sm:$0xff]  ;;  %v424_v42 = vld [vmem:[%s4621_s27 + $0x58] sm:$0xff] }
  0x19   : > { %993 = vmatpush.bf16.msrb.mxu2 %v3778_v18  ;;  %3719 = vmatmul.msk.bf16.vlgmr.msra.gmra.mxu0 %vm465_vm1, %v437_v17  ;;  %v441_v40 = vpack.c.bf16 %v422_v39, %v421_v38  ;;  %v442_v43 = vpack.c.bf16 %v424_v42, %v423_v41  ;;  %v425_v44 = vld [vmem:[%s4621_s27 + $0x60] sm:$0xff]  ;;  %v426_v45 = vld [vmem:[%s4621_s27 + $0x68] sm:$0xff]  ;;  %v427_v47 = vld [vmem:[%s4621_s27 + $0x70] sm:$0xff] }
  0x1a   : > { %3743 = vmatmul.msk.bf16.vlgmr.msra.gmra.mxu2 %vm465_vm1, %v437_v17  ;;  %3755 = vmatmul.msk.bf16.vlgmr.msra.gmra.mxu3 %vm465_vm1, %v437_v17  ;;  %v443_v46 = vpack.c.bf16 %v426_v45, %v425_v44  ;;  %v428_v48 = vld [vmem:[%s4621_s27 + $0x78] sm:$0xff]  ;;  %v429_v50 = vld [vmem:[%s4621_s27 + $0x80] sm:$0xff]  ;;  %v430_v51 = vld [vmem:[%s4621_s27 + $0x88] sm:$0xff] }
  0x1b   : > { %1062 = vmatpush.bf16.msrb.mxu3 %v3782_v27  ;;  %924 = vmatpush.bf16.msrb.mxu1 %v3774_v28  ;;  %v444_v49 = vpack.c.bf16 %v428_v48, %v427_v47  ;;  %v445_v52 = vpack.c.bf16 %v430_v51, %v429_v50  ;;  %v431_v59 = vld [vmem:[%s4621_s27 + $0x90] sm:$0xff]  ;;  %v432_v60 = vld [vmem:[%s4621_s27 + $0x98] sm:$0xff]  ;;  %v433_v6 = vld [vmem:[%s4621_s27 + $0xa0] sm:$0xff] }
  0x1c   : > { %v446_v63 = vpack.c.bf16 %v432_v60, %v431_v59  ;;  %v434_v7 = vld [vmem:[%s4621_s27 + $0xa8] sm:$0xff]  ;;  %v3945_v15 = vld [vmem:[#allocation3 + $0xe0] sm:$0xf]  ;;  %v4379_v17 = vld [vmem:[#allocation3 + $0xec] sm:$0xf0] }
  0x1d   : > { %v447_v10 = vpack.c.bf16 %v434_v7, %v433_v6  ;;  %v4329_v18 = vld [vmem:[#allocation3 + $0x3e0] sm:$0xf]  ;;  %v4475_v19 = vld [vmem:[#allocation3 + $0x3ec] sm:$0xf0]  ;;  %v3946_v20 = vor.u32 %v4379_v17, %v3945_v15  ;;  %2290 = vmatpush.bf16.msra.mxu2 %v4202_v16  ;;  %v436_v30 = vld [vmem:[%s4621_s27 + $0xb8] sm:$0xff] }
  0x1e   : > { %v4330_v21 = vor.u32 %v4475_v19, %v4329_v18  ;;  %v4073_v24 = vld [vmem:[#allocation3 + $0x1e0] sm:$0xf]  ;;  %v4411_v25 = vld [vmem:[#allocation3 + $0x1ec] sm:$0xf0]  ;;  %v378_v50 = vld [vmem:[%s4787_s26 + $0x8] sm:$0xff] }
  0x1f   : > { %2152 = vmatpush.bf16.msra.mxu0 %v3946_v20  ;;  %v4074_v28 = vor.u32 %v4411_v25, %v4073_v24  ;;  %v435_v29 = vld [vmem:[%s4621_s27 + $0xb0] sm:$0xff]  ;;  %v3929_v42 = vld [vmem:[#allocation3 + $0xc0] sm:$0xf]  ;;  %v380_v18 = vld [vmem:[%s4787_s26 + $0x18] sm:$0xff] }
  0x20   : > { %2359 = vmatpush.bf16.msra.mxu3 %v4330_v21  ;;  %v448_v33 = vpack.c.bf16 %v436_v30, %v435_v29  ;;  %v4439_v41 = vld [vmem:[#allocation3 + $0x2cc] sm:$0xf0]  ;;  %v4313_v45 = vld [vmem:[#allocation3 + $0x3c0] sm:$0xf] }
  0x21   : > { %2221 = vmatpush.bf16.msra.mxu1 %v4074_v28  ;;  %v4375_v44 = vld [vmem:[#allocation3 + $0xcc] sm:$0xf0]  ;;  %v4057_v60 = vld [vmem:[#allocation3 + $0x1c0] sm:$0xf] }
  0x22   : > { %v3930_v47 = vor.u32 %v4375_v44, %v3929_v42  ;;  %v379_v17 = vld [vmem:[%s4787_s26 + $0x10] sm:$0xff]  ;;  %v4169_v28 = vld [vmem:[#allocation3 + $0x2a0] sm:$0xf] }
  0x23   : > { %v402_v21 = vpack.c.bf16 %v380_v18, %v379_v17  ;;  %v4435_v29 = vld [vmem:[#allocation3 + $0x2ac] sm:$0xf0]  ;;  %v3913_v30 = vld [vmem:[#allocation3 + $0xa0] sm:$0xf] }
  0x24   : > { %2153 = vmatpush.bf16.msra.mxu0 %v3930_v47  ;;  %v4467_v42 = vld [vmem:[#allocation3 + $0x3ac] sm:$0xf0]  ;;  %v4041_v47 = vld [vmem:[#allocation3 + $0x1a0] sm:$0xf] }
  0x28   : > { %3732 = vmatmul.msk.bf16.gmra.mxu1 %vm465_vm1, %v438_v31 }
  0x29   : > { %3720 = vmatmul.msk.bf16.gmra.mxu0 %vm465_vm1, %v438_v31 }
  0x2a   : > { %3744 = vmatmul.msk.bf16.gmra.mxu2 %vm465_vm1, %v438_v31  ;;  %3756 = vmatmul.msk.bf16.gmra.mxu3 %vm465_vm1, %v438_v31 }
  0x38   : > { %3733 = vmatmul.msk.bf16.gmra.mxu1 %vm465_vm1, %v439_v34 }
  0x39   : > { %3721 = vmatmul.msk.bf16.gmra.mxu0 %vm465_vm1, %v439_v34 }
  0x3a   : > { %3745 = vmatmul.msk.bf16.gmra.mxu2 %vm465_vm1, %v439_v34  ;;  %3757 = vmatmul.msk.bf16.gmra.mxu3 %vm465_vm1, %v439_v34 }
  0x48   : > { %3734 = vmatmul.msk.bf16.gmra.mxu1 %vm465_vm1, %v440_v37 }
  0x49   : > { %3722 = vmatmul.msk.bf16.gmra.mxu0 %vm465_vm1, %v440_v37 }
  0x4a   : > { %3746 = vmatmul.msk.bf16.gmra.mxu2 %vm465_vm1, %v440_v37  ;;  %3758 = vmatmul.msk.bf16.gmra.mxu3 %vm465_vm1, %v440_v37 }
  0x58   : > { %3735 = vmatmul.msk.bf16.gmra.mxu1 %vm465_vm1, %v441_v40 }
  0x59   : > { %3723 = vmatmul.msk.bf16.gmra.mxu0 %vm465_vm1, %v441_v40 }
  0x5a   : > { %3747 = vmatmul.msk.bf16.gmra.mxu2 %vm465_vm1, %v441_v40  ;;  %3759 = vmatmul.msk.bf16.gmra.mxu3 %vm465_vm1, %v441_v40  ;;  %v4185_v40 = vld [vmem:[#allocation3 + $0x2c0] sm:$0xf] }
  0x68   : > { %3736 = vmatmul.msk.bf16.gmra.mxu1 %vm465_vm1, %v442_v43 }
  0x69   : > { %3724 = vmatmul.msk.bf16.gmra.mxu0 %vm465_vm1, %v442_v43 }
  0x6a   : > { %3748 = vmatmul.msk.bf16.gmra.mxu2 %vm465_vm1, %v442_v43  ;;  %3760 = vmatmul.msk.bf16.gmra.mxu3 %vm465_vm1, %v442_v43  ;;  %v4186_v43 = vor.u32 %v4439_v41, %v4185_v40  ;;  %v4371_v40 = vld [vmem:[#allocation3 + $0xac] sm:$0xf0]  ;;  %v4297_v41 = vld [vmem:[#allocation3 + $0x3a0] sm:$0xf] }
  0x6b   : > { %v4298_v44 = vor.u32 %v4467_v42, %v4297_v41  ;;  %v4153_v41 = vld [vmem:[#allocation3 + $0x280] sm:$0xf]  ;;  %v4431_v42 = vld [vmem:[#allocation3 + $0x28c] sm:$0xf0] }
  0x6c   : > { %2291 = vmatpush.bf16.msra.mxu2 %v4186_v43  ;;  %v3914_v43 = vor.u32 %v4371_v40, %v3913_v30 }
  0x6e   : > { %2154 = vmatpush.bf16.msra.mxu0 %v3914_v43  ;;  %v3897_v43 = vld [vmem:[#allocation3 + $0x80] sm:$0xf] }
  0x78   : > { %3737 = vmatmul.msk.bf16.gmra.mxu1 %vm465_vm1, %v443_v46 }
  0x79   : > { %3725 = vmatmul.msk.bf16.gmra.mxu0 %vm465_vm1, %v443_v46 }
  0x7a   : > { %3749 = vmatmul.msk.bf16.gmra.mxu2 %vm465_vm1, %v443_v46  ;;  %3761 = vmatmul.msk.bf16.gmra.mxu3 %vm465_vm1, %v443_v46  ;;  %v4471_v46 = vld [vmem:[#allocation3 + $0x3cc] sm:$0xf0] }
  0x7b   : > { %v4314_v48 = vor.u32 %v4471_v46, %v4313_v45 }
  0x7d   : > { %2360 = vmatpush.bf16.msra.mxu3 %v4314_v48  ;;  %v4403_v48 = vld [vmem:[#allocation3 + $0x1ac] sm:$0xf0] }
  0x81   : > { %2361 = vmatpush.bf16.msra.mxu3 %v4298_v44  ;;  %v4154_v44 = vor.u32 %v4431_v42, %v4153_v41 }
  0x88   : > { %3738 = vmatmul.msk.bf16.gmra.mxu1 %vm465_vm1, %v444_v49 }
  0x89   : > { %3726 = vmatmul.msk.bf16.gmra.mxu0 %vm465_vm1, %v444_v49 }
  0x8a   : > { %3750 = vmatmul.msk.bf16.gmra.mxu2 %vm465_vm1, %v444_v49  ;;  %3762 = vmatmul.msk.bf16.gmra.mxu3 %vm465_vm1, %v444_v49  ;;  %v377_v49 = vld [vmem:[%s4787_s26] sm:$0xff] }
  0x8b   : > { %v401_v59 = vpack.c.bf16 %v378_v50, %v377_v49 }
  0x95   : > { %v4703_v54 = vpop.f32.mrf.mxu1 }
  0x96   : > { %v4701_v53 = vpop.f32.mrf.mxu0 }
  0x98   : > { %3739 = vmatmul.msk.bf16.gmra.mxu1 %vm465_vm1, %v445_v52 }
  0x99   : > { %3727 = vmatmul.msk.bf16.gmra.mxu0 %vm465_vm1, %v445_v52 }
  0x9a   : > { %3751 = vmatmul.msk.bf16.gmra.mxu2 %vm465_vm1, %v445_v52  ;;  %3763 = vmatmul.msk.bf16.gmra.mxu3 %vm465_vm1, %v445_v52 }
  0x9d   : > { %v4709_v55 = vpop.f32.mrf.mxu2  ;;  %v4711_v56 = vpop.f32.mrf.mxu3 }
  0x9e   : > { %v4713_v57 = vpop.f32.mrf.mxu0  ;;  %v4715_v58 = vpop.f32.mrf.mxu1 }
  0xa5   : > { %v4719_v61 = vpop.f32.mrf.mxu2  ;;  %v4721_v62 = vpop.f32.mrf.mxu3 }
  0xa6   : > { %v4723_v0 = vpop.f32.mrf.mxu0  ;;  %v4725_v1 = vpop.f32.mrf.mxu1 }
  0xa8   : > { %3740 = vmatmul.msk.bf16.gmra.mxu1 %vm465_vm1, %v446_v63 }
  0xa9   : > { %3728 = vmatmul.msk.bf16.gmra.mxu0 %vm465_vm1, %v446_v63 }
  0xaa   : > { %3752 = vmatmul.msk.bf16.gmra.mxu2 %vm465_vm1, %v446_v63  ;;  %3764 = vmatmul.msk.bf16.gmra.mxu3 %vm465_vm1, %v446_v63  ;;  %v4407_v63 = vld [vmem:[#allocation3 + $0x1cc] sm:$0xf0] }
  0xad   : > { %v4731_v2 = vpop.f32.mrf.mxu2  ;;  %v4733_v3 = vpop.f32.mrf.mxu3 }
  0xae   : > { %v4735_v4 = vpop.f32.mrf.mxu0  ;;  %v4737_v5 = vpop.f32.mrf.mxu1 }
  0xb5   : > { %v4741_v8 = vpop.f32.mrf.mxu2  ;;  %v4743_v9 = vpop.f32.mrf.mxu3 }
  0xb6   : > { %v4745_v11 = vpop.f32.mrf.mxu0  ;;  %v4747_v12 = vpop.f32.mrf.mxu1 }
  0xb8   : > { %3741 = vmatmul.msk.bf16.gmra.mxu1 %vm465_vm1, %v447_v10 }
  0xb9   : > { %3729 = vmatmul.msk.bf16.gmra.mxu0 %vm465_vm1, %v447_v10 }
  0xba   : > { %3753 = vmatmul.msk.bf16.gmra.mxu2 %vm465_vm1, %v447_v10  ;;  %3765 = vmatmul.msk.bf16.gmra.mxu3 %vm465_vm1, %v447_v10  ;;  %v4058_v10 = vor.u32 %v4407_v63, %v4057_v60  ;;  %v381_v60 = vld [vmem:[%s4787_s26 + $0x20] sm:$0xff]  ;;  %v382_v63 = vld [vmem:[%s4787_s26 + $0x28] sm:$0xff] }
  0xbb   : > { %v403_v18 = vpack.c.bf16 %v382_v63, %v381_v60 }
  0xbc   : > { %2222 = vmatpush.bf16.msra.mxu1 %v4058_v10 }
  0xbd   : > { %v4753_v22 = vpop.f32.mrf.mxu2  ;;  %v4755_v23 = vpop.f32.mrf.mxu3 }
  0xbe   : > { %v4757_v26 = vpop.f32.mrf.mxu0  ;;  %v4759_v27 = vpop.f32.mrf.mxu1 }
  0xc5   : > { %v4763_v31 = vpop.f32.mrf.mxu2  ;;  %v4765_v32 = vpop.f32.mrf.mxu3 }
  0xc6   : > { %v4767_v34 = vpop.f32.mrf.mxu0  ;;  %v4769_v35 = vpop.f32.mrf.mxu1 }
  0xc7   : > { %6367 = vst [vmem:[#allocation6_spill] sm:$0xff] %v4769_v35 }
  0xc8   : > { %3742 = vmatmul.msk.bf16.gmra.mxu1 %vm465_vm1, %v448_v33 }
  0xc9   : > { %3730 = vmatmul.msk.bf16.gmra.mxu0 %vm465_vm1, %v448_v33 }
  0xca   : > { %3754 = vmatmul.msk.bf16.gmra.mxu2 %vm465_vm1, %v448_v33  ;;  %3766 = vmatmul.msk.bf16.gmra.mxu3 %vm465_vm1, %v448_v33  ;;  %v4170_v33 = vor.u32 %v4435_v29, %v4169_v28 }
  0xcc   : > { %2292 = vmatpush.bf16.msra.mxu2 %v4170_v33 }
  0xcd   : > { %v4775_v36 = vpop.f32.mrf.mxu2  ;;  %v4777_v37 = vpop.f32.mrf.mxu3 }
  0xce   : > { %6368 = vst [vmem:[#allocation7_spill] sm:$0xff] %v4775_v36  ;;  %v4779_v38 = vpop.f32.mrf.mxu0  ;;  %v4781_v39 = vpop.f32.mrf.mxu1 }
  0xcf   : > { %6369 = vst [vmem:[#allocation8_spill] sm:$0xff] %v4777_v37  ;;  %v4075_v37 = vld [vmem:[#allocation3 + $0x1f0] sm:$0xf0] }
  0xd0   : > { %6370 = vst [vmem:[#allocation9_spill] sm:$0xff] %v4779_v38  ;;  %2293 = vmatpush.bf16.msra.mxu2 %v4154_v44 }
  0xd1   : > { %6371 = vst [vmem:[#allocation10_spill] sm:$0xff] %v4781_v39 }
  0xd5   : > { %v4791_v51 = vpop.f32.mrf.mxu2  ;;  %v4793_v52 = vpop.f32.mrf.mxu3 }
  0xd6   : > { %6372 = vst [vmem:[#allocation11_spill] sm:$0xff] %v4791_v51  ;;  %v4795_v6 = vpop.f32.mrf.mxu0  ;;  %v4797_v7 = vpop.f32.mrf.mxu1  ;;  %v4409_v51 = vld [vmem:[#allocation3 + $0x1e4] sm:$0xf] }
  0xd7   : > { %6373 = vst [vmem:[#allocation12_spill] sm:$0xff] %v4793_v52  ;;  %v400_v52 = vld [vmem:[%s4787_s26 + $0xb8] sm:$0xff]  ;;  %v4078_v36 = vor.u32 %v4409_v51, %v4075_v37 }
  0xd8   : > { %6374 = vst [vmem:[#allocation13_spill] sm:$0xff] %v4795_v6  ;;  %3795 = vmatmul.msk.bf16.vlgmr.msrb.gmra.mxu1 %vm811_vm2, %v401_v59  ;;  %v4331_v6 = vld [vmem:[#allocation3 + $0x3f0] sm:$0xf0] }
  0xd9   : > { %6375 = vst [vmem:[#allocation14_spill] sm:$0xff] %v4797_v7  ;;  %3783 = vmatmul.msk.bf16.vlgmr.msrb.gmra.mxu0 %vm811_vm2, %v401_v59  ;;  %v4473_v7 = vld [vmem:[#allocation3 + $0x3e4] sm:$0xf] }
  0xda   : > { %3807 = vmatmul.msk.bf16.vlgmr.msrb.gmra.mxu2 %vm811_vm2, %v401_v59  ;;  %3819 = vmatmul.msk.bf16.vlgmr.msrb.gmra.mxu3 %vm811_vm2, %v401_v59  ;;  %v4042_v59 = vor.u32 %v4403_v48, %v4041_v47  ;;  %v4367_v47 = vld [vmem:[#allocation3 + $0x8c] sm:$0xf0]  ;;  %v4281_v48 = vld [vmem:[#allocation3 + $0x380] sm:$0xf] }
  0xdb   : > { %v3898_v60 = vor.u32 %v4367_v47, %v3897_v43 }
  0xdc   : > { %2223 = vmatpush.bf16.msra.mxu1 %v4042_v59  ;;  %v4463_v59 = vld [vmem:[#allocation3 + $0x38c] sm:$0xf0] }
  0xdd   : > { %v4803_v13 = vpop.f32.mrf.mxu2  ;;  %v4805_v14 = vpop.f32.mrf.mxu3  ;;  %v4282_v63 = vor.u32 %v4463_v59, %v4281_v48  ;;  %2155 = vmatpush.bf16.msra.mxu0 %v3898_v60  ;;  %v385_v59 = vld [vmem:[%s4787_s26 + $0x40] sm:$0xff]  ;;  %v386_v60 = vld [vmem:[%s4787_s26 + $0x48] sm:$0xff] }
  0xde   : > { %6376 = vst [vmem:[#allocation15_spill] sm:$0xff] %v4803_v13  ;;  %v4807_v15 = vpop.f32.mrf.mxu0  ;;  %v4809_v16 = vpop.f32.mrf.mxu1  ;;  %v3947_v13 = vld [vmem:[#allocation3 + $0xf0] sm:$0xf0] }
  0xdf   : > { %6377 = vst [vmem:[#allocation16_spill] sm:$0xff] %v4805_v14  ;;  %2362 = vmatpush.bf16.msra.mxu3 %v4282_v63  ;;  %v405_v63 = vpack.c.bf16 %v386_v60, %v385_v59  ;;  %v4459_v59 = vld [vmem:[#allocation3 + $0x36c] sm:$0xf0] }
  0xe0   : > { %6378 = vst [vmem:[#allocation17_spill] sm:$0xff] %v4807_v15  ;;  %v4334_v15 = vor.u32 %v4473_v7, %v4331_v6  ;;  %v1124_v6 = vld [vmem:[%s6308_s4] sm:$0xf] }
  0xe1   : > { %6379 = vst [vmem:[#allocation18_spill] sm:$0xff] %v4809_v16  ;;  %v5046_v7 = vperm.slane %v1124_v6, 0  ;;  %v5048_v37 = vperm.slane %v1124_v6, 1  ;;  %v5050_v51 = vperm.slane %v1124_v6, 2 }
  0xe5   : > { %v4813_v19 = vpop.f32.mrf.mxu2  ;;  %v4815_v20 = vpop.f32.mrf.mxu3 }
  0xe6   : > { %6380 = vst [vmem:[#allocation19_spill] sm:$0xff] %v4813_v19  ;;  %v4817_v24 = vpop.f32.mrf.mxu0  ;;  %v4819_v25 = vpop.f32.mrf.mxu1 }
  0xe7   : > { %6381 = vst [vmem:[#allocation20_spill] sm:$0xff] %v4815_v20 }
  0xe8   : > { %6382 = vst [vmem:[#allocation21_spill] sm:$0xff] %v4817_v24  ;;  %3796 = vmatmul.msk.bf16.gmra.mxu1 %vm811_vm2, %v402_v21  ;;  %v4447_v24 = vld [vmem:[#allocation3 + $0x30c] sm:$0xf0] }
  0xe9   : > { %6383 = vst [vmem:[#allocation22_spill] sm:$0xff] %v4819_v25  ;;  %3784 = vmatmul.msk.bf16.gmra.mxu0 %vm811_vm2, %v402_v21  ;;  %v4217_v25 = vld [vmem:[#allocation3 + $0x300] sm:$0xf] }
  0xea   : > { %3808 = vmatmul.msk.bf16.gmra.mxu2 %vm811_vm2, %v402_v21  ;;  %3820 = vmatmul.msk.bf16.gmra.mxu3 %vm811_vm2, %v402_v21 }
  0xed   : > { %v4825_v45 = vpop.f32.mrf.mxu2  ;;  %v4827_v46 = vpop.f32.mrf.mxu3 }
  0xee   : > { %6384 = vst [vmem:[#allocation23_spill] sm:$0xff] %v4825_v45  ;;  %v4829_v49 = vpop.f32.mrf.mxu0  ;;  %v4831_v50 = vpop.f32.mrf.mxu1  ;;  %v4351_v45 = vld [vmem:[#allocation3 + $0xc] sm:$0xf0] }
  0xef   : > { %6385 = vst [vmem:[#allocation24_spill] sm:$0xff] %v4827_v46 }
  0xf0   : > { %6386 = vst [vmem:[#allocation25_spill] sm:$0xff] %v4829_v49 }
  0xf1   : > { %6387 = vst [vmem:[#allocation26_spill] sm:$0xff] %v4831_v50 }
  0xf5   : > { %v4835_v10 = vpop.f32.mrf.mxu2  ;;  %v4837_v17 = vpop.f32.mrf.mxu3 }
  0xf6   : > { %6388 = vst [vmem:[#allocation27_spill] sm:$0xff] %v4835_v10  ;;  %v4839_v21 = vpop.f32.mrf.mxu0  ;;  %v4841_v28 = vpop.f32.mrf.mxu1  ;;  %v4218_v10 = vor.u32 %v4447_v24, %v4217_v25 }
  0xf7   : > { %6389 = vst [vmem:[#allocation28_spill] sm:$0xff] %v4837_v17 }
  0xf8   : > { %6390 = vst [vmem:[#allocation29_spill] sm:$0xff] %v4839_v21  ;;  %3797 = vmatmul.msk.bf16.gmra.mxu1 %vm811_vm2, %v403_v18  ;;  %v4399_v21 = vld [vmem:[#allocation3 + $0x18c] sm:$0xf0] }
  0xf9   : > { %6391 = vst [vmem:[#allocation30_spill] sm:$0xff] %v4841_v28  ;;  %3785 = vmatmul.msk.bf16.gmra.mxu0 %vm811_vm2, %v403_v18  ;;  %v384_v28 = vld [vmem:[%s4787_s26 + $0x38] sm:$0xff] }
  0xfa   : > { %3809 = vmatmul.msk.bf16.gmra.mxu2 %vm811_vm2, %v403_v18  ;;  %3821 = vmatmul.msk.bf16.gmra.mxu3 %vm811_vm2, %v403_v18  ;;  %v383_v18 = vld [vmem:[%s4787_s26 + $0x30] sm:$0xff] }
  0xfd   : > { %v4847_v29 = vpop.f32.mrf.mxu2  ;;  %v4849_v30 = vpop.f32.mrf.mxu3 }
  0xfe   : > { %6392 = vst [vmem:[#allocation31_spill] sm:$0xff] %v4847_v29  ;;  %v4851_v33 = vpop.f32.mrf.mxu0  ;;  %v4853_v40 = vpop.f32.mrf.mxu1 }
  0xff   : > { %6393 = vst [vmem:[#allocation32_spill] sm:$0xff] %v4849_v30 }
 0x100   : > { %6394 = vst [vmem:[#allocation33_spill] sm:$0xff] %v4851_v33  ;;  %v4025_v33 = vld [vmem:[#allocation3 + $0x180] sm:$0xf] }
 0x101   : > { %6395 = vst [vmem:[#allocation34_spill] sm:$0xff] %v4853_v40  ;;  %v404_v40 = vpack.c.bf16 %v384_v28, %v383_v18  ;;  %v4026_v43 = vor.u32 %v4399_v21, %v4025_v33 }
 0x103   : > { %2224 = vmatpush.bf16.msra.mxu1 %v4026_v43 }
 0x105   : > { %v4857_v29 = vpop.f32.mrf.mxu2  ;;  %v4859_v30 = vpop.f32.mrf.mxu3 }
 0x106   : > { %6396 = vst [vmem:[#allocation35_spill] sm:$0xff] %v4857_v29  ;;  %v4861_v41 = vpop.f32.mrf.mxu0  ;;  %v4863_v42 = vpop.f32.mrf.mxu1  ;;  %v388_v29 = vld [vmem:[%s4787_s26 + $0x58] sm:$0xff] }
 0x107   : > { %6397 = vst [vmem:[#allocation36_spill] sm:$0xff] %v4859_v30 }
 0x108   : > { %6398 = vst [vmem:[#allocation37_spill] sm:$0xff] %v4861_v41  ;;  %3798 = vmatmul.msk.bf16.gmra.mxu1 %vm811_vm2, %v404_v40  ;;  %v4363_v41 = vld [vmem:[#allocation3 + $0x6c] sm:$0xf0] }
 0x109   : > { %6399 = vst [vmem:[#allocation38_spill] sm:$0xff] %v4863_v42  ;;  %3786 = vmatmul.msk.bf16.gmra.mxu0 %vm811_vm2, %v404_v40 }
 0x10a   : > { %3810 = vmatmul.msk.bf16.gmra.mxu2 %vm811_vm2, %v404_v40  ;;  %3822 = vmatmul.msk.bf16.gmra.mxu3 %vm811_vm2, %v404_v40  ;;  %v4137_v40 = vld [vmem:[#allocation3 + $0x260] sm:$0xf] }
 0x10d   : > { %v4869_v44 = vpop.f32.mrf.mxu2  ;;  %v4871_v28 = vpop.f32.mrf.mxu3 }
 0x10e   : > { %6400 = vst [vmem:[#allocation39_spill] sm:$0xff] %v4869_v44  ;;  %v4873_v47 = vpop.f32.mrf.mxu0  ;;  %v4875_v48 = vpop.f32.mrf.mxu1  ;;  %v3881_v44 = vld [vmem:[#allocation3 + $0x60] sm:$0xf] }
 0x10f   : > { %6401 = vst [vmem:[#allocation40_spill] sm:$0xff] %v4871_v28  ;;  %v4427_v28 = vld [vmem:[#allocation3 + $0x26c] sm:$0xf0]  ;;  %v3882_v60 = vor.u32 %v4363_v41, %v3881_v44 }
 0x110   : > { %6402 = vst [vmem:[#allocation41_spill] sm:$0xff] %v4873_v47  ;;  %v4138_v42 = vor.u32 %v4427_v28, %v4137_v40  ;;  %v4395_v47 = vld [vmem:[#allocation3 + $0x16c] sm:$0xf0] }
 0x111   : > { %6403 = vst [vmem:[#allocation42_spill] sm:$0xff] %v4875_v48  ;;  %v4009_v48 = vld [vmem:[#allocation3 + $0x160] sm:$0xf]  ;;  %2156 = vmatpush.bf16.msra.mxu0 %v3882_v60  ;;  %v387_v40 = vld [vmem:[%s4787_s26 + $0x50] sm:$0xff] }
 0x112   : > { %2294 = vmatpush.bf16.msra.mxu2 %v4138_v42  ;;  %v4010_v28 = vor.u32 %v4395_v47, %v4009_v48  ;;  %v406_v44 = vpack.c.bf16 %v388_v29, %v387_v40  ;;  %v4423_v60 = vld [vmem:[#allocation3 + $0x24c] sm:$0xf0] }
 0x114   : > { %2225 = vmatpush.bf16.msra.mxu1 %v4010_v28  ;;  %v3865_v28 = vld [vmem:[#allocation3 + $0x40] sm:$0xf] }
 0x115   : > { %v4879_v21 = vpop.f32.mrf.mxu2  ;;  %v4881_v33 = vpop.f32.mrf.mxu3 }
 0x116   : > { %6404 = vst [vmem:[#allocation43_spill] sm:$0xff] %v4879_v21  ;;  %v4883_v18 = vpop.f32.mrf.mxu0  ;;  %v4885_v43 = vpop.f32.mrf.mxu1 }
 0x117   : > { %6405 = vst [vmem:[#allocation44_spill] sm:$0xff] %v4881_v33  ;;  %v4265_v33 = vld [vmem:[#allocation3 + $0x360] sm:$0xf] }
 0x118   : > { %6406 = vst [vmem:[#allocation45_spill] sm:$0xff] %v4883_v18  ;;  %3799 = vmatmul.msk.bf16.gmra.mxu1 %vm811_vm2, %v405_v63  ;;  %v4266_v18 = vor.u32 %v4459_v59, %v4265_v33  ;;  %v4121_v59 = vld [vmem:[#allocation3 + $0x240] sm:$0xf] }
 0x119   : > { %6407 = vst [vmem:[#allocation46_spill] sm:$0xff] %v4885_v43  ;;  %3787 = vmatmul.msk.bf16.gmra.mxu0 %vm811_vm2, %v405_v63  ;;  %v4122_v40 = vor.u32 %v4423_v60, %v4121_v59 }
 0x11a   : > { %3811 = vmatmul.msk.bf16.gmra.mxu2 %vm811_vm2, %v405_v63  ;;  %3823 = vmatmul.msk.bf16.gmra.mxu3 %vm811_vm2, %v405_v63 }
 0x11b   : > { %2363 = vmatpush.bf16.msra.mxu3 %v4266_v18  ;;  %2295 = vmatpush.bf16.msra.mxu2 %v4122_v40 }
 0x11d   : > { %v4891_v43 = vpop.f32.mrf.mxu2  ;;  %v4893_v21 = vpop.f32.mrf.mxu3 }
 0x11e   : > { %6408 = vst [vmem:[#allocation47_spill] sm:$0xff] %v4891_v43  ;;  %v4895_v30 = vpop.f32.mrf.mxu0  ;;  %v4897_v63 = vpop.f32.mrf.mxu1 }
 0x11f   : > { %6409 = vst [vmem:[#allocation48_spill] sm:$0xff] %v4893_v21  ;;  %v4455_v21 = vld [vmem:[#allocation3 + $0x34c] sm:$0xf0] }
 0x120   : > { %6410 = vst [vmem:[#allocation49_spill] sm:$0xff] %v4895_v30  ;;  %v4387_v30 = vld [vmem:[#allocation3 + $0x12c] sm:$0xf0] }
 0x121   : > { %6411 = vst [vmem:[#allocation50_spill] sm:$0xff] %v4897_v63  ;;  %v4391_v63 = vld [vmem:[#allocation3 + $0x14c] sm:$0xf0] }
 0x125   : > { %v4901_v46 = vpop.f32.mrf.mxu2  ;;  %v4903_v41 = vpop.f32.mrf.mxu3 }
 0x126   : > { %6412 = vst [vmem:[#allocation51_spill] sm:$0xff] %v4901_v46  ;;  %v4905_v33 = vpop.f32.mrf.mxu0  ;;  %v4907_v42 = vpop.f32.mrf.mxu1  ;;  %v390_v46 = vld [vmem:[%s4787_s26 + $0x68] sm:$0xff] }
 0x127   : > { %6413 = vst [vmem:[#allocation52_spill] sm:$0xff] %v4903_v41 }
 0x128   : > { %6414 = vst [vmem:[#allocation53_spill] sm:$0xff] %v4905_v33  ;;  %3800 = vmatmul.msk.bf16.gmra.mxu1 %vm811_vm2, %v406_v44  ;;  %v4249_v33 = vld [vmem:[#allocation3 + $0x340] sm:$0xf] }
 0x129   : > { %6415 = vst [vmem:[#allocation54_spill] sm:$0xff] %v4907_v42  ;;  %3788 = vmatmul.msk.bf16.gmra.mxu0 %vm811_vm2, %v406_v44  ;;  %v4359_v42 = vld [vmem:[#allocation3 + $0x4c] sm:$0xf0]  ;;  %v4250_v41 = vor.u32 %v4455_v21, %v4249_v33 }
 0x12a   : > { %3812 = vmatmul.msk.bf16.gmra.mxu2 %vm811_vm2, %v406_v44  ;;  %3824 = vmatmul.msk.bf16.gmra.mxu3 %vm811_vm2, %v406_v44  ;;  %v3866_v43 = vor.u32 %v4359_v42, %v3865_v28  ;;  %v389_v44 = vld [vmem:[%s4787_s26 + $0x60] sm:$0xff]  ;;  %v391_v33 = vld [vmem:[%s4787_s26 + $0x70] sm:$0xff]  ;;  %v392_v28 = vld [vmem:[%s4787_s26 + $0x78] sm:$0xff] }
 0x12b   : > { %2364 = vmatpush.bf16.msra.mxu3 %v4250_v41  ;;  %v408_v40 = vpack.c.bf16 %v392_v28, %v391_v33 }
 0x12c   : > { %2157 = vmatpush.bf16.msra.mxu0 %v3866_v43 }
 0x12d   : > { %v4913_v47 = vpop.f32.mrf.mxu2  ;;  %v4915_v48 = vpop.f32.mrf.mxu3 }
 0x12e   : > { %6416 = vst [vmem:[#allocation55_spill] sm:$0xff] %v4913_v47  ;;  %v4917_v18 = vpop.f32.mrf.mxu0  ;;  %v4919_v29 = vpop.f32.mrf.mxu1 }
 0x12f   : > { %6417 = vst [vmem:[#allocation56_spill] sm:$0xff] %v4915_v48 }
 0x130   : > { %6418 = vst [vmem:[#allocation57_spill] sm:$0xff] %v4917_v18  ;;  %v3993_v18 = vld [vmem:[#allocation3 + $0x140] sm:$0xf] }
 0x131   : > { %6419 = vst [vmem:[#allocation58_spill] sm:$0xff] %v4919_v29  ;;  %v407_v29 = vpack.c.bf16 %v390_v46, %v389_v44  ;;  %v3994_v42 = vor.u32 %v4391_v63, %v3993_v18 }
 0x133   : > { %2226 = vmatpush.bf16.msra.mxu1 %v3994_v42 }
 0x135   : > { %v4923_v47 = vpop.f32.mrf.mxu2  ;;  %v4925_v48 = vpop.f32.mrf.mxu3 }
 0x136   : > { %6420 = vst [vmem:[#allocation59_spill] sm:$0xff] %v4923_v47  ;;  %v4927_v59 = vpop.f32.mrf.mxu0  ;;  %v4929_v60 = vpop.f32.mrf.mxu1  ;;  %v3977_v47 = vld [vmem:[#allocation3 + $0x120] sm:$0xf] }
 0x137   : > { %6421 = vst [vmem:[#allocation60_spill] sm:$0xff] %v4925_v48  ;;  %v394_v48 = vld [vmem:[%s4787_s26 + $0x88] sm:$0xff] }
 0x138   : > { %6422 = vst [vmem:[#allocation61_spill] sm:$0xff] %v4927_v59  ;;  %3801 = vmatmul.msk.bf16.gmra.mxu1 %vm811_vm2, %v407_v29  ;;  %v4451_v59 = vld [vmem:[#allocation3 + $0x32c] sm:$0xf0] }
 0x139   : > { %6423 = vst [vmem:[#allocation62_spill] sm:$0xff] %v4929_v60  ;;  %3789 = vmatmul.msk.bf16.gmra.mxu0 %vm811_vm2, %v407_v29 }
 0x13a   : > { %3813 = vmatmul.msk.bf16.gmra.mxu2 %vm811_vm2, %v407_v29  ;;  %3825 = vmatmul.msk.bf16.gmra.mxu3 %vm811_vm2, %v407_v29  ;;  %v4105_v29 = vld [vmem:[#allocation3 + $0x220] sm:$0xf] }
 0x13d   : > { %v4935_v21 = vpop.f32.mrf.mxu2  ;;  %v4937_v46 = vpop.f32.mrf.mxu3 }
 0x13e   : > { %6424 = vst [vmem:[#allocation63_spill] sm:$0xff] %v4935_v21  ;;  %v4939_v43 = vpop.f32.mrf.mxu0  ;;  %v4941_v41 = vpop.f32.mrf.mxu1  ;;  %v3849_v21 = vld [vmem:[#allocation3 + $0x20] sm:$0xf] }
 0x13f   : > { %6425 = vst [vmem:[#allocation64_spill] sm:$0xff] %v4937_v46  ;;  %v4419_v46 = vld [vmem:[#allocation3 + $0x22c] sm:$0xf0] }
 0x140   : > { %6426 = vst [vmem:[#allocation65_spill] sm:$0xff] %v4939_v43  ;;  %v4106_v28 = vor.u32 %v4419_v46, %v4105_v29 }
 0x141   : > { %6427 = vst [vmem:[#allocation66_spill] sm:$0xff] %v4941_v41 }
 0x142   : > { %2296 = vmatpush.bf16.msra.mxu2 %v4106_v28  ;;  %v4089_v28 = vld [vmem:[#allocation3 + $0x200] sm:$0xf] }
 0x145   : > { %v4945_v63 = vpop.f32.mrf.mxu2  ;;  %v4947_v18 = vpop.f32.mrf.mxu3 }
 0x146   : > { %6428 = vst [vmem:[#allocation67_spill] sm:$0xff] %v4945_v63  ;;  %v4949_v44 = vpop.f32.mrf.mxu0  ;;  %v4951_v42 = vpop.f32.mrf.mxu1 }
 0x147   : > { %6429 = vst [vmem:[#allocation68_spill] sm:$0xff] %v4947_v18 }
 0x148   : > { %6430 = vst [vmem:[#allocation69_spill] sm:$0xff] %v4949_v44  ;;  %3802 = vmatmul.msk.bf16.gmra.mxu1 %vm811_vm2, %v408_v40  ;;  %v4355_v44 = vld [vmem:[#allocation3 + $0x2c] sm:$0xf0] }
 0x149   : > { %6431 = vst [vmem:[#allocation70_spill] sm:$0xff] %v4951_v42  ;;  %3790 = vmatmul.msk.bf16.gmra.mxu0 %vm811_vm2, %v408_v40  ;;  %v4233_v42 = vld [vmem:[#allocation3 + $0x320] sm:$0xf]  ;;  %v3850_v41 = vor.u32 %v4355_v44, %v3849_v21 }
 0x14a   : > { %3814 = vmatmul.msk.bf16.gmra.mxu2 %vm811_vm2, %v408_v40  ;;  %3826 = vmatmul.msk.bf16.gmra.mxu3 %vm811_vm2, %v408_v40  ;;  %v4234_v43 = vor.u32 %v4451_v59, %v4233_v42  ;;  %v393_v40 = vld [vmem:[%s4787_s26 + $0x80] sm:$0xff] }
 0x14b   : > { %2158 = vmatpush.bf16.msra.mxu0 %v3850_v41 }
 0x14c   : > { %2365 = vmatpush.bf16.msra.mxu3 %v4234_v43  ;;  %v396_v43 = vld [vmem:[%s4787_s26 + $0x98] sm:$0xff] }
 0x14d   : > { %v4957_v60 = vpop.f32.mrf.mxu2  ;;  %v4959_v33 = vpop.f32.mrf.mxu3 }
 0x14e   : > { %6432 = vst [vmem:[#allocation71_spill] sm:$0xff] %v4957_v60  ;;  %v4961_v18 = vpop.f32.mrf.mxu0  ;;  %v4963_v63 = vpop.f32.mrf.mxu1  ;;  %v3978_v60 = vor.u32 %v4387_v30, %v3977_v47 }
 0x14f   : > { %6433 = vst [vmem:[#allocation72_spill] sm:$0xff] %v4959_v33  ;;  %v409_v33 = vpack.c.bf16 %v394_v48, %v393_v40  ;;  %v4415_v40 = vld [vmem:[#allocation3 + $0x20c] sm:$0xf0] }
 0x150   : > { %6434 = vst [vmem:[#allocation73_spill] sm:$0xff] %v4961_v18  ;;  %2227 = vmatpush.bf16.msra.mxu1 %v3978_v60  ;;  %v395_v60 = vld [vmem:[%s4787_s26 + $0x90] sm:$0xff]  ;;  %2366 = vmatpush.bf16.msra.mxu3 %v4218_v10 }
 0x151   : > { %6435 = vst [vmem:[#allocation74_spill] sm:$0xff] %v4963_v63  ;;  %v410_v42 = vpack.c.bf16 %v396_v43, %v395_v60  ;;  %v4090_v63 = vor.u32 %v4415_v40, %v4089_v28  ;;  %v3961_v60 = vld [vmem:[#allocation3 + $0x100] sm:$0xf]  ;;  %v4383_v43 = vld [vmem:[#allocation3 + $0x10c] sm:$0xf0] }
 0x152   : > { %v3962_v24 = vor.u32 %v4383_v43, %v3961_v60  ;;  %v4441_v60 = vld [vmem:[#allocation3 + $0x2e4] sm:$0xf]  ;;  %v4203_v43 = vld [vmem:[#allocation3 + $0x2f0] sm:$0xf0] }
 0x153   : > { %2297 = vmatpush.bf16.msra.mxu2 %v4090_v63  ;;  %v397_v63 = vld [vmem:[%s4787_s26 + $0xa0] sm:$0xff] }
 0x154   : > { %2228 = vmatpush.bf16.msra.mxu1 %v3962_v24  ;;  %v4377_v24 = vld [vmem:[#allocation3 + $0xe4] sm:$0xf]  ;;  %2635 = vmatpush.bf16.msrb.mxu3 %v4334_v15 }
 0x155   : > { %v4967_v46 = vpop.f32.mrf.mxu2  ;;  %v4969_v29 = vpop.f32.mrf.mxu3  ;;  %v3950_v16 = vor.u32 %v4377_v24, %v3947_v13 }
 0x156   : > { %6436 = vst [vmem:[#allocation75_spill] sm:$0xff] %v4967_v46  ;;  %v4971_v18 = vpop.f32.mrf.mxu0  ;;  %v4973_v21 = vpop.f32.mrf.mxu1 }
 0x157   : > { %6437 = vst [vmem:[#allocation76_spill] sm:$0xff] %v4969_v29  ;;  %v3833_v29 = vld [vmem:[#allocation3] sm:$0xf]  ;;  %v927_v13 = vadd.f32 %v4973_v21, %v4703_v54 }
 0x158   : > { %3803 = vmatmul.msk.bf16.gmra.mxu1 %vm811_vm2, %v409_v33  ;;  %v3834_v17 = vor.u32 %v4351_v45, %v3833_v29  ;;  %v398_v29 = vld [vmem:[%s4787_s26 + $0xa8] sm:$0xff] }
 0x159   : > { %3791 = vmatmul.msk.bf16.gmra.mxu0 %vm811_vm2, %v409_v33  ;;  %2497 = vmatpush.bf16.msrb.mxu1 %v4078_v36  ;;  %v858_v36 = vadd.f32 %v4971_v18, %v4701_v53 }
 0x15a   : > { %3815 = vmatmul.msk.bf16.gmra.mxu2 %vm811_vm2, %v409_v33  ;;  %3827 = vmatmul.msk.bf16.gmra.mxu3 %vm811_vm2, %v409_v33 }
 0x15b   : > { %2159 = vmatpush.bf16.msra.mxu0 %v3834_v17  ;;  %v411_v17 = vpack.c.bf16 %v398_v29, %v397_v63  ;;  %v4206_v29 = vor.u32 %v4441_v60, %v4203_v43 }
 0x15d   : > { %v4979_v30 = vpop.f32.mrf.mxu2  ;;  %v4981_v47 = vpop.f32.mrf.mxu3  ;;  %2566 = vmatpush.bf16.msrb.mxu2 %v4206_v29 }
 0x15e   : > { %v4983_v59 = vpop.f32.mrf.mxu0  ;;  %v4985_v48 = vpop.f32.mrf.mxu1  ;;  %v996_v24 = vadd.f32 %v4979_v30, %v4709_v55  ;;  %v1065_v29 = vadd.f32 %v4981_v47, %v4711_v56  ;;  %v1135_v55 = vadd.f32 %v5048_v37, %v927_v13 }
 0x15f   : > { %2428 = vmatpush.bf16.msrb.mxu0 %v3950_v16  ;;  %v860_v15 = vadd.f32 %v4983_v59, %v4713_v57  ;;  %v929_v16 = vadd.f32 %v4985_v48, %v4715_v58  ;;  %v1134_v58 = vadd.f32 %v5046_v7, %v858_v36 }
 0x161   : > { %v1138_v56 = vadd.f32 %v5046_v7, %v860_v15  ;;  %v1139_v30 = vadd.f32 %v5048_v37, %v929_v16  ;;  %v1230_v48 = vmax.f32 %v1134_v58, 0.0  ;;  %v4437_v16 = vld [vmem:[#allocation3 + $0x2c4] sm:$0xf]  ;;  %v3931_v58 = vld [vmem:[#allocation3 + $0xd0] sm:$0xf0] }
 0x165   : > { %v4989_v41 = vpop.f32.mrf.mxu2  ;;  %v4991_v44 = vpop.f32.mrf.mxu3 }
 0x166   : > { %v4993_v46 = vpop.f32.mrf.mxu0  ;;  %v4995_v33 = vpop.f32.mrf.mxu1  ;;  %v1067_v53 = vadd.f32 %v4991_v44, %v4721_v62  ;;  %v1234_v44 = vmax.f32 %v1138_v56, 0.0  ;;  %v4315_v56 = vld [vmem:[#allocation3 + $0x3d0] sm:$0xf0] }
 0x168   : > { %3804 = vmatmul.msk.bf16.gmra.mxu1 %vm811_vm2, %v410_v42 }
 0x169   : > { %3792 = vmatmul.msk.bf16.gmra.mxu0 %vm811_vm2, %v410_v42 }
 0x16a   : > { %3816 = vmatmul.msk.bf16.gmra.mxu2 %vm811_vm2, %v410_v42  ;;  %3828 = vmatmul.msk.bf16.gmra.mxu3 %vm811_vm2, %v410_v42 }
 0x16d   : > { %v5001_v28 = vpop.f32.mrf.mxu2  ;;  %v5003_v40 = vpop.f32.mrf.mxu3 }
 0x16e   : > { %v5005_v25 = vpop.f32.mrf.mxu0  ;;  %v5007_v45 = vpop.f32.mrf.mxu1 }
 0x175   : > { %v5011_v50 = vpop.f32.mrf.mxu2  ;;  %v5013_v49 = vpop.f32.mrf.mxu3 }
 0x176   : > { %v5015_v10 = vpop.f32.mrf.mxu0  ;;  %v5017_v42 = vpop.f32.mrf.mxu1 }
 0x178   : > { %3805 = vmatmul.msk.bf16.gmra.mxu1 %vm811_vm2, %v411_v17 }
 0x179   : > { %3793 = vmatmul.msk.bf16.gmra.mxu0 %vm811_vm2, %v411_v17 }
 0x17a   : > { %3817 = vmatmul.msk.bf16.gmra.mxu2 %vm811_vm2, %v411_v17  ;;  %3829 = vmatmul.msk.bf16.gmra.mxu3 %vm811_vm2, %v411_v17  ;;  %v399_v17 = vld [vmem:[%s4787_s26 + $0xb0] sm:$0xff] }
 0x17b   : > { %v412_v43 = vpack.c.bf16 %v400_v52, %v399_v17  ;;  %v5052_v52 = vperm.slane %v1124_v6, 3  ;;  %v998_v17 = vadd.f32 %v4989_v41, %v4719_v61  ;;  %v1136_v61 = vadd.f32 %v5050_v51, %v996_v24  ;;  %v4187_v24 = vld [vmem:[#allocation3 + $0x2d0] sm:$0xf0] }
 0x17c   : > { %v1231_v41 = vmax.f32 %v1135_v55, 0.0  ;;  %v4469_v55 = vld [vmem:[#allocation3 + $0x3c4] sm:$0xf] }
 0x17d   : > { %v5023_v14 = vpop.f32.mrf.mxu2  ;;  %v5025_v63 = vpop.f32.mrf.mxu3  ;;  %v1137_v62 = vadd.f32 %v5052_v52, %v1065_v29  ;;  %v1140_v47 = vadd.f32 %v5050_v51, %v998_v17  ;;  %v1141_v59 = vadd.f32 %v5052_v52, %v1067_v53  ;;  %v1232_v6 = vmax.f32 %v1136_v61, 0.0 }
 0x17e   : > { %v5027_v20 = vpop.f32.mrf.mxu0  ;;  %v5029_v19 = vpop.f32.mrf.mxu1  ;;  %v4190_v53 = vor.u32 %v4437_v16, %v4187_v24 }
 0x17f   : > { %v1233_v36 = vmax.f32 %v1137_v62, 0.0  ;;  %v1237_v13 = vmax.f32 %v1141_v59, 0.0 }
 0x180   : > { %2567 = vmatpush.bf16.msrb.mxu2 %v4190_v53 }
 0x185   : > { %v5033_v39 = vpop.f32.mrf.mxu2  ;;  %v5035_v60 = vpop.f32.mrf.mxu3 }
 0x186   : > { %v5037_v38 = vpop.f32.mrf.mxu0  ;;  %v5039_v35 = vpop.f32.mrf.mxu1 }
 0x188   : > { %3806 = vmatmul.msk.bf16.gmra.mxu1 %vm811_vm2, %v412_v43 }
 0x189   : > { %3794 = vmatmul.msk.bf16.gmra.mxu0 %vm811_vm2, %v412_v43 }
 0x18a   : > { %3818 = vmatmul.msk.bf16.gmra.mxu2 %vm811_vm2, %v412_v43  ;;  %3830 = vmatmul.msk.bf16.gmra.mxu3 %vm811_vm2, %v412_v43  ;;  %v1235_v43 = vmax.f32 %v1139_v30, 0.0  ;;  %v5096_v30 = vpack.c.bf16 %v1234_v44, %v1230_v48  ;;  %v865_v48 = vadd.f32 %v5005_v25, %v4735_v4  ;;  %v4405_v44 = vld [vmem:[#allocation3 + $0x1c4] sm:$0xf] }
 0x18c   : > { %v5098_v61 = vpack.c.bf16 %v1235_v43, %v1231_v41  ;;  %v1072_v41 = vadd.f32 %v5013_v49, %v4743_v9  ;;  %v4059_v43 = vld [vmem:[#allocation3 + $0x1d0] sm:$0xf0] }
 0x18d   : > { %v5072_v18 = vpop.f32.mrf.mxu2  ;;  %v5074_v54 = vpop.f32.mrf.mxu3 }
 0x18e   : > { %6438 = vst [vmem:[#allocation77_spill] sm:$0xff] %v5072_v18  ;;  %v5076_v57 = vpop.f32.mrf.mxu0  ;;  %v5078_v21 = vpop.f32.mrf.mxu1 }
 0x18f   : > { %6439 = vst [vmem:[#allocation78_spill] sm:$0xff] %v5074_v54  ;;  %v1236_v54 = vmax.f32 %v1140_v47, 0.0  ;;  %v4318_v47 = vor.u32 %v4469_v55, %v4315_v56 }
 0x190   : > { %6440 = vst [vmem:[#allocation79_spill] sm:$0xff] %v5078_v21  ;;  %v4373_v21 = vld [vmem:[#allocation3 + $0xc4] sm:$0xf] }
 0x191   : > { %v3934_v62 = vor.u32 %v4373_v21, %v3931_v58  ;;  %v5100_v59 = vpack.c.bf16 %v1236_v54, %v1232_v6  ;;  %v934_v21 = vadd.f32 %v5007_v45, %v4737_v5  ;;  %2636 = vmatpush.bf16.msrb.mxu3 %v4318_v47  ;;  %v1003_v54 = vadd.f32 %v5011_v50, %v4741_v8 }
 0x192   : > { %v863_v6 = vadd.f32 %v4993_v46, %v4723_v0  ;;  %v4062_v5 = vor.u32 %v4405_v44, %v4059_v43  ;;  %v1001_v45 = vadd.f32 %v5001_v28, %v4731_v2  ;;  %v1070_v8 = vadd.f32 %v5003_v40, %v4733_v3 }
 0x193   : > { %2429 = vmatpush.bf16.msrb.mxu0 %v3934_v62  ;;  %v1146_v0 = vadd.f32 %v5046_v7, %v865_v48  ;;  %v1147_v50 = vadd.f32 %v5048_v37, %v934_v21  ;;  %v1149_v46 = vadd.f32 %v5052_v52, %v1072_v41 }
 0x194   : > { %2498 = vmatpush.bf16.msrb.mxu1 %v4062_v5  ;;  %v1144_v28 = vadd.f32 %v5050_v51, %v1001_v45  ;;  %v1145_v3 = vadd.f32 %v5052_v52, %v1070_v8  ;;  %v1008_v5 = vadd.f32 %v5033_v39, %v4763_v31  ;;  %v1077_v45 = vadd.f32 %v5035_v60, %v4765_v32  ;;  %v4433_v8 = vld [vmem:[#allocation3 + $0x2a4] sm:$0xf]  ;;  %v4299_v31 = vld [vmem:[#allocation3 + $0x3b0] sm:$0xf0] }
 0x195   : > { %v5088_v18 = vpop.f32.mrf.mxu2  ;;  %v5090_v15 = vpop.f32.mrf.mxu3  ;;  %v1242_v40 = vmax.f32 %v1146_v0, 0.0  ;;  %v1245_v24 = vmax.f32 %v1149_v46, 0.0  ;;  %v4171_v0 = vld [vmem:[#allocation3 + $0x2b0] sm:$0xf0]  ;;  %v937_v46 = vadd.f32 %v5017_v42, %v4747_v12  ;;  %v1006_v32 = vadd.f32 %v5023_v14, %v4753_v22 }
 0x196   : > { %6441 = vst [vmem:[#allocation80_spill] sm:$0xff] %v5090_v15  ;;  %v5092_v29 = vpop.f32.mrf.mxu0  ;;  %v5094_v17 = vpop.f32.mrf.mxu1  ;;  %v5102_v15 = vpack.c.bf16 %v1237_v13, %v1233_v36  ;;  %v932_v36 = vadd.f32 %v4995_v33, %v4725_v1  ;;  %v1148_v1 = vadd.f32 %v5050_v51, %v1003_v54  ;;  %v1142_v33 = vadd.f32 %v5046_v7, %v863_v6 }
 0x197   : > { %v1243_v13 = vmax.f32 %v1147_v50, 0.0  ;;  %v1240_v62 = vmax.f32 %v1144_v28, 0.0  ;;  %v1241_v47 = vmax.f32 %v1145_v3, 0.0  ;;  %v870_v6 = vadd.f32 %v5027_v20, %v4757_v26  ;;  %v4369_v50 = vld [vmem:[#allocation3 + $0xa4] sm:$0xf] }
 0x198   : > { %2229 = vmatmul.bf16.vlgmr.msra.gmra.mxu1 %v5098_v61  ;;  %v1143_v2 = vadd.f32 %v5048_v37, %v932_v36  ;;  %v1244_v16 = vmax.f32 %v1148_v1, 0.0  ;;  %v1238_v53 = vmax.f32 %v1142_v33, 0.0  ;;  %v939_v36 = vadd.f32 %v5029_v19, %v4759_v27  ;;  %v3915_v19 = vld [vmem:[#allocation3 + $0xb0] sm:$0xf0]  ;;  %v4465_v20 = vld [vmem:[#allocation3 + $0x3a4] sm:$0xf] }
 0x199   : > { %2160 = vmatmul.bf16.vlgmr.msra.gmra.mxu0 %v5096_v30  ;;  %v5154_v43 = vpack.c.bf16 %v1245_v24, %v1241_v47  ;;  %v868_v1 = vadd.f32 %v5015_v10, %v4745_v11  ;;  %v4174_v27 = vor.u32 %v4433_v8, %v4171_v0  ;;  %v1075_v39 = vadd.f32 %v5025_v63, %v4755_v23 }
 0x19a   : > { %2298 = vmatmul.bf16.vlgmr.msra.gmra.mxu2 %v5100_v59  ;;  %2367 = vmatmul.bf16.vlgmr.msra.gmra.mxu3 %v5102_v15  ;;  %v1239_v58 = vmax.f32 %v1143_v2, 0.0  ;;  %v5148_v54 = vpack.c.bf16 %v1242_v40, %v1238_v53  ;;  %v5152_v44 = vpack.c.bf16 %v1244_v16, %v1240_v62  ;;  %v3918_v10 = vor.u32 %v4369_v50, %v3915_v19  ;;  %v4401_v40 = vld [vmem:[#allocation3 + $0x1a4] sm:$0xf] }
 0x19b   : > { %v4302_v12 = vor.u32 %v4465_v20, %v4299_v31  ;;  %v1154_v42 = vadd.f32 %v5046_v7, %v870_v6  ;;  %v1155_v2 = vadd.f32 %v5048_v37, %v939_v36  ;;  %2568 = vmatpush.bf16.msrb.mxu2 %v4174_v27  ;;  %v1156_v28 = vadd.f32 %v5050_v51, %v1008_v5  ;;  %v6442_v31 = vld [vmem:[#allocation6_spill] sm:$0xff] }
 0x19c   : > { %v5150_v41 = vpack.c.bf16 %v1243_v13, %v1239_v58  ;;  %v1157_v3 = vadd.f32 %v5052_v52, %v1077_v45  ;;  %2430 = vmatpush.bf16.msrb.mxu0 %v3918_v10  ;;  %v1150_v22 = vadd.f32 %v5046_v7, %v868_v1  ;;  %v1151_v23 = vadd.f32 %v5048_v37, %v937_v46  ;;  %v4043_v13 = vld [vmem:[#allocation3 + $0x1b0] sm:$0xf0] }
 0x19d   : > { %v5120_v4 = vpop.f32.mrf.mxu2  ;;  %v5122_v25 = vpop.f32.mrf.mxu3  ;;  %2637 = vmatpush.bf16.msrb.mxu3 %v4302_v12  ;;  %v1152_v14 = vadd.f32 %v5050_v51, %v1006_v32  ;;  %v1153_v63 = vadd.f32 %v5052_v52, %v1075_v39  ;;  %v1250_v16 = vmax.f32 %v1154_v42, 0.0  ;;  %v1251_v24 = vmax.f32 %v1155_v2, 0.0  ;;  %v6443_v39 = vld [vmem:[#allocation9_spill] sm:$0xff]  ;;  %v6444_v12 = vld [vmem:[#allocation10_spill] sm:$0xff]  ;;  %v6445_v42 = vld [vmem:[#allocation79_spill] sm:$0xff] }
 0x19e   : > { %v5128_v9 = vpop.f32.mrf.mxu0  ;;  %v5130_v49 = vpop.f32.mrf.mxu1  ;;  %v4046_v53 = vor.u32 %v4401_v40, %v4043_v13  ;;  %v1252_v58 = vmax.f32 %v1156_v28, 0.0  ;;  %v1253_v62 = vmax.f32 %v1157_v3, 0.0  ;;  %v1246_v47 = vmax.f32 %v1150_v22, 0.0  ;;  %v6446_v28 = vld [vmem:[#allocation7_spill] sm:$0xff]  ;;  %v6447_v3 = vld [vmem:[#allocation77_spill] sm:$0xff] }
 0x19f   : > { %v1247_v6 = vmax.f32 %v1151_v23, 0.0  ;;  %v1248_v45 = vmax.f32 %v1152_v14, 0.0  ;;  %v1249_v8 = vmax.f32 %v1153_v63, 0.0  ;;  %v873_v20 = vadd.f32 %v5037_v38, %v4767_v34  ;;  %v6448_v23 = vld [vmem:[#allocation8_spill] sm:$0xff]  ;;  %v6449_v14 = vld [vmem:[#allocation78_spill] sm:$0xff]  ;;  %v6450_v40 = vld [vmem:[#allocation11_spill] sm:$0xff] }
 0x1a0   : > { %2499 = vmatpush.bf16.msrb.mxu1 %v4046_v53  ;;  %v5200_v1 = vpack.c.bf16 %v1250_v16, %v1246_v47  ;;  %v942_v32 = vadd.f32 %v5039_v35, %v6442_v31  ;;  %v875_v10 = vadd.f32 %v5076_v57, %v6443_v39  ;;  %v944_v2 = vadd.f32 %v6445_v42, %v6444_v12  ;;  %v6451_v16 = vld [vmem:[#allocation12_spill] sm:$0xff] }
 0x1a1   : > { %v5202_v46 = vpack.c.bf16 %v1251_v24, %v1247_v6  ;;  %v5204_v27 = vpack.c.bf16 %v1252_v58, %v1248_v45  ;;  %v5206_v19 = vpack.c.bf16 %v1253_v62, %v1249_v8  ;;  %v1011_v22 = vadd.f32 %v6447_v3, %v6446_v28  ;;  %v6452_v34 = vld [vmem:[#allocation80_spill] sm:$0xff] }
 0x1a2   : > { %v1080_v63 = vadd.f32 %v6449_v14, %v6448_v23  ;;  %v1013_v13 = vadd.f32 %v5088_v18, %v6450_v40  ;;  %v1082_v38 = vadd.f32 %v6452_v34, %v6451_v16  ;;  %v1158_v58 = vadd.f32 %v5046_v7, %v873_v20  ;;  %v4365_v40 = vld [vmem:[#allocation3 + $0x84] sm:$0xf]  ;;  %v3899_v34 = vld [vmem:[#allocation3 + $0x90] sm:$0xf0] }
 0x1a3   : > { %v1159_v62 = vadd.f32 %v5048_v37, %v942_v32  ;;  %v1162_v47 = vadd.f32 %v5046_v7, %v875_v10  ;;  %v1163_v6 = vadd.f32 %v5048_v37, %v944_v2  ;;  %v1160_v18 = vadd.f32 %v5050_v51, %v1011_v22  ;;  %v4429_v2 = vld [vmem:[#allocation3 + $0x284] sm:$0xf]  ;;  %v4155_v22 = vld [vmem:[#allocation3 + $0x290] sm:$0xf0] }
 0x1a4   : > { %v1161_v45 = vadd.f32 %v5052_v52, %v1080_v63  ;;  %v1164_v8 = vadd.f32 %v5050_v51, %v1013_v13  ;;  %v1165_v31 = vadd.f32 %v5052_v52, %v1082_v38  ;;  %v1254_v39 = vmax.f32 %v1158_v58, 0.0  ;;  %v4461_v38 = vld [vmem:[#allocation3 + $0x384] sm:$0xf]  ;;  %v4283_v58 = vld [vmem:[#allocation3 + $0x390] sm:$0xf0] }
 0x1a5   : > { %v5140_v55 = vpop.f32.mrf.mxu2  ;;  %v5142_v56 = vpop.f32.mrf.mxu3  ;;  %v1255_v12 = vmax.f32 %v1159_v62, 0.0  ;;  %v1258_v42 = vmax.f32 %v1162_v47, 0.0  ;;  %v1259_v28 = vmax.f32 %v1163_v6, 0.0  ;;  %v1256_v3 = vmax.f32 %v1160_v18, 0.0 }
 0x1a6   : > { %v5144_v48 = vpop.f32.mrf.mxu0  ;;  %v5146_v21 = vpop.f32.mrf.mxu1  ;;  %v1257_v20 = vmax.f32 %v1161_v45, 0.0  ;;  %v1260_v23 = vmax.f32 %v1164_v8, 0.0  ;;  %v1261_v32 = vmax.f32 %v1165_v31, 0.0  ;;  %v4158_v16 = vor.u32 %v4429_v2, %v4155_v22  ;;  %v6457_v31 = vld [vmem:[#allocation17_spill] sm:$0xff]  ;;  %v4027_v2 = vld [vmem:[#allocation3 + $0x190] sm:$0xf0] }
 0x1a7   : > { %v5252_v62 = vpack.c.bf16 %v1258_v42, %v1254_v39  ;;  %v5254_v47 = vpack.c.bf16 %v1259_v28, %v1255_v12  ;;  %v3902_v6 = vor.u32 %v4365_v40, %v3899_v34  ;;  %v4286_v18 = vor.u32 %v4461_v38, %v4283_v58  ;;  %v6458_v12 = vld [vmem:[#allocation18_spill] sm:$0xff]  ;;  %v6459_v28 = vld [vmem:[#allocation19_spill] sm:$0xff]  ;;  %v6461_v22 = vld [vmem:[#allocation13_spill] sm:$0xff] }
 0x1a8   : > { %2234 = vmatmul.bf16.gmra.mxu1 %v5150_v41  ;;  %v5256_v45 = vpack.c.bf16 %v1260_v23, %v1256_v3  ;;  %v5258_v8 = vpack.c.bf16 %v1261_v32, %v1257_v20  ;;  %2569 = vmatpush.bf16.msrb.mxu2 %v4158_v16  ;;  %v880_v39 = vadd.f32 %v5128_v9, %v6457_v31  ;;  %v6460_v20 = vld [vmem:[#allocation20_spill] sm:$0xff]  ;;  %v4397_v32 = vld [vmem:[#allocation3 + $0x184] sm:$0xf]  ;;  %v6463_v58 = vld [vmem:[#allocation15_spill] sm:$0xff] }
 0x1a9   : > { %2165 = vmatmul.bf16.gmra.mxu0 %v5148_v54  ;;  %6453 = vst [vmem:[#allocation6_spill] sm:$0xff] %v5252_v62  ;;  %v949_v42 = vadd.f32 %v5130_v49, %v6458_v12  ;;  %2638 = vmatpush.bf16.msrb.mxu3 %v4286_v18  ;;  %v1018_v3 = vadd.f32 %v5140_v55, %v6459_v28  ;;  %v6462_v16 = vld [vmem:[#allocation14_spill] sm:$0xff]  ;;  %v6464_v55 = vld [vmem:[#allocation16_spill] sm:$0xff] }
 0x1aa   : > { %2303 = vmatmul.bf16.gmra.mxu2 %v5152_v44  ;;  %2372 = vmatmul.bf16.gmra.mxu3 %v5154_v43  ;;  %6454 = vst [vmem:[#allocation9_spill] sm:$0xff] %v5254_v47  ;;  %v1087_v23 = vadd.f32 %v5142_v56, %v6460_v20  ;;  %v878_v40 = vadd.f32 %v5092_v29, %v6461_v22 }
 0x1ab   : > { %6455 = vst [vmem:[#allocation10_spill] sm:$0xff] %v5256_v45  ;;  %2431 = vmatpush.bf16.msrb.mxu0 %v3902_v6  ;;  %v947_v34 = vadd.f32 %v5094_v17, %v6462_v16  ;;  %v4030_v49 = vor.u32 %v4397_v32, %v4027_v2  ;;  %v1016_v6 = vadd.f32 %v5120_v4, %v6463_v58 }
 0x1ac   : > { %6456 = vst [vmem:[#allocation79_spill] sm:$0xff] %v5258_v8  ;;  %v1085_v18 = vadd.f32 %v5122_v25, %v6464_v55  ;;  %v1170_v29 = vadd.f32 %v5046_v7, %v880_v39  ;;  %v1171_v12 = vadd.f32 %v5048_v37, %v949_v42  ;;  %v1172_v17 = vadd.f32 %v5050_v51, %v1018_v3 }
 0x1ad   : > { %v5172_v33 = vpop.f32.mrf.mxu2  ;;  %v5174_v26 = vpop.f32.mrf.mxu3  ;;  %2500 = vmatpush.bf16.msrb.mxu1 %v4030_v49  ;;  %v1173_v28 = vadd.f32 %v5052_v52, %v1087_v23  ;;  %v1166_v20 = vadd.f32 %v5046_v7, %v878_v40  ;;  %v1167_v4 = vadd.f32 %v5048_v37, %v947_v34  ;;  %v1168_v32 = vadd.f32 %v5050_v51, %v1016_v6 }
 0x1ae   : > { %v5180_v60 = vpop.f32.mrf.mxu0  ;;  %v5182_v11 = vpop.f32.mrf.mxu1  ;;  %v1169_v25 = vadd.f32 %v5052_v52, %v1085_v18  ;;  %v1266_v2 = vmax.f32 %v1170_v29, 0.0  ;;  %v1267_v22 = vmax.f32 %v1171_v12, 0.0  ;;  %v1268_v16 = vmax.f32 %v1172_v17, 0.0  ;;  %v6469_v12 = vld [vmem:[#allocation25_spill] sm:$0xff] }
 0x1af   : > { %v1269_v58 = vmax.f32 %v1173_v28, 0.0  ;;  %v1262_v39 = vmax.f32 %v1166_v20, 0.0  ;;  %v1263_v55 = vmax.f32 %v1167_v4, 0.0  ;;  %v1264_v3 = vmax.f32 %v1168_v32, 0.0  ;;  %v6470_v28 = vld [vmem:[#allocation26_spill] sm:$0xff]  ;;  %v6471_v4 = vld [vmem:[#allocation27_spill] sm:$0xff] }
 0x1b0   : > { %v1265_v23 = vmax.f32 %v1169_v25, 0.0  ;;  %v885_v17 = vadd.f32 %v5180_v60, %v6469_v12  ;;  %v954_v20 = vadd.f32 %v5182_v11, %v6470_v28  ;;  %v6472_v25 = vld [vmem:[#allocation28_spill] sm:$0xff]  ;;  %v4457_v28 = vld [vmem:[#allocation3 + $0x364] sm:$0xf] }
 0x1b1   : > { %v5304_v34 = vpack.c.bf16 %v1266_v2, %v1262_v39  ;;  %v5306_v6 = vpack.c.bf16 %v1267_v22, %v1263_v55  ;;  %v5308_v18 = vpack.c.bf16 %v1268_v16, %v1264_v3  ;;  %v4425_v22 = vld [vmem:[#allocation3 + $0x264] sm:$0xf]  ;;  %v4139_v16 = vld [vmem:[#allocation3 + $0x270] sm:$0xf0]  ;;  %v6473_v39 = vld [vmem:[#allocation21_spill] sm:$0xff] }
 0x1b2   : > { %v5310_v29 = vpack.c.bf16 %v1269_v58, %v1265_v23  ;;  %v4361_v58 = vld [vmem:[#allocation3 + $0x64] sm:$0xf]  ;;  %v883_v55 = vadd.f32 %v5144_v48, %v6473_v39  ;;  %v4142_v11 = vor.u32 %v4425_v22, %v4139_v16  ;;  %v3883_v12 = vld [vmem:[#allocation3 + $0x70] sm:$0xf0] }
 0x1b3   : > { %6465 = vst [vmem:[#allocation7_spill] sm:$0xff] %v5304_v34  ;;  %v6474_v3 = vld [vmem:[#allocation22_spill] sm:$0xff]  ;;  %v3886_v39 = vor.u32 %v4361_v58, %v3883_v12 }
 0x1b4   : > { %6466 = vst [vmem:[#allocation77_spill] sm:$0xff] %v5306_v6  ;;  %v952_v23 = vadd.f32 %v5146_v21, %v6474_v3  ;;  %v1178_v3 = vadd.f32 %v5046_v7, %v885_v17  ;;  %2570 = vmatpush.bf16.msrb.mxu2 %v4142_v11  ;;  %v4393_v12 = vld [vmem:[#allocation3 + $0x164] sm:$0xf] }
 0x1b5   : > { %v5192_v36 = vpop.f32.mrf.mxu2  ;;  %v5194_v5 = vpop.f32.mrf.mxu3  ;;  %6467 = vst [vmem:[#allocation8_spill] sm:$0xff] %v5308_v18  ;;  %2432 = vmatpush.bf16.msrb.mxu0 %v3886_v39 }
 0x1b6   : > { %v5196_v0 = vpop.f32.mrf.mxu0  ;;  %v5198_v50 = vpop.f32.mrf.mxu1  ;;  %6468 = vst [vmem:[#allocation78_spill] sm:$0xff] %v5310_v29  ;;  %v1023_v32 = vadd.f32 %v5192_v36, %v6471_v4  ;;  %v1092_v2 = vadd.f32 %v5194_v5, %v6472_v25  ;;  %v4267_v36 = vld [vmem:[#allocation3 + $0x370] sm:$0xf0]  ;;  %v6475_v4 = vld [vmem:[#allocation23_spill] sm:$0xff]  ;;  %v1274_v17 = vmax.f32 %v1178_v3, 0.0 }
 0x1b7   : > { %v1021_v5 = vadd.f32 %v5172_v33, %v6475_v4  ;;  %v6476_v25 = vld [vmem:[#allocation24_spill] sm:$0xff]  ;;  %v4270_v21 = vor.u32 %v4457_v28, %v4267_v36  ;;  %v1174_v33 = vadd.f32 %v5046_v7, %v883_v55 }
 0x1b8   : > { %2239 = vmatmul.bf16.gmra.mxu1 %v5202_v46  ;;  %v1180_v22 = vadd.f32 %v5050_v51, %v1023_v32  ;;  %v1181_v16 = vadd.f32 %v5052_v52, %v1092_v2  ;;  %v4011_v28 = vld [vmem:[#allocation3 + $0x170] sm:$0xf0] }
 0x1b9   : > { %2170 = vmatmul.bf16.gmra.mxu0 %v5200_v1  ;;  %2639 = vmatpush.bf16.msrb.mxu3 %v4270_v21  ;;  %v1176_v4 = vadd.f32 %v5050_v51, %v1021_v5  ;;  %v1270_v32 = vmax.f32 %v1174_v33, 0.0 }
 0x1ba   : > { %2308 = vmatmul.bf16.gmra.mxu2 %v5204_v27  ;;  %2377 = vmatmul.bf16.gmra.mxu3 %v5206_v19  ;;  %v1276_v11 = vmax.f32 %v1180_v22, 0.0 }
 0x1bb   : > { %v1272_v55 = vmax.f32 %v1176_v4, 0.0 }
 0x1bd   : > { %v5228_v24 = vpop.f32.mrf.mxu2  ;;  %v5230_v35 = vpop.f32.mrf.mxu3 }
 0x1be   : > { %v5232_v57 = vpop.f32.mrf.mxu0  ;;  %v5234_v53 = vpop.f32.mrf.mxu1 }
 0x1c5   : > { %v5244_v14 = vpop.f32.mrf.mxu2  ;;  %v5246_v10 = vpop.f32.mrf.mxu3 }
 0x1c6   : > { %v5248_v63 = vpop.f32.mrf.mxu0  ;;  %v5250_v13 = vpop.f32.mrf.mxu1 }
 0x1c8   : > { %2244 = vmatmul.bf16.gmra.mxu1 %v5254_v47 }
 0x1c9   : > { %2175 = vmatmul.bf16.gmra.mxu0 %v5252_v62  ;;  %v6519_v62 = vld [vmem:[#allocation54_spill] sm:$0xff] }
 0x1ca   : > { %2313 = vmatmul.bf16.gmra.mxu2 %v5256_v45  ;;  %2382 = vmatmul.bf16.gmra.mxu3 %v5258_v8 }
 0x1cd   : > { %v5276_v9 = vpop.f32.mrf.mxu2  ;;  %v5278_v38 = vpop.f32.mrf.mxu3 }
 0x1ce   : > { %v5284_v56 = vpop.f32.mrf.mxu0  ;;  %v5286_v31 = vpop.f32.mrf.mxu1 }
 0x1d5   : > { %v5296_v42 = vpop.f32.mrf.mxu2  ;;  %v5298_v49 = vpop.f32.mrf.mxu3 }
 0x1d6   : > { %v5300_v8 = vpop.f32.mrf.mxu0  ;;  %v5302_v40 = vpop.f32.mrf.mxu1 }
 0x1d8   : > { %2249 = vmatmul.bf16.gmra.mxu1 %v5306_v6 }
 0x1d9   : > { %2180 = vmatmul.bf16.gmra.mxu0 %v5304_v34  ;;  %v1179_v34 = vadd.f32 %v5048_v37, %v954_v20  ;;  %v4014_v20 = vor.u32 %v4393_v12, %v4011_v28  ;;  %v6484_v12 = vld [vmem:[#allocation34_spill] sm:$0xff] }
 0x1da   : > { %2318 = vmatmul.bf16.gmra.mxu2 %v5308_v18  ;;  %2387 = vmatmul.bf16.gmra.mxu3 %v5310_v29  ;;  %v1090_v18 = vadd.f32 %v5174_v26, %v6476_v25  ;;  %v1175_v26 = vadd.f32 %v5048_v37, %v952_v23  ;;  %v1277_v25 = vmax.f32 %v1181_v16, 0.0  ;;  %v6481_v16 = vld [vmem:[#allocation29_spill] sm:$0xff]  ;;  %v959_v28 = vadd.f32 %v5234_v53, %v6484_v12 }
 0x1db   : > { %v1275_v36 = vmax.f32 %v1179_v34, 0.0  ;;  %2501 = vmatpush.bf16.msrb.mxu1 %v4014_v20  ;;  %v5360_v34 = vpack.c.bf16 %v1276_v11, %v1272_v55  ;;  %v888_v33 = vadd.f32 %v5196_v0, %v6481_v16  ;;  %v6486_v20 = vld [vmem:[#allocation32_spill] sm:$0xff] }
 0x1dc   : > { %v1177_v58 = vadd.f32 %v5052_v52, %v1090_v18  ;;  %v1271_v45 = vmax.f32 %v1175_v26, 0.0  ;;  %v5356_v18 = vpack.c.bf16 %v1274_v17, %v1270_v32  ;;  %v6482_v26 = vld [vmem:[#allocation30_spill] sm:$0xff]  ;;  %v6485_v17 = vld [vmem:[#allocation31_spill] sm:$0xff]  ;;  %v1095_v11 = vadd.f32 %v5230_v35, %v6486_v20  ;;  %v6488_v55 = vld [vmem:[#allocation36_spill] sm:$0xff] }
 0x1dd   : > { %v5328_v29 = vpop.f32.mrf.mxu2  ;;  %v5330_v60 = vpop.f32.mrf.mxu3  ;;  %6479 = vst [vmem:[#allocation80_spill] sm:$0xff] %v5360_v34  ;;  %v957_v4 = vadd.f32 %v5198_v50, %v6482_v26  ;;  %v1097_v0 = vadd.f32 %v5246_v10, %v6488_v55  ;;  %v1182_v53 = vadd.f32 %v5046_v7, %v888_v33  ;;  %v1187_v26 = vadd.f32 %v5048_v37, %v959_v28  ;;  %v4421_v28 = vld [vmem:[#allocation3 + $0x244] sm:$0xf] }
 0x1de   : > { %v5336_v6 = vpop.f32.mrf.mxu0  ;;  %v5338_v48 = vpop.f32.mrf.mxu1  ;;  %v1273_v23 = vmax.f32 %v1177_v58, 0.0  ;;  %6477 = vst [vmem:[#allocation11_spill] sm:$0xff] %v5356_v18  ;;  %v5358_v3 = vpack.c.bf16 %v1275_v36, %v1271_v45  ;;  %v6483_v45 = vld [vmem:[#allocation33_spill] sm:$0xff]  ;;  %v1026_v36 = vadd.f32 %v5228_v24, %v6485_v17  ;;  %v1185_v10 = vadd.f32 %v5052_v52, %v1095_v11 }
 0x1df   : > { %v890_v58 = vadd.f32 %v5232_v57, %v6483_v45  ;;  %v1183_v24 = vadd.f32 %v5048_v37, %v957_v4  ;;  %v1189_v12 = vadd.f32 %v5052_v52, %v1097_v0  ;;  %v1278_v17 = vmax.f32 %v1182_v53, 0.0  ;;  %v3867_v53 = vld [vmem:[#allocation3 + $0x50] sm:$0xf0] }
 0x1e0   : > { %6478 = vst [vmem:[#allocation12_spill] sm:$0xff] %v5358_v3  ;;  %v5362_v22 = vpack.c.bf16 %v1277_v25, %v1273_v23  ;;  %v6487_v25 = vld [vmem:[#allocation35_spill] sm:$0xff]  ;;  %v1283_v55 = vmax.f32 %v1187_v26, 0.0  ;;  %v1281_v33 = vmax.f32 %v1185_v10, 0.0 }
 0x1e1   : > { %v1028_v32 = vadd.f32 %v5244_v14, %v6487_v25  ;;  %v1186_v35 = vadd.f32 %v5046_v7, %v890_v58  ;;  %v1184_v14 = vadd.f32 %v5050_v51, %v1026_v36  ;;  %v1279_v20 = vmax.f32 %v1183_v24, 0.0  ;;  %v4123_v36 = vld [vmem:[#allocation3 + $0x250] sm:$0xf0]  ;;  %v4453_v24 = vld [vmem:[#allocation3 + $0x344] sm:$0xf] }
 0x1e2   : > { %6480 = vst [vmem:[#allocation17_spill] sm:$0xff] %v5362_v22  ;;  %v1285_v4 = vmax.f32 %v1189_v12, 0.0  ;;  %v4126_v0 = vor.u32 %v4421_v28, %v4123_v36  ;;  %v6493_v28 = vld [vmem:[#allocation41_spill] sm:$0xff] }
 0x1e3   : > { %v1188_v45 = vadd.f32 %v5050_v51, %v1028_v32  ;;  %v1282_v25 = vmax.f32 %v1186_v35, 0.0  ;;  %v4251_v35 = vld [vmem:[#allocation3 + $0x350] sm:$0xf0]  ;;  %v6497_v36 = vld [vmem:[#allocation37_spill] sm:$0xff] }
 0x1e4   : > { %v5414_v47 = vpack.c.bf16 %v1285_v4, %v1281_v33  ;;  %2571 = vmatpush.bf16.msrb.mxu2 %v4126_v0  ;;  %v4389_v33 = vld [vmem:[#allocation3 + $0x144] sm:$0xf]  ;;  %v3995_v4 = vld [vmem:[#allocation3 + $0x150] sm:$0xf0]  ;;  %v893_v0 = vadd.f32 %v5248_v63, %v6497_v36 }
 0x1e5   : > { %v5348_v2 = vpop.f32.mrf.mxu2  ;;  %v5350_v39 = vpop.f32.mrf.mxu3  ;;  %v5408_v26 = vpack.c.bf16 %v1282_v25, %v1278_v17  ;;  %v895_v17 = vadd.f32 %v5284_v56, %v6493_v28  ;;  %v6496_v25 = vld [vmem:[#allocation44_spill] sm:$0xff] }
 0x1e6   : > { %v5352_v21 = vpop.f32.mrf.mxu0  ;;  %v5354_v5 = vpop.f32.mrf.mxu1  ;;  %6492 = vst [vmem:[#allocation13_spill] sm:$0xff] %v5414_v47 }
 0x1e7   : > { %6489 = vst [vmem:[#allocation18_spill] sm:$0xff] %v5408_v26  ;;  %v1194_v63 = vadd.f32 %v5046_v7, %v895_v17 }
 0x1e8   : > { %2254 = vmatmul.bf16.gmra.mxu1 %v5358_v3 }
 0x1e9   : > { %2185 = vmatmul.bf16.gmra.mxu0 %v5356_v18  ;;  %v4357_v18 = vld [vmem:[#allocation3 + $0x44] sm:$0xf]  ;;  %v1290_v36 = vmax.f32 %v1194_v63, 0.0 }
 0x1ea   : > { %2323 = vmatmul.bf16.gmra.mxu2 %v5360_v34  ;;  %2392 = vmatmul.bf16.gmra.mxu3 %v5362_v22  ;;  %v1280_v22 = vmax.f32 %v1184_v14, 0.0  ;;  %v1284_v34 = vmax.f32 %v1188_v45, 0.0  ;;  %v5410_v14 = vpack.c.bf16 %v1283_v55, %v1279_v20  ;;  %v3870_v10 = vor.u32 %v4357_v18, %v3867_v53  ;;  %v6494_v20 = vld [vmem:[#allocation42_spill] sm:$0xff] }
 0x1eb   : > { %v4254_v45 = vor.u32 %v4453_v24, %v4251_v35  ;;  %v964_v18 = vadd.f32 %v5286_v31, %v6494_v20  ;;  %v1102_v55 = vadd.f32 %v5298_v49, %v6496_v25  ;;  %v6498_v53 = vld [vmem:[#allocation38_spill] sm:$0xff]  ;;  %v3998_v31 = vor.u32 %v4389_v33, %v3995_v4 }
 0x1ec   : > { %6490 = vst [vmem:[#allocation19_spill] sm:$0xff] %v5410_v14  ;;  %v5412_v12 = vpack.c.bf16 %v1284_v34, %v1280_v22  ;;  %2433 = vmatpush.bf16.msrb.mxu0 %v3870_v10  ;;  %v6495_v34 = vld [vmem:[#allocation43_spill] sm:$0xff]  ;;  %v962_v24 = vadd.f32 %v5250_v13, %v6498_v53  ;;  %v1190_v33 = vadd.f32 %v5046_v7, %v893_v0 }
 0x1ed   : > { %v5384_v23 = vpop.f32.mrf.mxu2  ;;  %v5386_v50 = vpop.f32.mrf.mxu3  ;;  %2640 = vmatpush.bf16.msrb.mxu3 %v4254_v45  ;;  %v1033_v22 = vadd.f32 %v5296_v42, %v6495_v34  ;;  %v6499_v10 = vld [vmem:[#allocation39_spill] sm:$0xff]  ;;  %v6500_v42 = vld [vmem:[#allocation40_spill] sm:$0xff]  ;;  %v1195_v34 = vadd.f32 %v5048_v37, %v964_v18  ;;  %2502 = vmatpush.bf16.msrb.mxu1 %v3998_v31  ;;  %v1197_v25 = vadd.f32 %v5052_v52, %v1102_v55 }
 0x1ee   : > { %v5388_v57 = vpop.f32.mrf.mxu0  ;;  %v5390_v16 = vpop.f32.mrf.mxu1  ;;  %6491 = vst [vmem:[#allocation20_spill] sm:$0xff] %v5412_v12  ;;  %v1031_v45 = vadd.f32 %v5276_v9, %v6499_v10  ;;  %v1100_v28 = vadd.f32 %v5278_v38, %v6500_v42  ;;  %v1191_v9 = vadd.f32 %v5048_v37, %v962_v24  ;;  %v1286_v17 = vmax.f32 %v1190_v33, 0.0 }
 0x1ef   : > { %v1196_v13 = vadd.f32 %v5050_v51, %v1033_v22  ;;  %v1291_v53 = vmax.f32 %v1195_v34, 0.0  ;;  %v1293_v42 = vmax.f32 %v1197_v25, 0.0  ;;  %v6505_v34 = vld [vmem:[#allocation49_spill] sm:$0xff]  ;;  %v6506_v25 = vld [vmem:[#allocation50_spill] sm:$0xff] }
 0x1f0   : > { %v1192_v4 = vadd.f32 %v5050_v51, %v1031_v45  ;;  %v1193_v38 = vadd.f32 %v5052_v52, %v1100_v28  ;;  %v5460_v24 = vpack.c.bf16 %v1290_v36, %v1286_v17  ;;  %v969_v33 = vadd.f32 %v5338_v48, %v6506_v25  ;;  %v4417_v36 = vld [vmem:[#allocation3 + $0x224] sm:$0xf] }
 0x1f1   : > { %v1292_v10 = vmax.f32 %v1196_v13, 0.0  ;;  %v900_v13 = vadd.f32 %v5336_v6, %v6505_v34  ;;  %v3851_v34 = vld [vmem:[#allocation3 + $0x30] sm:$0xf0]  ;;  %v4449_v25 = vld [vmem:[#allocation3 + $0x324] sm:$0xf] }
 0x1f2   : > { %v1288_v22 = vmax.f32 %v1192_v4, 0.0  ;;  %v1289_v55 = vmax.f32 %v1193_v38, 0.0  ;;  %6501 = vst [vmem:[#allocation14_spill] sm:$0xff] %v5460_v24  ;;  %v6508_v4 = vld [vmem:[#allocation52_spill] sm:$0xff] }
 0x1f3   : > { %v1107_v38 = vadd.f32 %v5350_v39, %v6508_v4  ;;  %v6512_v4 = vld [vmem:[#allocation48_spill] sm:$0xff] }
 0x1f4   : > { %v5464_v28 = vpack.c.bf16 %v1292_v10, %v1288_v22  ;;  %v5466_v63 = vpack.c.bf16 %v1293_v42, %v1289_v55  ;;  %v4353_v10 = vld [vmem:[#allocation3 + $0x24] sm:$0xf]  ;;  %v6509_v42 = vld [vmem:[#allocation45_spill] sm:$0xff] }
 0x1f5   : > { %v5400_v3 = vpop.f32.mrf.mxu2  ;;  %v5402_v58 = vpop.f32.mrf.mxu3  ;;  %v898_v17 = vadd.f32 %v5300_v8, %v6509_v42  ;;  %v6510_v22 = vld [vmem:[#allocation46_spill] sm:$0xff]  ;;  %v3854_v42 = vor.u32 %v4353_v10, %v3851_v34 }
 0x1f6   : > { %v5404_v11 = vpop.f32.mrf.mxu0  ;;  %v5406_v32 = vpop.f32.mrf.mxu1  ;;  %6503 = vst [vmem:[#allocation16_spill] sm:$0xff] %v5464_v28  ;;  %v967_v55 = vadd.f32 %v5302_v40, %v6510_v22  ;;  %v1202_v22 = vadd.f32 %v5046_v7, %v900_v13 }
 0x1f7   : > { %6504 = vst [vmem:[#allocation25_spill] sm:$0xff] %v5466_v63  ;;  %2434 = vmatpush.bf16.msrb.mxu0 %v3854_v42 }
 0x1f8   : > { %2259 = vmatmul.bf16.gmra.mxu1 %v5410_v14  ;;  %v1199_v10 = vadd.f32 %v5048_v37, %v967_v55 }
 0x1f9   : > { %2190 = vmatmul.bf16.gmra.mxu0 %v5408_v26 }
 0x1fa   : > { %2328 = vmatmul.bf16.gmra.mxu2 %v5412_v12  ;;  %2397 = vmatmul.bf16.gmra.mxu3 %v5414_v47  ;;  %v1287_v47 = vmax.f32 %v1191_v9, 0.0  ;;  %v1295_v42 = vmax.f32 %v1199_v10, 0.0  ;;  %v6518_v10 = vld [vmem:[#allocation53_spill] sm:$0xff] }
 0x1fc   : > { %v5462_v45 = vpack.c.bf16 %v1291_v53, %v1287_v47  ;;  %v6507_v47 = vld [vmem:[#allocation51_spill] sm:$0xff]  ;;  %v4107_v53 = vld [vmem:[#allocation3 + $0x230] sm:$0xf0] }
 0x1fd   : > { %v5432_v56 = vpop.f32.mrf.mxu2  ;;  %v5434_v35 = vpop.f32.mrf.mxu3  ;;  %v1038_v9 = vadd.f32 %v5348_v2, %v6507_v47  ;;  %v4110_v48 = vor.u32 %v4417_v36, %v4107_v53  ;;  %v4235_v2 = vld [vmem:[#allocation3 + $0x330] sm:$0xf0]  ;;  %v6511_v47 = vld [vmem:[#allocation47_spill] sm:$0xff]  ;;  %v1205_v53 = vadd.f32 %v5052_v52, %v1107_v38 }
 0x1fe   : > { %v5440_v49 = vpop.f32.mrf.mxu0  ;;  %v5442_v20 = vpop.f32.mrf.mxu1  ;;  %6502 = vst [vmem:[#allocation15_spill] sm:$0xff] %v5462_v45  ;;  %v1036_v39 = vadd.f32 %v5328_v29, %v6511_v47  ;;  %v4238_v40 = vor.u32 %v4449_v25, %v4235_v2  ;;  %v5503_v29 = vld [vmem:[%s6310_s6] sm:$0xf]  ;;  %v4385_v2 = vld [vmem:[#allocation3 + $0x124] sm:$0xf] }
 0x1ff   : > { %2572 = vmatpush.bf16.msrb.mxu2 %v4110_v48  ;;  %v1204_v36 = vadd.f32 %v5050_v51, %v1038_v9  ;;  %6513 = vst [vmem:[#allocation26_spill] sm:$0xff] %v5503_v29  ;;  %v1298_v48 = vmax.f32 %v1202_v22, 0.0  ;;  %v5510_v9 = vperm.slane %v5503_v29, 0  ;;  %v1301_v25 = vmax.f32 %v1205_v53, 0.0  ;;  %v3979_v47 = vld [vmem:[#allocation3 + $0x130] sm:$0xf0] }
 0x200   : > { %2641 = vmatpush.bf16.msrb.mxu3 %v4238_v40  ;;  %v1200_v13 = vadd.f32 %v5050_v51, %v1036_v39  ;;  %v3982_v55 = vor.u32 %v4385_v2, %v3979_v47  ;;  %v903_v29 = vadd.f32 %v5352_v21, %v6518_v10 }
 0x201   : > { %v1300_v38 = vmax.f32 %v1204_v36, 0.0 }
 0x202   : > { %v1296_v14 = vmax.f32 %v1200_v13, 0.0  ;;  %2503 = vmatpush.bf16.msrb.mxu1 %v3982_v55  ;;  %v972_v13 = vadd.f32 %v5354_v5, %v6519_v62  ;;  %v6524_v5 = vld [vmem:[#allocation60_spill] sm:$0xff]  ;;  %v1206_v47 = vadd.f32 %v5046_v7, %v903_v29 }
 0x203   : > { %v1112_v2 = vadd.f32 %v5402_v58, %v6524_v5  ;;  %v6525_v55 = vld [vmem:[#allocation56_spill] sm:$0xff] }
 0x204   : > { %v5521_v53 = vpack.c.bf16 %v1300_v38, %v1296_v14  ;;  %v6522_v38 = vld [vmem:[#allocation58_spill] sm:$0xff] }
 0x205   : > { %v5452_v18 = vpop.f32.mrf.mxu2  ;;  %v5454_v31 = vpop.f32.mrf.mxu3  ;;  %v974_v21 = vadd.f32 %v5390_v16, %v6522_v38  ;;  %v1213_v29 = vadd.f32 %v5052_v52, %v1112_v2 }
 0x206   : > { %v5456_v12 = vpop.f32.mrf.mxu0  ;;  %v5458_v0 = vpop.f32.mrf.mxu1  ;;  %6516 = vst [vmem:[#allocation21_spill] sm:$0xff] %v5521_v53 }
 0x208   : > { %2264 = vmatmul.bf16.gmra.mxu1 %v5462_v45 }
 0x209   : > { %2195 = vmatmul.bf16.gmra.mxu0 %v5460_v24  ;;  %v1203_v24 = vadd.f32 %v5048_v37, %v969_v33 }
 0x20a   : > { %2333 = vmatmul.bf16.gmra.mxu2 %v5464_v28  ;;  %2402 = vmatmul.bf16.gmra.mxu3 %v5466_v63  ;;  %v1105_v28 = vadd.f32 %v5330_v60, %v6512_v4  ;;  %v1198_v60 = vadd.f32 %v5046_v7, %v898_v17 }
 0x20b   : > { %v1299_v34 = vmax.f32 %v1203_v24, 0.0 }
 0x20c   : > { %v1201_v33 = vadd.f32 %v5052_v52, %v1105_v28  ;;  %v1294_v4 = vmax.f32 %v1198_v60, 0.0 }
 0x20d   : > { %v5484_v63 = vpop.f32.mrf.mxu2  ;;  %v5486_v6 = vpop.f32.mrf.mxu3  ;;  %v5518_v24 = vpack.c.bf16 %v1299_v34, %v1295_v42 }
 0x20e   : > { %v5492_v45 = vpop.f32.mrf.mxu0  ;;  %v5494_v8 = vpop.f32.mrf.mxu1  ;;  %v1297_v39 = vmax.f32 %v1201_v33, 0.0  ;;  %v5516_v22 = vpack.c.bf16 %v1298_v48, %v1294_v4  ;;  %v6520_v48 = vld [vmem:[#allocation55_spill] sm:$0xff] }
 0x20f   : > { %6515 = vst [vmem:[#allocation28_spill] sm:$0xff] %v5518_v24  ;;  %v1041_v34 = vadd.f32 %v5384_v23, %v6520_v48  ;;  %v1207_v23 = vadd.f32 %v5048_v37, %v972_v13 }
 0x210   : > { %6514 = vst [vmem:[#allocation27_spill] sm:$0xff] %v5516_v22  ;;  %v5523_v60 = vpack.c.bf16 %v1301_v25, %v1297_v39  ;;  %v6523_v25 = vld [vmem:[#allocation59_spill] sm:$0xff]  ;;  %v1110_v39 = vadd.f32 %v5386_v50, %v6525_v55  ;;  %v4413_v55 = vld [vmem:[#allocation3 + $0x204] sm:$0xf] }
 0x211   : > { %v1043_v62 = vadd.f32 %v5400_v3, %v6523_v25  ;;  %v1211_v3 = vadd.f32 %v5048_v37, %v974_v21  ;;  %v1303_v38 = vmax.f32 %v1207_v23, 0.0  ;;  %v4091_v21 = vld [vmem:[#allocation3 + $0x210] sm:$0xf0] }
 0x212   : > { %6517 = vst [vmem:[#allocation22_spill] sm:$0xff] %v5523_v60  ;;  %v1209_v50 = vadd.f32 %v5052_v52, %v1110_v39  ;;  %v4094_v2 = vor.u32 %v4413_v55, %v4091_v21 }
 0x213   : > { %v1212_v58 = vadd.f32 %v5050_v51, %v1043_v62 }
 0x214   : > { %2573 = vmatpush.bf16.msrb.mxu2 %v4094_v2 }
 0x215   : > { %v5512_v40 = vpop.f32.mrf.mxu2  ;;  %v5514_v17 = vpop.f32.mrf.mxu3  ;;  %v1308_v5 = vmax.f32 %v1212_v58, 0.0 }
 0x216   : > { %v2161_v26 = vpop.f32.mrf.mxu0  ;;  %v2230_v28 = vpop.f32.mrf.mxu1 }
 0x217   : > { %v2162_v36 = vadd.f32 %v2161_v26, %v5510_v9  ;;  %v6521_v26 = vld [vmem:[#allocation57_spill] sm:$0xff] }
 0x218   : > { %2269 = vmatmul.bf16.gmra.mxu1 %v5518_v24  ;;  %v905_v14 = vadd.f32 %v5388_v57, %v6521_v26  ;;  %v1208_v57 = vadd.f32 %v5050_v51, %v1041_v34  ;;  %v1302_v34 = vmax.f32 %v1206_v47, 0.0  ;;  %v3835_v24 = vld [vmem:[#allocation3 + $0x10] sm:$0xf0] }
 0x219   : > { %v2231_v33 = vadd.f32 %v2230_v28, %v2162_v36  ;;  %2200 = vmatmul.bf16.gmra.mxu0 %v5516_v22 }
 0x21a   : > { %2338 = vmatmul.bf16.gmra.mxu2 %v5521_v53  ;;  %2407 = vmatmul.bf16.gmra.mxu3 %v5523_v60  ;;  %v1210_v28 = vadd.f32 %v5046_v7, %v905_v14  ;;  %v1304_v25 = vmax.f32 %v1208_v57, 0.0  ;;  %v4349_v60 = vld [vmem:[#allocation3 + $0x4] sm:$0xf] }
 0x21b   : > { %v3838_v57 = vor.u32 %v4349_v60, %v3835_v24  ;;  %v6526_v24 = vld [vmem:[#allocation65_spill] sm:$0xff] }
 0x21c   : > { %v1306_v14 = vmax.f32 %v1210_v28, 0.0  ;;  %v5561_v58 = vpack.c.bf16 %v1308_v5, %v1304_v25  ;;  %v910_v60 = vadd.f32 %v5440_v49, %v6526_v24  ;;  %v6528_v25 = vld [vmem:[#allocation67_spill] sm:$0xff]  ;;  %v3963_v5 = vld [vmem:[#allocation3 + $0x110] sm:$0xf0] }
 0x21d   : > { %v2299_v4 = vpop.f32.mrf.mxu2  ;;  %v2368_v42 = vpop.f32.mrf.mxu3  ;;  %2435 = vmatpush.bf16.msrb.mxu0 %v3838_v57 }
 0x21e   : > { %v2300_v16 = vadd.f32 %v2299_v4, %v2231_v33  ;;  %v2163_v36 = vpop.f32.mrf.mxu0  ;;  %v2232_v10 = vpop.f32.mrf.mxu1  ;;  %v1307_v33 = vmax.f32 %v1211_v3, 0.0  ;;  %v1309_v4 = vmax.f32 %v1213_v29, 0.0  ;;  %v5556_v39 = vpack.c.bf16 %v1306_v14, %v1302_v34  ;;  %v6527_v34 = vld [vmem:[#allocation66_spill] sm:$0xff] }
 0x21f   : > { %v2164_v13 = vadd.f32 %v2163_v36, %v5510_v9  ;;  %v4445_v36 = vld [vmem:[#allocation3 + $0x304] sm:$0xf]  ;;  %v1218_v57 = vadd.f32 %v5046_v7, %v910_v60 }
 0x220   : > { %v5553_v48 = vadd.f32 %v2368_v42, %v2300_v16  ;;  %v4219_v42 = vld [vmem:[#allocation3 + $0x310] sm:$0xf0]  ;;  %v1305_v16 = vmax.f32 %v1209_v50, 0.0  ;;  %v5558_v28 = vpack.c.bf16 %v1307_v33, %v1303_v38  ;;  %v979_v38 = vadd.f32 %v5442_v20, %v6527_v34  ;;  %v4381_v33 = vld [vmem:[#allocation3 + $0x104] sm:$0xf] }
 0x221   : > { %v2233_v26 = vadd.f32 %v2232_v10, %v2164_v13  ;;  %v4222_v13 = vor.u32 %v4445_v36, %v4219_v42  ;;  %v6529_v50 = vld [vmem:[#allocation68_spill] sm:$0xff]  ;;  %v3966_v49 = vor.u32 %v4381_v33, %v3963_v5 }
 0x222   : > { %v5563_v29 = vpack.c.bf16 %v1309_v4, %v1305_v16  ;;  %v1117_v14 = vadd.f32 %v5454_v31, %v6529_v50  ;;  %v6530_v4 = vld [vmem:[#allocation61_spill] sm:$0xff]  ;;  %v6532_v16 = vld [vmem:[#allocation63_spill] sm:$0xff] }
 0x223   : > { %2642 = vmatpush.bf16.msrb.mxu3 %v4222_v13  ;;  %v908_v21 = vadd.f32 %v5404_v11, %v6530_v4  ;;  %v1046_v20 = vadd.f32 %v5432_v56, %v6532_v16  ;;  %v1219_v13 = vadd.f32 %v5048_v37, %v979_v38  ;;  %2504 = vmatpush.bf16.msrb.mxu1 %v3966_v49 }
 0x225   : > { %v2301_v62 = vpop.f32.mrf.mxu2  ;;  %v2370_v53 = vpop.f32.mrf.mxu3  ;;  %v1214_v56 = vadd.f32 %v5046_v7, %v908_v21  ;;  %v1216_v34 = vadd.f32 %v5050_v51, %v1046_v20  ;;  %v1315_v38 = vmax.f32 %v1219_v13, 0.0  ;;  %v6536_v13 = vld [vmem:[#allocation74_spill] sm:$0xff] }
 0x226   : > { %v2302_v10 = vadd.f32 %v2301_v62, %v2233_v26  ;;  %v2166_v47 = vpop.f32.mrf.mxu0  ;;  %v2235_v23 = vpop.f32.mrf.mxu1  ;;  %v6531_v62 = vld [vmem:[#allocation62_spill] sm:$0xff] }
 0x227   : > { %v2167_v3 = vadd.f32 %v2166_v47, %v5510_v9  ;;  %v977_v2 = vadd.f32 %v5406_v32, %v6531_v62  ;;  %v1310_v5 = vmax.f32 %v1214_v56, 0.0  ;;  %v6538_v56 = vld [vmem:[#allocation76_spill] sm:$0xff] }
 0x228   : > { %v5565_v55 = vadd.f32 %v2370_v53, %v2302_v10  ;;  %2274 = vmatmul.bf16.gmra.mxu1 %v5558_v28  ;;  %v1048_v53 = vadd.f32 %v5452_v18, %v6528_v25  ;;  %v6533_v10 = vld [vmem:[#allocation64_spill] sm:$0xff]  ;;  %v1314_v25 = vmax.f32 %v1218_v57, 0.0 }
 0x229   : > { %v2236_v26 = vadd.f32 %v2235_v23, %v2167_v3  ;;  %2205 = vmatmul.bf16.gmra.mxu0 %v5556_v39  ;;  %v1115_v18 = vadd.f32 %v5434_v35, %v6533_v10  ;;  %v1221_v3 = vadd.f32 %v5052_v52, %v1117_v14  ;;  %v1215_v35 = vadd.f32 %v5048_v37, %v977_v2 }
 0x22a   : > { %2343 = vmatmul.bf16.gmra.mxu2 %v5561_v58  ;;  %2412 = vmatmul.bf16.gmra.mxu3 %v5563_v29  ;;  %v1220_v32 = vadd.f32 %v5050_v51, %v1048_v53  ;;  %v1312_v14 = vmax.f32 %v1216_v34, 0.0  ;;  %v5598_v16 = vpack.c.bf16 %v1314_v25, %v1310_v5  ;;  %v4444_v34 = vld [vmem:[#allocation3 + $0x2f4] sm:$0xf0]  ;;  %v6541_v5 = vld [vmem:[#allocation71_spill] sm:$0xff] }
 0x22b   : > { %v1217_v60 = vadd.f32 %v5052_v52, %v1115_v18  ;;  %v1317_v33 = vmax.f32 %v1221_v3, 0.0  ;;  %v1311_v4 = vmax.f32 %v1215_v35, 0.0  ;;  %v1122_v35 = vadd.f32 %v5514_v17, %v6538_v56  ;;  %v6539_v25 = vld [vmem:[#allocation69_spill] sm:$0xff] }
 0x22c   : > { %v1316_v50 = vmax.f32 %v1220_v32, 0.0  ;;  %v6537_v32 = vld [vmem:[#allocation75_spill] sm:$0xff] }
 0x22d   : > { %v2304_v36 = vpop.f32.mrf.mxu2  ;;  %v2373_v42 = vpop.f32.mrf.mxu3  ;;  %v5600_v2 = vpack.c.bf16 %v1315_v38, %v1311_v4  ;;  %v1053_v3 = vadd.f32 %v5512_v40, %v6537_v32  ;;  %v913_v38 = vadd.f32 %v5456_v12, %v6539_v25  ;;  %v4337_v40 = vld [vmem:[#allocation3 + $0x3e8] sm:$0xf]  ;;  %v1229_v32 = vadd.f32 %v5052_v52, %v1122_v35 }
 0x22e   : > { %v2305_v47 = vadd.f32 %v2304_v36, %v2236_v26  ;;  %v2168_v23 = vpop.f32.mrf.mxu0  ;;  %v2237_v31 = vpop.f32.mrf.mxu1  ;;  %v1313_v36 = vmax.f32 %v1217_v60, 0.0  ;;  %v5603_v10 = vpack.c.bf16 %v1316_v50, %v1312_v14  ;;  %v3953_v60 = vld [vmem:[#allocation3 + $0xe8] sm:$0xf]  ;;  %v6540_v50 = vld [vmem:[#allocation70_spill] sm:$0xff]  ;;  %v4476_v14 = vld [vmem:[#allocation3 + $0x3f4] sm:$0xf0] }
 0x22f   : > { %v2169_v11 = vadd.f32 %v2168_v23, %v5510_v9  ;;  %v4338_v12 = vor.u32 %v4476_v14, %v4337_v40 }
 0x230   : > { %v5592_v24 = vadd.f32 %v2373_v42, %v2305_v47  ;;  %v5605_v18 = vpack.c.bf16 %v1317_v33, %v1313_v36  ;;  %v982_v33 = vadd.f32 %v5458_v0, %v6540_v50  ;;  %v6542_v36 = vld [vmem:[#allocation72_spill] sm:$0xff]  ;;  %v1325_v50 = vmax.f32 %v1229_v32, 0.0  ;;  %v4193_v32 = vld [vmem:[#allocation3 + $0x2c8] sm:$0xf] }
 0x231   : > { %v2238_v26 = vadd.f32 %v2237_v31, %v2169_v11  ;;  %v6535_v31 = vld [vmem:[#allocation73_spill] sm:$0xff]  ;;  %v984_v11 = vadd.f32 %v5494_v8, %v6536_v13  ;;  %v1120_v17 = vadd.f32 %v5486_v6, %v6542_v36  ;;  %v1228_v13 = vadd.f32 %v5050_v51, %v1053_v3  ;;  %2911 = vmatpush.bf16.msra.mxu3 %v4338_v12  ;;  %v4081_v3 = vld [vmem:[#allocation3 + $0x1e8] sm:$0xf] }
 0x232   : > { %6534 = vst [vmem:[#allocation23_spill] sm:$0xff] %v5605_v18  ;;  %v915_v57 = vadd.f32 %v5492_v45, %v6535_v31  ;;  %v1051_v45 = vadd.f32 %v5484_v63, %v6541_v5  ;;  %v1222_v6 = vadd.f32 %v5046_v7, %v913_v38  ;;  %v4412_v5 = vld [vmem:[#allocation3 + $0x1f4] sm:$0xf0] }
 0x233   : > { %v1227_v0 = vadd.f32 %v5048_v37, %v984_v11  ;;  %v1225_v11 = vadd.f32 %v5052_v52, %v1120_v17  ;;  %v1324_v25 = vmax.f32 %v1228_v13, 0.0 }
 0x234   : > { %v1226_v31 = vadd.f32 %v5046_v7, %v915_v57  ;;  %v1224_v57 = vadd.f32 %v5050_v51, %v1051_v45  ;;  %v1318_v35 = vmax.f32 %v1222_v6, 0.0  ;;  %v4440_v6 = vld [vmem:[#allocation3 + $0x2d4] sm:$0xf0] }
 0x235   : > { %v2306_v53 = vpop.f32.mrf.mxu2  ;;  %v2375_v62 = vpop.f32.mrf.mxu3  ;;  %v1321_v7 = vmax.f32 %v1225_v11, 0.0  ;;  %v4194_v11 = vor.u32 %v4440_v6, %v4193_v32 }
 0x236   : > { %v2307_v42 = vadd.f32 %v2306_v53, %v2238_v26  ;;  %v2171_v49 = vpop.f32.mrf.mxu0  ;;  %v2240_v21 = vpop.f32.mrf.mxu1  ;;  %v4209_v26 = vld [vmem:[#allocation3 + $0x2e8] sm:$0xf]  ;;  %v1320_v40 = vmax.f32 %v1224_v57, 0.0 }
 0x237   : > { %v2172_v20 = vadd.f32 %v2171_v49, %v5510_v9  ;;  %v4210_v53 = vor.u32 %v4444_v34, %v4209_v26  ;;  %v1322_v34 = vmax.f32 %v1226_v31, 0.0  ;;  %v5647_v36 = vpack.c.bf16 %v1325_v50, %v1321_v7  ;;  %v4408_v7 = vld [vmem:[#allocation3 + $0x1d4] sm:$0xf0] }
 0x238   : > { %v5607_v47 = vadd.f32 %v2375_v62, %v2307_v42  ;;  %2279 = vmatmul.bf16.gmra.mxu1 %v5600_v2  ;;  %v4380_v62 = vld [vmem:[#allocation3 + $0xf4] sm:$0xf0]  ;;  %v5645_v45 = vpack.c.bf16 %v1324_v25, %v1320_v40  ;;  %v4065_v40 = vld [vmem:[#allocation3 + $0x1c8] sm:$0xf] }
 0x239   : > { %v2241_v23 = vadd.f32 %v2240_v21, %v2172_v20  ;;  %2210 = vmatmul.bf16.gmra.mxu0 %v5598_v16  ;;  %v3954_v20 = vor.u32 %v4380_v62, %v3953_v60  ;;  %2842 = vmatpush.bf16.msra.mxu2 %v4210_v53  ;;  %v1323_v60 = vmax.f32 %v1227_v0, 0.0  ;;  %v4082_v62 = vor.u32 %v4412_v5, %v4081_v3  ;;  %v4472_v25 = vld [vmem:[#allocation3 + $0x3d4] sm:$0xf0] }
 0x23a   : > { %2348 = vmatmul.bf16.gmra.mxu2 %v5603_v10  ;;  %2417 = vmatmul.bf16.gmra.mxu3 %v5605_v18  ;;  %v5640_v14 = vpack.c.bf16 %v1322_v34, %v1318_v35  ;;  %v4376_v34 = vld [vmem:[#allocation3 + $0xd4] sm:$0xf0] }
 0x23b   : > { %2704 = vmatpush.bf16.msra.mxu0 %v3954_v20  ;;  %2773 = vmatpush.bf16.msra.mxu1 %v4082_v62 }
 0x23d   : > { %v2309_v4 = vpop.f32.mrf.mxu2  ;;  %v2378_v8 = vpop.f32.mrf.mxu3  ;;  %2843 = vmatpush.bf16.msra.mxu2 %v4194_v11  ;;  %v4177_v11 = vld [vmem:[#allocation3 + $0x2a8] sm:$0xf] }
 0x23e   : > { %v2310_v42 = vadd.f32 %v2309_v4, %v2241_v23  ;;  %v2173_v49 = vpop.f32.mrf.mxu0  ;;  %v2242_v21 = vpop.f32.mrf.mxu1  ;;  %v1223_v23 = vadd.f32 %v5048_v37, %v982_v33 }
 0x23f   : > { %v2174_v63 = vadd.f32 %v2173_v49, %v5510_v9 }
 0x240   : > { %v5634_v56 = vadd.f32 %v2378_v8, %v2310_v42  ;;  %v1319_v4 = vmax.f32 %v1223_v23, 0.0  ;;  %v3937_v23 = vld [vmem:[#allocation3 + $0xc8] sm:$0xf] }
 0x241   : > { %v2243_v26 = vadd.f32 %v2242_v21, %v2174_v63  ;;  %v3938_v35 = vor.u32 %v4376_v34, %v3937_v23  ;;  %v4436_v34 = vld [vmem:[#allocation3 + $0x2b4] sm:$0xf0] }
 0x242   : > { %v5642_v51 = vpack.c.bf16 %v1323_v60, %v1319_v4  ;;  %v4321_v60 = vld [vmem:[#allocation3 + $0x3c8] sm:$0xf] }
 0x243   : > { %v4322_v4 = vor.u32 %v4472_v25, %v4321_v60  ;;  %2705 = vmatpush.bf16.msra.mxu0 %v3938_v35  ;;  %v3921_v60 = vld [vmem:[#allocation3 + $0xa8] sm:$0xf] }
 0x244   : > { %v4305_v35 = vld [vmem:[#allocation3 + $0x3a8] sm:$0xf] }
 0x245   : > { %v2311_v8 = vpop.f32.mrf.mxu2  ;;  %v2380_v53 = vpop.f32.mrf.mxu3  ;;  %2912 = vmatpush.bf16.msra.mxu3 %v4322_v4  ;;  %v4468_v4 = vld [vmem:[#allocation3 + $0x3b4] sm:$0xf0] }
 0x246   : > { %v2312_v38 = vadd.f32 %v2311_v8, %v2243_v26  ;;  %v2176_v37 = vpop.f32.mrf.mxu0  ;;  %v2245_v33 = vpop.f32.mrf.mxu1 }
 0x247   : > { %v2177_v52 = vadd.f32 %v2176_v37, %v5510_v9 }
 0x248   : > { %v5649_v17 = vadd.f32 %v2380_v53, %v2312_v38  ;;  %2284 = vmatmul.bf16.gmra.mxu1 %v5642_v51 }
 0x249   : > { %v2246_v42 = vadd.f32 %v2245_v33, %v2177_v52  ;;  %2215 = vmatmul.bf16.gmra.mxu0 %v5640_v14  ;;  %v4066_v33 = vor.u32 %v4408_v7, %v4065_v40 }
 0x24a   : > { %2353 = vmatmul.bf16.gmra.mxu2 %v5645_v45  ;;  %2422 = vmatmul.bf16.gmra.mxu3 %v5647_v36 }
 0x24b   : > { %2774 = vmatpush.bf16.msra.mxu1 %v4066_v33 }
 0x24d   : > { %v2314_v49 = vpop.f32.mrf.mxu2  ;;  %v2383_v21 = vpop.f32.mrf.mxu3 }
 0x24e   : > { %v2315_v20 = vadd.f32 %v2314_v49, %v2246_v42  ;;  %v2178_v12 = vpop.f32.mrf.mxu0  ;;  %v2247_v31 = vpop.f32.mrf.mxu1 }
 0x24f   : > { %v2179_v0 = vadd.f32 %v2178_v12, %v5510_v9 }
 0x250   : > { %v5656_v63 = vadd.f32 %v2383_v21, %v2315_v20 }
 0x251   : > { %v2248_v13 = vadd.f32 %v2247_v31, %v2179_v0 }
 0x255   : > { %v2316_v26 = vpop.f32.mrf.mxu2  ;;  %v2385_v57 = vpop.f32.mrf.mxu3 }
 0x256   : > { %v2317_v50 = vadd.f32 %v2316_v26, %v2248_v13  ;;  %v2181_v3 = vpop.f32.mrf.mxu0  ;;  %v2250_v5 = vpop.f32.mrf.mxu1 }
 0x257   : > { %v2182_v8 = vadd.f32 %v2181_v3, %v5510_v9  ;;  %v4178_v3 = vor.u32 %v4436_v34, %v4177_v11 }
 0x258   : > { %v5659_v53 = vadd.f32 %v2385_v57, %v2317_v50  ;;  %2505 = vmatmul.bf16.vlgmr.msrb.gmra.mxu1 %v5098_v61 }
 0x259   : > { %v2251_v62 = vadd.f32 %v2250_v5, %v2182_v8  ;;  %2436 = vmatmul.bf16.vlgmr.msrb.gmra.mxu0 %v5096_v30  ;;  %v4372_v5 = vld [vmem:[#allocation3 + $0xb4] sm:$0xf0]  ;;  %2844 = vmatpush.bf16.msra.mxu2 %v4178_v3 }
 0x25a   : > { %2574 = vmatmul.bf16.vlgmr.msrb.gmra.mxu2 %v5100_v59  ;;  %2643 = vmatmul.bf16.vlgmr.msrb.gmra.mxu3 %v5102_v15  ;;  %v3922_v7 = vor.u32 %v4372_v5, %v3921_v60 }
 0x25c   : > { %2706 = vmatpush.bf16.msra.mxu0 %v3922_v7 }
 0x25d   : > { %v2319_v38 = vpop.f32.mrf.mxu2  ;;  %v2388_v37 = vpop.f32.mrf.mxu3 }
 0x25e   : > { %v2320_v52 = vadd.f32 %v2319_v38, %v2251_v62  ;;  %v2183_v42 = vpop.f32.mrf.mxu0  ;;  %v2252_v49 = vpop.f32.mrf.mxu1  ;;  %v4306_v38 = vor.u32 %v4468_v4, %v4305_v35  ;;  %v4161_v4 = vld [vmem:[#allocation3 + $0x288] sm:$0xf] }
 0x25f   : > { %v2184_v21 = vadd.f32 %v2183_v42, %v5510_v9  ;;  %v4049_v42 = vld [vmem:[#allocation3 + $0x1a8] sm:$0xf] }
 0x260   : > { %v5666_v20 = vadd.f32 %v2388_v37, %v2320_v52  ;;  %2913 = vmatpush.bf16.msra.mxu3 %v4306_v38 }
 0x261   : > { %v2253_v12 = vadd.f32 %v2252_v49, %v2184_v21  ;;  %v4404_v49 = vld [vmem:[#allocation3 + $0x1b4] sm:$0xf0] }
 0x265   : > { %v2321_v31 = vpop.f32.mrf.mxu2  ;;  %v2390_v0 = vpop.f32.mrf.mxu3 }
 0x266   : > { %v2322_v13 = vadd.f32 %v2321_v31, %v2253_v12  ;;  %v2186_v32 = vpop.f32.mrf.mxu0  ;;  %v2255_v6 = vpop.f32.mrf.mxu1  ;;  %v4050_v31 = vor.u32 %v4404_v49, %v4049_v42  ;;  %v4464_v42 = vld [vmem:[#allocation3 + $0x394] sm:$0xf0] }
 0x267   : > { %v2187_v23 = vadd.f32 %v2186_v32, %v5510_v9 }
 0x268   : > { %v5669_v26 = vadd.f32 %v2390_v0, %v2322_v13  ;;  %2510 = vmatmul.bf16.gmra.mxu1 %v5150_v41 }
 0x269   : > { %v2256_v57 = vadd.f32 %v2255_v6, %v2187_v23  ;;  %2441 = vmatmul.bf16.gmra.mxu0 %v5148_v54  ;;  %2775 = vmatpush.bf16.msra.mxu1 %v4050_v31 }
 0x26a   : > { %2579 = vmatmul.bf16.gmra.mxu2 %v5152_v44  ;;  %2648 = vmatmul.bf16.gmra.mxu3 %v5154_v43 }
 0x26d   : > { %v2324_v25 = vpop.f32.mrf.mxu2  ;;  %v2393_v50 = vpop.f32.mrf.mxu3 }
 0x26e   : > { %v2325_v8 = vadd.f32 %v2324_v25, %v2256_v57  ;;  %v2188_v62 = vpop.f32.mrf.mxu0  ;;  %v2257_v40 = vpop.f32.mrf.mxu1 }
 0x26f   : > { %v2189_v37 = vadd.f32 %v2188_v62, %v5510_v9  ;;  %v3905_v62 = vld [vmem:[#allocation3 + $0x88] sm:$0xf] }
 0x270   : > { %v5676_v33 = vadd.f32 %v2393_v50, %v2325_v8  ;;  %v4432_v8 = vld [vmem:[#allocation3 + $0x294] sm:$0xf0] }
 0x271   : > { %v2258_v52 = vadd.f32 %v2257_v40, %v2189_v37  ;;  %v4162_v38 = vor.u32 %v4432_v8, %v4161_v4  ;;  %v4368_v37 = vld [vmem:[#allocation3 + $0x94] sm:$0xf0] }
 0x272   : > { %v3906_v31 = vor.u32 %v4368_v37, %v3905_v62 }
 0x273   : > { %2845 = vmatpush.bf16.msra.mxu2 %v4162_v38 }
 0x274   : > { %2707 = vmatpush.bf16.msra.mxu0 %v3906_v31 }
 0x275   : > { %v2326_v21 = vpop.f32.mrf.mxu2  ;;  %v2395_v12 = vpop.f32.mrf.mxu3 }
 0x276   : > { %v2327_v0 = vadd.f32 %v2326_v21, %v2258_v52  ;;  %v2191_v13 = vpop.f32.mrf.mxu0  ;;  %v2260_v32 = vpop.f32.mrf.mxu1  ;;  %v4289_v52 = vld [vmem:[#allocation3 + $0x388] sm:$0xf] }
 0x277   : > { %v2192_v6 = vadd.f32 %v2191_v13, %v5510_v9 }
 0x278   : > { %v5679_v23 = vadd.f32 %v2395_v12, %v2327_v0  ;;  %2515 = vmatmul.bf16.gmra.mxu1 %v5202_v46  ;;  %v4290_v0 = vor.u32 %v4464_v42, %v4289_v52 }
 0x279   : > { %v2261_v57 = vadd.f32 %v2260_v32, %v2192_v6  ;;  %2446 = vmatmul.bf16.gmra.mxu0 %v5200_v1 }
 0x27a   : > { %2584 = vmatmul.bf16.gmra.mxu2 %v5204_v27  ;;  %2653 = vmatmul.bf16.gmra.mxu3 %v5206_v19 }
 0x27b   : > { %2914 = vmatpush.bf16.msra.mxu3 %v4290_v0 }
 0x27d   : > { %v2329_v11 = vpop.f32.mrf.mxu2  ;;  %v2398_v34 = vpop.f32.mrf.mxu3 }
 0x27e   : > { %v2330_v60 = vadd.f32 %v2329_v11, %v2261_v57  ;;  %v2193_v25 = vpop.f32.mrf.mxu0  ;;  %v2262_v50 = vpop.f32.mrf.mxu1  ;;  %v6543_v57 = vld [vmem:[#allocation6_spill] sm:$0xff]  ;;  %v6544_v11 = vld [vmem:[#allocation9_spill] sm:$0xff] }
 0x27f   : > { %v2194_v3 = vadd.f32 %v2193_v25, %v5510_v9  ;;  %v4033_v25 = vld [vmem:[#allocation3 + $0x188] sm:$0xf] }
 0x280   : > { %v5686_v5 = vadd.f32 %v2398_v34, %v2330_v60  ;;  %v6545_v34 = vld [vmem:[#allocation10_spill] sm:$0xff]  ;;  %v6546_v60 = vld [vmem:[#allocation79_spill] sm:$0xff] }
 0x281   : > { %v2263_v35 = vadd.f32 %v2262_v50, %v2194_v3  ;;  %v4400_v50 = vld [vmem:[#allocation3 + $0x194] sm:$0xf0] }
 0x282   : > { %v4034_v4 = vor.u32 %v4400_v50, %v4033_v25  ;;  %v6549_v25 = vld [vmem:[#allocation7_spill] sm:$0xff]  ;;  %v6551_v50 = vld [vmem:[#allocation8_spill] sm:$0xff] }
 0x284   : > { %2776 = vmatpush.bf16.msra.mxu1 %v4034_v4  ;;  %v4428_v4 = vld [vmem:[#allocation3 + $0x274] sm:$0xf0] }
 0x285   : > { %v2331_v40 = vpop.f32.mrf.mxu2  ;;  %v2400_v7 = vpop.f32.mrf.mxu3 }
 0x286   : > { %v2332_v49 = vadd.f32 %v2331_v40, %v2263_v35  ;;  %v2196_v21 = vpop.f32.mrf.mxu0  ;;  %v2265_v12 = vpop.f32.mrf.mxu1 }
 0x287   : > { %v2197_v13 = vadd.f32 %v2196_v21, %v5510_v9 }
 0x288   : > { %v5689_v32 = vadd.f32 %v2400_v7, %v2332_v49  ;;  %2520 = vmatmul.bf16.gmra.mxu1 %v6544_v11 }
 0x289   : > { %v2266_v6 = vadd.f32 %v2265_v12, %v2197_v13  ;;  %2451 = vmatmul.bf16.gmra.mxu0 %v6543_v57 }
 0x28a   : > { %2589 = vmatmul.bf16.gmra.mxu2 %v6545_v34  ;;  %2658 = vmatmul.bf16.gmra.mxu3 %v6546_v60 }
 0x28d   : > { %v2334_v3 = vpop.f32.mrf.mxu2  ;;  %v2403_v35 = vpop.f32.mrf.mxu3 }
 0x28e   : > { %v2335_v8 = vadd.f32 %v2334_v3, %v2266_v6  ;;  %v2198_v62 = vpop.f32.mrf.mxu0  ;;  %v2267_v40 = vpop.f32.mrf.mxu1  ;;  %v6550_v6 = vld [vmem:[#allocation77_spill] sm:$0xff]  ;;  %v6552_v3 = vld [vmem:[#allocation78_spill] sm:$0xff] }
 0x28f   : > { %v2199_v7 = vadd.f32 %v2198_v62, %v5510_v9 }
 0x290   : > { %v5696_v38 = vadd.f32 %v2403_v35, %v2335_v8  ;;  %v4145_v35 = vld [vmem:[#allocation3 + $0x268] sm:$0xf] }
 0x291   : > { %v2268_v37 = vadd.f32 %v2267_v40, %v2199_v7  ;;  %v3889_v8 = vld [vmem:[#allocation3 + $0x68] sm:$0xf]  ;;  %v4146_v7 = vor.u32 %v4428_v4, %v4145_v35 }
 0x292   : > { %6547 = vst [vmem:[#allocation24_spill] sm:$0xff] %v5696_v38  ;;  %v4396_v38 = vld [vmem:[#allocation3 + $0x174] sm:$0xf0] }
 0x293   : > { %2846 = vmatpush.bf16.msra.mxu2 %v4146_v7  ;;  %v6555_v7 = vld [vmem:[#allocation11_spill] sm:$0xff] }
 0x295   : > { %v2336_v52 = vpop.f32.mrf.mxu2  ;;  %v2405_v42 = vpop.f32.mrf.mxu3 }
 0x296   : > { %v2337_v49 = vadd.f32 %v2336_v52, %v2268_v37  ;;  %v2201_v21 = vpop.f32.mrf.mxu0  ;;  %v2270_v12 = vpop.f32.mrf.mxu1  ;;  %v4364_v37 = vld [vmem:[#allocation3 + $0x74] sm:$0xf0]  ;;  %v4273_v52 = vld [vmem:[#allocation3 + $0x368] sm:$0xf] }
 0x297   : > { %v2202_v31 = vadd.f32 %v2201_v21, %v5510_v9  ;;  %v4460_v21 = vld [vmem:[#allocation3 + $0x374] sm:$0xf0] }
 0x298   : > { %v5699_v0 = vadd.f32 %v2405_v42, %v2337_v49  ;;  %2525 = vmatmul.bf16.gmra.mxu1 %v6550_v6 }
 0x299   : > { %v2271_v13 = vadd.f32 %v2270_v12, %v2202_v31  ;;  %2456 = vmatmul.bf16.gmra.mxu0 %v6549_v25  ;;  %v3890_v31 = vor.u32 %v4364_v37, %v3889_v8  ;;  %v4274_v25 = vor.u32 %v4460_v21, %v4273_v52 }
 0x29a   : > { %6548 = vst [vmem:[#allocation29_spill] sm:$0xff] %v5699_v0  ;;  %2594 = vmatmul.bf16.gmra.mxu2 %v6551_v50  ;;  %2663 = vmatmul.bf16.gmra.mxu3 %v6552_v3  ;;  %v4017_v0 = vld [vmem:[#allocation3 + $0x168] sm:$0xf] }
 0x29b   : > { %2708 = vmatpush.bf16.msra.mxu0 %v3890_v31  ;;  %2915 = vmatpush.bf16.msra.mxu3 %v4274_v25  ;;  %v4018_v4 = vor.u32 %v4396_v38, %v4017_v0  ;;  %v6557_v25 = vld [vmem:[#allocation80_spill] sm:$0xff] }
 0x29d   : > { %v2339_v62 = vpop.f32.mrf.mxu2  ;;  %v2408_v40 = vpop.f32.mrf.mxu3  ;;  %2777 = vmatpush.bf16.msra.mxu1 %v4018_v4 }
 0x29e   : > { %v2340_v42 = vadd.f32 %v2339_v62, %v2271_v13  ;;  %v2203_v49 = vpop.f32.mrf.mxu0  ;;  %v2272_v12 = vpop.f32.mrf.mxu1 }
 0x29f   : > { %v2204_v6 = vadd.f32 %v2203_v49, %v5510_v9  ;;  %v4424_v49 = vld [vmem:[#allocation3 + $0x254] sm:$0xf0] }
 0x2a0   : > { %v5706_v50 = vadd.f32 %v2408_v40, %v2340_v42  ;;  %v6556_v40 = vld [vmem:[#allocation12_spill] sm:$0xff]  ;;  %v4129_v42 = vld [vmem:[#allocation3 + $0x248] sm:$0xf] }
 0x2a1   : > { %v2273_v3 = vadd.f32 %v2272_v12, %v2204_v6  ;;  %v6558_v6 = vld [vmem:[#allocation17_spill] sm:$0xff]  ;;  %v3873_v12 = vld [vmem:[#allocation3 + $0x48] sm:$0xf]  ;;  %v4130_v4 = vor.u32 %v4424_v49, %v4129_v42 }
 0x2a2   : > { %6553 = vst [vmem:[#allocation30_spill] sm:$0xff] %v5706_v50  ;;  %v6564_v42 = vld [vmem:[#allocation13_spill] sm:$0xff] }
 0x2a3   : > { %2847 = vmatpush.bf16.msra.mxu2 %v4130_v4  ;;  %v4392_v49 = vld [vmem:[#allocation3 + $0x154] sm:$0xf0] }
 0x2a5   : > { %v2341_v60 = vpop.f32.mrf.mxu2  ;;  %v2410_v35 = vpop.f32.mrf.mxu3 }
 0x2a6   : > { %v2342_v34 = vadd.f32 %v2341_v60, %v2273_v3  ;;  %v2206_v11 = vpop.f32.mrf.mxu0  ;;  %v2275_v13 = vpop.f32.mrf.mxu1 }
 0x2a7   : > { %v2207_v62 = vadd.f32 %v2206_v11, %v5510_v9 }
 0x2a8   : > { %v5709_v8 = vadd.f32 %v2410_v35, %v2342_v34  ;;  %2530 = vmatmul.bf16.gmra.mxu1 %v6556_v40 }
 0x2a9   : > { %v2276_v37 = vadd.f32 %v2275_v13, %v2207_v62  ;;  %2461 = vmatmul.bf16.gmra.mxu0 %v6555_v7  ;;  %v4360_v13 = vld [vmem:[#allocation3 + $0x54] sm:$0xf0]  ;;  %v4257_v62 = vld [vmem:[#allocation3 + $0x348] sm:$0xf] }
 0x2aa   : > { %6554 = vst [vmem:[#allocation33_spill] sm:$0xff] %v5709_v8  ;;  %2599 = vmatmul.bf16.gmra.mxu2 %v6557_v25  ;;  %2668 = vmatmul.bf16.gmra.mxu3 %v6558_v6  ;;  %v4456_v25 = vld [vmem:[#allocation3 + $0x354] sm:$0xf0] }
 0x2ad   : > { %v2344_v52 = vpop.f32.mrf.mxu2  ;;  %v2413_v21 = vpop.f32.mrf.mxu3 }
 0x2ae   : > { %v2345_v38 = vadd.f32 %v2344_v52, %v2276_v37  ;;  %v2208_v60 = vpop.f32.mrf.mxu0  ;;  %v2277_v0 = vpop.f32.mrf.mxu1  ;;  %v3874_v37 = vor.u32 %v4360_v13, %v3873_v12  ;;  %v4258_v52 = vor.u32 %v4456_v25, %v4257_v62 }
 0x2af   : > { %v2209_v3 = vadd.f32 %v2208_v60, %v5510_v9  ;;  %v6561_v60 = vld [vmem:[#allocation18_spill] sm:$0xff] }
 0x2b0   : > { %v5716_v11 = vadd.f32 %v2413_v21, %v2345_v38  ;;  %2709 = vmatpush.bf16.msra.mxu0 %v3874_v37  ;;  %2916 = vmatpush.bf16.msra.mxu3 %v4258_v52 }
 0x2b1   : > { %v2278_v34 = vadd.f32 %v2277_v0, %v2209_v3  ;;  %v6562_v0 = vld [vmem:[#allocation19_spill] sm:$0xff]  ;;  %v6563_v3 = vld [vmem:[#allocation20_spill] sm:$0xff] }
 0x2b2   : > { %6559 = vst [vmem:[#allocation34_spill] sm:$0xff] %v5716_v11 }
 0x2b5   : > { %v2346_v31 = vpop.f32.mrf.mxu2  ;;  %v2415_v35 = vpop.f32.mrf.mxu3 }
 0x2b6   : > { %v2347_v6 = vadd.f32 %v2346_v31, %v2278_v34  ;;  %v2211_v40 = vpop.f32.mrf.mxu0  ;;  %v2280_v7 = vpop.f32.mrf.mxu1  ;;  %v4001_v34 = vld [vmem:[#allocation3 + $0x148] sm:$0xf] }
 0x2b7   : > { %v2212_v8 = vadd.f32 %v2211_v40, %v5510_v9  ;;  %v4002_v31 = vor.u32 %v4392_v49, %v4001_v34  ;;  %v6567_v34 = vld [vmem:[#allocation14_spill] sm:$0xff]  ;;  %v6569_v49 = vld [vmem:[#allocation16_spill] sm:$0xff] }
 0x2b8   : > { %v5719_v21 = vadd.f32 %v2415_v35, %v2347_v6  ;;  %2535 = vmatmul.bf16.gmra.mxu1 %v6562_v0 }
 0x2b9   : > { %v2281_v38 = vadd.f32 %v2280_v7, %v2212_v8  ;;  %2466 = vmatmul.bf16.gmra.mxu0 %v6561_v60  ;;  %2778 = vmatpush.bf16.msra.mxu1 %v4002_v31  ;;  %v4420_v31 = vld [vmem:[#allocation3 + $0x234] sm:$0xf0] }
 0x2ba   : > { %6560 = vst [vmem:[#allocation31_spill] sm:$0xff] %v5719_v21  ;;  %2604 = vmatmul.bf16.gmra.mxu2 %v6563_v3  ;;  %2673 = vmatmul.bf16.gmra.mxu3 %v6564_v42 }
 0x2bd   : > { %v2349_v12 = vpop.f32.mrf.mxu2  ;;  %v2418_v25 = vpop.f32.mrf.mxu3 }
 0x2be   : > { %v2350_v40 = vadd.f32 %v2349_v12, %v2281_v38  ;;  %v2213_v4 = vpop.f32.mrf.mxu0  ;;  %v2282_v6 = vpop.f32.mrf.mxu1  ;;  %v6568_v38 = vld [vmem:[#allocation15_spill] sm:$0xff]  ;;  %v6570_v12 = vld [vmem:[#allocation25_spill] sm:$0xff] }
 0x2bf   : > { %v2214_v35 = vadd.f32 %v2213_v4, %v5510_v9 }
 0x2c0   : > { %v5726_v8 = vadd.f32 %v2418_v25, %v2350_v40  ;;  %v4113_v25 = vld [vmem:[#allocation3 + $0x228] sm:$0xf] }
 0x2c1   : > { %v2283_v7 = vadd.f32 %v2282_v6, %v2214_v35  ;;  %v3857_v40 = vld [vmem:[#allocation3 + $0x28] sm:$0xf]  ;;  %v4114_v35 = vor.u32 %v4420_v31, %v4113_v25  ;;  %v4388_v31 = vld [vmem:[#allocation3 + $0x134] sm:$0xf0] }
 0x2c2   : > { %6565 = vst [vmem:[#allocation32_spill] sm:$0xff] %v5726_v8  ;;  %v3985_v25 = vld [vmem:[#allocation3 + $0x128] sm:$0xf] }
 0x2c3   : > { %2848 = vmatpush.bf16.msra.mxu2 %v4114_v35 }
 0x2c5   : > { %v2351_v13 = vpop.f32.mrf.mxu2  ;;  %v2420_v62 = vpop.f32.mrf.mxu3 }
 0x2c6   : > { %v2352_v37 = vadd.f32 %v2351_v13, %v2283_v7  ;;  %v2216_v52 = vpop.f32.mrf.mxu0  ;;  %v2285_v3 = vpop.f32.mrf.mxu1  ;;  %v4356_v7 = vld [vmem:[#allocation3 + $0x34] sm:$0xf0]  ;;  %v4241_v13 = vld [vmem:[#allocation3 + $0x328] sm:$0xf] }
 0x2c7   : > { %v2217_v42 = vadd.f32 %v2216_v52, %v5510_v9  ;;  %v4452_v52 = vld [vmem:[#allocation3 + $0x334] sm:$0xf0] }
 0x2c8   : > { %v5729_v0 = vadd.f32 %v2420_v62, %v2352_v37  ;;  %2540 = vmatmul.bf16.gmra.mxu1 %v6568_v38 }
 0x2c9   : > { %v2286_v60 = vadd.f32 %v2285_v3, %v2217_v42  ;;  %2471 = vmatmul.bf16.gmra.mxu0 %v6567_v34  ;;  %v3858_v42 = vor.u32 %v4356_v7, %v3857_v40  ;;  %v4242_v34 = vor.u32 %v4452_v52, %v4241_v13 }
 0x2ca   : > { %6566 = vst [vmem:[#allocation35_spill] sm:$0xff] %v5729_v0  ;;  %2609 = vmatmul.bf16.gmra.mxu2 %v6569_v49  ;;  %2678 = vmatmul.bf16.gmra.mxu3 %v6570_v12  ;;  %v6571_v0 = vld [vmem:[#allocation26_spill] sm:$0xff] }
 0x2cb   : > { %2710 = vmatpush.bf16.msra.mxu0 %v3858_v42  ;;  %2917 = vmatpush.bf16.msra.mxu3 %v4242_v34  ;;  %v5739_v8 = vperm.slane %v6571_v0, 1  ;;  %v6573_v34 = vld [vmem:[#allocation28_spill] sm:$0xff]  ;;  %v6574_v0 = vld [vmem:[#allocation21_spill] sm:$0xff] }
 0x2cd   : > { %v2354_v4 = vpop.f32.mrf.mxu2  ;;  %v2423_v6 = vpop.f32.mrf.mxu3 }
 0x2ce   : > { %v2355_v62 = vadd.f32 %v2354_v4, %v2286_v60  ;;  %v2218_v37 = vpop.f32.mrf.mxu0  ;;  %v2287_v3 = vpop.f32.mrf.mxu1  ;;  %v3986_v60 = vor.u32 %v4388_v31, %v3985_v25 }
 0x2cf   : > { %v2219_v38 = vadd.f32 %v2218_v37, %v5510_v9 }
 0x2d0   : > { %v5736_v49 = vadd.f32 %v2423_v6, %v2355_v62  ;;  %2779 = vmatpush.bf16.msra.mxu1 %v3986_v60  ;;  %v3256_v62 = vmax.f32 %v5553_v48, 0.0  ;;  %v4352_v48 = vld [vmem:[#allocation3 + $0x14] sm:$0xf0] }
 0x2d1   : > { %v2288_v12 = vadd.f32 %v2287_v3, %v2219_v38  ;;  %v6575_v38 = vld [vmem:[#allocation22_spill] sm:$0xff] }
 0x2d5   : > { %v2356_v21 = vpop.f32.mrf.mxu2  ;;  %v2425_v11 = vpop.f32.mrf.mxu3 }
 0x2d6   : > { %v2357_v4 = vadd.f32 %v2356_v21, %v2288_v12  ;;  %v2437_v50 = vpop.f32.mrf.mxu0  ;;  %v2506_v40 = vpop.f32.mrf.mxu1  ;;  %v5751_v21 = vld [vmem:[%s6311_s7] sm:$0xf] }
 0x2d7   : > { %v2438_v7 = vadd.f32 %v2437_v50, %v5739_v8  ;;  %6576 = vst [vmem:[#allocation41_spill] sm:$0xff] %v5751_v21  ;;  %v5756_v37 = vperm.slane %v5751_v21, 0  ;;  %v5759_v42 = vperm.slane %v5751_v21, 1 }
 0x2d8   : > { %v5742_v9 = vadd.f32 %v2425_v11, %v2357_v4  ;;  %2545 = vmatmul.bf16.gmra.mxu1 %v6573_v34  ;;  %v4448_v34 = vld [vmem:[#allocation3 + $0x314] sm:$0xf0] }
 0x2d9   : > { %v2507_v6 = vadd.f32 %v2506_v40, %v2438_v7  ;;  %2476 = vmatmul.bf16.gmra.mxu0 %v5516_v22  ;;  %v3362_v60 = vmul.f32 %v5756_v37, %v3256_v62  ;;  %v4097_v40 = vld [vmem:[#allocation3 + $0x208] sm:$0xf]  ;;  %v4416_v7 = vld [vmem:[#allocation3 + $0x214] sm:$0xf0]  ;;  %v3260_v62 = vmax.f32 %v5565_v55, 0.0 }
 0x2da   : > { %6572 = vst [vmem:[#allocation36_spill] sm:$0xff] %v5742_v9  ;;  %2614 = vmatmul.bf16.gmra.mxu2 %v6574_v0  ;;  %2683 = vmatmul.bf16.gmra.mxu3 %v6575_v38  ;;  %v4098_v38 = vor.u32 %v4416_v7, %v4097_v40  ;;  %v4225_v0 = vld [vmem:[#allocation3 + $0x308] sm:$0xf] }
 0x2db   : > { %v4226_v9 = vor.u32 %v4448_v34, %v4225_v0  ;;  %v3366_v34 = vmul.f32 %v5756_v37, %v3260_v62 }
 0x2dc   : > { %2849 = vmatpush.bf16.msra.mxu2 %v4098_v38  ;;  %v3969_v38 = vld [vmem:[#allocation3 + $0x108] sm:$0xf] }
 0x2dd   : > { %v2575_v12 = vpop.f32.mrf.mxu2  ;;  %v2644_v35 = vpop.f32.mrf.mxu3  ;;  %2918 = vmatpush.bf16.msra.mxu3 %v4226_v9 }
 0x2de   : > { %v2576_v50 = vadd.f32 %v2575_v12, %v2507_v6  ;;  %v2439_v13 = vpop.f32.mrf.mxu0  ;;  %v2508_v11 = vpop.f32.mrf.mxu1  ;;  %v3841_v6 = vld [vmem:[#allocation3 + $0x8] sm:$0xf] }
 0x2df   : > { %v2440_v52 = vadd.f32 %v2439_v13, %v5739_v8  ;;  %v3842_v21 = vor.u32 %v4352_v48, %v3841_v6 }
 0x2e0   : > { %v2645_v3 = vadd.f32 %v2644_v35, %v2576_v50 }
 0x2e1   : > { %v2509_v25 = vadd.f32 %v2508_v11, %v2440_v52  ;;  %2711 = vmatpush.bf16.msra.mxu0 %v3842_v21 }
 0x2e2   : > { %v3257_v31 = vmax.f32 %v2645_v3, 0.0 }
 0x2e4   : > { %v3363_v4 = vmul.f32 %v5759_v42, %v3257_v31 }
 0x2e5   : > { %v2577_v12 = vpop.f32.mrf.mxu2  ;;  %v2646_v13 = vpop.f32.mrf.mxu3 }
 0x2e6   : > { %v2578_v22 = vadd.f32 %v2577_v12, %v2509_v25  ;;  %v2442_v35 = vpop.f32.mrf.mxu0  ;;  %v2511_v50 = vpop.f32.mrf.mxu1  ;;  %v5763_v11 = vadd.f32 %v3363_v4, %v3362_v60  ;;  %v4384_v60 = vld [vmem:[#allocation3 + $0x114] sm:$0xf0]  ;;  %v3264_v12 = vmax.f32 %v5592_v24, 0.0 }
 0x2e7   : > { %v2443_v52 = vadd.f32 %v2442_v35, %v5739_v8  ;;  %v3970_v21 = vor.u32 %v4384_v60, %v3969_v38 }
 0x2e8   : > { %v2647_v3 = vadd.f32 %v2646_v13, %v2578_v22  ;;  %2550 = vmatmul.bf16.gmra.mxu1 %v5558_v28 }
 0x2e9   : > { %v2512_v31 = vadd.f32 %v2511_v50, %v2443_v52  ;;  %2481 = vmatmul.bf16.gmra.mxu0 %v5556_v39  ;;  %2780 = vmatpush.bf16.msra.mxu1 %v3970_v21  ;;  %v3370_v50 = vmul.f32 %v5756_v37, %v3264_v12 }
 0x2ea   : > { %v3261_v25 = vmax.f32 %v2647_v3, 0.0  ;;  %2619 = vmatmul.bf16.gmra.mxu2 %v5561_v58  ;;  %2688 = vmatmul.bf16.gmra.mxu3 %v5563_v29 }
 0x2ec   : > { %v3367_v0 = vmul.f32 %v5759_v42, %v3261_v25 }
 0x2ed   : > { %v2580_v55 = vpop.f32.mrf.mxu2  ;;  %v2649_v22 = vpop.f32.mrf.mxu3 }
 0x2ee   : > { %v2581_v9 = vadd.f32 %v2580_v55, %v2512_v31  ;;  %v2444_v4 = vpop.f32.mrf.mxu0  ;;  %v2513_v40 = vpop.f32.mrf.mxu1  ;;  %v5773_v7 = vadd.f32 %v3367_v0, %v3366_v34  ;;  %v3268_v0 = vmax.f32 %v5607_v47, 0.0 }
 0x2ef   : > { %v2445_v6 = vadd.f32 %v2444_v4, %v5739_v8  ;;  %v4442_v4 = vld [vmem:[#allocation3 + $0x2ec] sm:$0xf] }
 0x2f0   : > { %v2650_v13 = vadd.f32 %v2649_v22, %v2581_v9  ;;  %v3374_v21 = vmul.f32 %v5756_v37, %v3268_v0  ;;  %v3272_v0 = vmax.f32 %v5634_v56, 0.0 }
 0x2f1   : > { %v2514_v48 = vadd.f32 %v2513_v40, %v2445_v6  ;;  %v4211_v40 = vld [vmem:[#allocation3 + $0x2f8] sm:$0xf0]  ;;  %v4378_v6 = vld [vmem:[#allocation3 + $0xec] sm:$0xf] }
 0x2f2   : > { %v3265_v35 = vmax.f32 %v2650_v13, 0.0  ;;  %v4214_v13 = vor.u32 %v4442_v4, %v4211_v40  ;;  %v3378_v40 = vmul.f32 %v5756_v37, %v3272_v0 }
 0x2f4   : > { %v3371_v52 = vmul.f32 %v5759_v42, %v3265_v35  ;;  %v4474_v35 = vld [vmem:[#allocation3 + $0x3ec] sm:$0xf]  ;;  %3118 = vmatpush.bf16.msrb.mxu2 %v4214_v13  ;;  %v3276_v13 = vmax.f32 %v5649_v17, 0.0 }
 0x2f5   : > { %v2582_v62 = vpop.f32.mrf.mxu2  ;;  %v2651_v3 = vpop.f32.mrf.mxu3 }
 0x2f6   : > { %v2583_v25 = vadd.f32 %v2582_v62, %v2514_v48  ;;  %v2447_v31 = vpop.f32.mrf.mxu0  ;;  %v2516_v38 = vpop.f32.mrf.mxu1  ;;  %v5779_v60 = vadd.f32 %v3371_v52, %v3370_v50  ;;  %v3955_v48 = vld [vmem:[#allocation3 + $0xf8] sm:$0xf0] }
 0x2f7   : > { %v2448_v34 = vadd.f32 %v2447_v31, %v5739_v8  ;;  %v4339_v50 = vld [vmem:[#allocation3 + $0x3f8] sm:$0xf0] }
 0x2f8   : > { %v2652_v55 = vadd.f32 %v2651_v3, %v2583_v25  ;;  %2555 = vmatmul.bf16.gmra.mxu1 %v5600_v2  ;;  %v3958_v25 = vor.u32 %v4378_v6, %v3955_v48  ;;  %v4342_v31 = vor.u32 %v4474_v35, %v4339_v50  ;;  %v4083_v35 = vld [vmem:[#allocation3 + $0x1f8] sm:$0xf0] }
 0x2f9   : > { %v2517_v24 = vadd.f32 %v2516_v38, %v2448_v34  ;;  %2486 = vmatmul.bf16.gmra.mxu0 %v5598_v16 }
 0x2fa   : > { %v3269_v22 = vmax.f32 %v2652_v55, 0.0  ;;  %2624 = vmatmul.bf16.gmra.mxu2 %v5603_v10  ;;  %2693 = vmatmul.bf16.gmra.mxu3 %v5605_v18 }
 0x2fb   : > { %2980 = vmatpush.bf16.msrb.mxu0 %v3958_v25  ;;  %3187 = vmatpush.bf16.msrb.mxu3 %v4342_v31  ;;  %v3382_v25 = vmul.f32 %v5756_v37, %v3276_v13 }
 0x2fc   : > { %v3375_v9 = vmul.f32 %v5759_v42, %v3269_v22 }
 0x2fd   : > { %v2585_v12 = vpop.f32.mrf.mxu2  ;;  %v2654_v47 = vpop.f32.mrf.mxu3 }
 0x2fe   : > { %v2586_v52 = vadd.f32 %v2585_v12, %v2517_v24  ;;  %v2449_v62 = vpop.f32.mrf.mxu0  ;;  %v2518_v3 = vpop.f32.mrf.mxu1  ;;  %v5789_v38 = vadd.f32 %v3375_v9, %v3374_v21  ;;  %v4410_v9 = vld [vmem:[#allocation3 + $0x1ec] sm:$0xf] }
 0x2ff   : > { %v2450_v34 = vadd.f32 %v2449_v62, %v5739_v8 }
 0x300   : > { %v2655_v55 = vadd.f32 %v2654_v47, %v2586_v52  ;;  %v4086_v47 = vor.u32 %v4410_v9, %v4083_v35 }
 0x301   : > { %v2519_v22 = vadd.f32 %v2518_v3, %v2450_v34 }
 0x302   : > { %v3273_v4 = vmax.f32 %v2655_v55, 0.0  ;;  %3049 = vmatpush.bf16.msrb.mxu1 %v4086_v47 }
 0x304   : > { %v3379_v24 = vmul.f32 %v5759_v42, %v3273_v4 }
 0x305   : > { %v2587_v12 = vpop.f32.mrf.mxu2  ;;  %v2656_v18 = vpop.f32.mrf.mxu3 }
 0x306   : > { %v2588_v6 = vadd.f32 %v2587_v12, %v2519_v22  ;;  %v2452_v48 = vpop.f32.mrf.mxu0  ;;  %v2521_v21 = vpop.f32.mrf.mxu1  ;;  %v5795_v50 = vadd.f32 %v3379_v24, %v3378_v40  ;;  %v3280_v40 = vmax.f32 %v5656_v63, 0.0 }
 0x307   : > { %v2453_v56 = vadd.f32 %v2452_v48, %v5739_v8 }
 0x308   : > { %v2657_v52 = vadd.f32 %v2656_v18, %v2588_v6  ;;  %2560 = vmatmul.bf16.gmra.mxu1 %v5642_v51  ;;  %v3386_v48 = vmul.f32 %v5756_v37, %v3280_v40 }
 0x309   : > { %v2522_v62 = vadd.f32 %v2521_v21, %v2453_v56  ;;  %2491 = vmatmul.bf16.gmra.mxu0 %v5640_v14 }
 0x30a   : > { %v3277_v3 = vmax.f32 %v2657_v52, 0.0  ;;  %2629 = vmatmul.bf16.gmra.mxu2 %v5645_v45  ;;  %2698 = vmatmul.bf16.gmra.mxu3 %v5647_v36 }
 0x30c   : > { %v3383_v31 = vmul.f32 %v5759_v42, %v3277_v3  ;;  %v4195_v3 = vld [vmem:[#allocation3 + $0x2d8] sm:$0xf0] }
 0x30d   : > { %v2590_v34 = vpop.f32.mrf.mxu2  ;;  %v2659_v0 = vpop.f32.mrf.mxu3 }
 0x30e   : > { %v2591_v55 = vadd.f32 %v2590_v34, %v2522_v62  ;;  %v2454_v17 = vpop.f32.mrf.mxu0  ;;  %v2523_v18 = vpop.f32.mrf.mxu1  ;;  %v5805_v22 = vadd.f32 %v3383_v31, %v3382_v25  ;;  %v4438_v62 = vld [vmem:[#allocation3 + $0x2cc] sm:$0xf]  ;;  %v3939_v34 = vld [vmem:[#allocation3 + $0xd8] sm:$0xf0] }
 0x30f   : > { %v2455_v4 = vadd.f32 %v2454_v17, %v5739_v8  ;;  %v4374_v25 = vld [vmem:[#allocation3 + $0xcc] sm:$0xf]  ;;  %v4198_v63 = vor.u32 %v4438_v62, %v4195_v3  ;;  %v3284_v17 = vmax.f32 %v5659_v53, 0.0 }
 0x310   : > { %v2660_v24 = vadd.f32 %v2659_v0, %v2591_v55  ;;  %v4470_v0 = vld [vmem:[#allocation3 + $0x3cc] sm:$0xf]  ;;  %v4323_v55 = vld [vmem:[#allocation3 + $0x3d8] sm:$0xf0] }
 0x311   : > { %v2524_v12 = vadd.f32 %v2523_v18, %v2455_v4  ;;  %v3942_v4 = vor.u32 %v4374_v25, %v3939_v34  ;;  %v4326_v40 = vor.u32 %v4470_v0, %v4323_v55  ;;  %3119 = vmatpush.bf16.msrb.mxu2 %v4198_v63  ;;  %v4406_v53 = vld [vmem:[#allocation3 + $0x1cc] sm:$0xf] }
 0x312   : > { %v3281_v6 = vmax.f32 %v2660_v24, 0.0 }
 0x313   : > { %2981 = vmatpush.bf16.msrb.mxu0 %v3942_v4  ;;  %3188 = vmatpush.bf16.msrb.mxu3 %v4326_v40 }
 0x314   : > { %v3387_v21 = vmul.f32 %v5759_v42, %v3281_v6  ;;  %v3390_v6 = vmul.f32 %v5756_v37, %v3284_v17 }
 0x315   : > { %v2592_v9 = vpop.f32.mrf.mxu2  ;;  %v2661_v35 = vpop.f32.mrf.mxu3 }
 0x316   : > { %v5811_v56 = vadd.f32 %v3387_v21, %v3386_v48  ;;  %v2593_v47 = vadd.f32 %v2592_v9, %v2524_v12  ;;  %v2457_v13 = vpop.f32.mrf.mxu0  ;;  %v2526_v52 = vpop.f32.mrf.mxu1  ;;  %v4067_v21 = vld [vmem:[#allocation3 + $0x1d8] sm:$0xf0] }
 0x317   : > { %v2458_v31 = vadd.f32 %v2457_v13, %v5739_v8 }
 0x318   : > { %v2662_v18 = vadd.f32 %v2661_v35, %v2593_v47  ;;  %2781 = vmatmul.bf16.vlgmr.msra.gmra.mxu1 %v5098_v61  ;;  %v4070_v47 = vor.u32 %v4406_v53, %v4067_v21  ;;  %v3292_v53 = vmax.f32 %v5669_v26, 0.0 }
 0x319   : > { %v2527_v24 = vadd.f32 %v2526_v52, %v2458_v31  ;;  %2712 = vmatmul.bf16.vlgmr.msra.gmra.mxu0 %v5096_v30  ;;  %v3288_v31 = vmax.f32 %v5666_v20, 0.0 }
 0x31a   : > { %v3285_v12 = vmax.f32 %v2662_v18, 0.0  ;;  %2850 = vmatmul.bf16.vlgmr.msra.gmra.mxu2 %v5100_v59  ;;  %2919 = vmatmul.bf16.vlgmr.msra.gmra.mxu3 %v5102_v15 }
 0x31b   : > { %3050 = vmatpush.bf16.msrb.mxu1 %v4070_v47  ;;  %v3394_v55 = vmul.f32 %v5756_v37, %v3288_v31 }
 0x31c   : > { %v3391_v48 = vmul.f32 %v5759_v42, %v3285_v12 }
 0x31d   : > { %v2595_v9 = vpop.f32.mrf.mxu2  ;;  %v2664_v35 = vpop.f32.mrf.mxu3 }
 0x31e   : > { %v2596_v13 = vadd.f32 %v2595_v9, %v2527_v24  ;;  %v2459_v52 = vpop.f32.mrf.mxu0  ;;  %v2528_v62 = vpop.f32.mrf.mxu1  ;;  %v5821_v3 = vadd.f32 %v3391_v48, %v3390_v6 }
 0x31f   : > { %v2460_v25 = vadd.f32 %v2459_v52, %v5739_v8  ;;  %v4179_v52 = vld [vmem:[#allocation3 + $0x2b8] sm:$0xf0] }
 0x320   : > { %v2665_v63 = vadd.f32 %v2664_v35, %v2596_v13  ;;  %v3398_v35 = vmul.f32 %v5756_v37, %v3292_v53  ;;  %v4434_v13 = vld [vmem:[#allocation3 + $0x2ac] sm:$0xf] }
 0x321   : > { %v2529_v34 = vadd.f32 %v2528_v62, %v2460_v25  ;;  %v4370_v62 = vld [vmem:[#allocation3 + $0xac] sm:$0xf]  ;;  %v4182_v31 = vor.u32 %v4434_v13, %v4179_v52 }
 0x322   : > { %v3289_v0 = vmax.f32 %v2665_v63, 0.0  ;;  %v3923_v63 = vld [vmem:[#allocation3 + $0xb8] sm:$0xf0] }
 0x323   : > { %3120 = vmatpush.bf16.msrb.mxu2 %v4182_v31  ;;  %v4051_v31 = vld [vmem:[#allocation3 + $0x1b8] sm:$0xf0] }
 0x324   : > { %v3395_v17 = vmul.f32 %v5759_v42, %v3289_v0  ;;  %v4307_v0 = vld [vmem:[#allocation3 + $0x3b8] sm:$0xf0] }
 0x325   : > { %v2597_v18 = vpop.f32.mrf.mxu2  ;;  %v2666_v4 = vpop.f32.mrf.mxu3 }
 0x326   : > { %v5827_v40 = vadd.f32 %v3395_v17, %v3394_v55  ;;  %v2598_v24 = vadd.f32 %v2597_v18, %v2529_v34  ;;  %v2462_v12 = vpop.f32.mrf.mxu0  ;;  %v2531_v6 = vpop.f32.mrf.mxu1  ;;  %v4466_v34 = vld [vmem:[#allocation3 + $0x3ac] sm:$0xf] }
 0x327   : > { %v2463_v48 = vadd.f32 %v2462_v12, %v5739_v8 }
 0x328   : > { %v2667_v21 = vadd.f32 %v2666_v4, %v2598_v24  ;;  %2786 = vmatmul.bf16.gmra.mxu1 %v5150_v41  ;;  %v3926_v4 = vor.u32 %v4370_v62, %v3923_v63  ;;  %v4310_v24 = vor.u32 %v4466_v34, %v4307_v0  ;;  %v4402_v34 = vld [vmem:[#allocation3 + $0x1ac] sm:$0xf]  ;;  %v3300_v0 = vmax.f32 %v5679_v23, 0.0 }
 0x329   : > { %v2532_v20 = vadd.f32 %v2531_v6, %v2463_v48  ;;  %2717 = vmatmul.bf16.gmra.mxu0 %v5148_v54  ;;  %v3296_v48 = vmax.f32 %v5676_v33, 0.0 }
 0x32a   : > { %v3293_v9 = vmax.f32 %v2667_v21, 0.0  ;;  %2855 = vmatmul.bf16.gmra.mxu2 %v5152_v44  ;;  %2924 = vmatmul.bf16.gmra.mxu3 %v5154_v43 }
 0x32b   : > { %2982 = vmatpush.bf16.msrb.mxu0 %v3926_v4  ;;  %3189 = vmatpush.bf16.msrb.mxu3 %v4310_v24  ;;  %v3402_v13 = vmul.f32 %v5756_v37, %v3296_v48  ;;  %v3406_v4 = vmul.f32 %v5756_v37, %v3300_v0 }
 0x32c   : > { %v3399_v47 = vmul.f32 %v5759_v42, %v3293_v9 }
 0x32d   : > { %v2600_v25 = vpop.f32.mrf.mxu2  ;;  %v2669_v26 = vpop.f32.mrf.mxu3 }
 0x32e   : > { %v2601_v55 = vadd.f32 %v2600_v25, %v2532_v20  ;;  %v2464_v17 = vpop.f32.mrf.mxu0  ;;  %v2533_v18 = vpop.f32.mrf.mxu1  ;;  %v5837_v12 = vadd.f32 %v3399_v47, %v3398_v35 }
 0x32f   : > { %v2465_v6 = vadd.f32 %v2464_v17, %v5739_v8 }
 0x330   : > { %v2670_v53 = vadd.f32 %v2669_v26, %v2601_v55  ;;  %v4054_v26 = vor.u32 %v4402_v34, %v4051_v31 }
 0x331   : > { %v2534_v21 = vadd.f32 %v2533_v18, %v2465_v6 }
 0x332   : > { %v3297_v9 = vmax.f32 %v2670_v53, 0.0  ;;  %3051 = vmatpush.bf16.msrb.mxu1 %v4054_v26 }
 0x334   : > { %v3403_v20 = vmul.f32 %v5759_v42, %v3297_v9 }
 0x335   : > { %v2602_v52 = vpop.f32.mrf.mxu2  ;;  %v2671_v25 = vpop.f32.mrf.mxu3 }
 0x336   : > { %v5843_v62 = vadd.f32 %v3403_v20, %v3402_v13  ;;  %v2603_v35 = vadd.f32 %v2602_v52, %v2534_v21  ;;  %v2467_v47 = vpop.f32.mrf.mxu0  ;;  %v2536_v63 = vpop.f32.mrf.mxu1  ;;  %v3304_v20 = vmax.f32 %v5686_v5, 0.0 }
 0x337   : > { %v2468_v33 = vadd.f32 %v2467_v47, %v5739_v8 }
 0x338   : > { %v2672_v55 = vadd.f32 %v2671_v25, %v2603_v35  ;;  %2791 = vmatmul.bf16.gmra.mxu1 %v5202_v46  ;;  %v3410_v47 = vmul.f32 %v5756_v37, %v3304_v20 }
 0x339   : > { %v2537_v17 = vadd.f32 %v2536_v63, %v2468_v33  ;;  %2722 = vmatmul.bf16.gmra.mxu0 %v5200_v1 }
 0x33a   : > { %v3301_v18 = vmax.f32 %v2672_v55, 0.0  ;;  %2860 = vmatmul.bf16.gmra.mxu2 %v5204_v27  ;;  %2929 = vmatmul.bf16.gmra.mxu3 %v5206_v19 }
 0x33c   : > { %v3407_v24 = vmul.f32 %v5759_v42, %v3301_v18  ;;  %v4163_v18 = vld [vmem:[#allocation3 + $0x298] sm:$0xf0] }
 0x33d   : > { %v2605_v6 = vpop.f32.mrf.mxu2  ;;  %v2674_v48 = vpop.f32.mrf.mxu3 }
 0x33e   : > { %v2606_v53 = vadd.f32 %v2605_v6, %v2537_v17  ;;  %v2469_v23 = vpop.f32.mrf.mxu0  ;;  %v2538_v21 = vpop.f32.mrf.mxu1  ;;  %v5853_v9 = vadd.f32 %v3407_v24, %v3406_v4  ;;  %v4430_v17 = vld [vmem:[#allocation3 + $0x28c] sm:$0xf]  ;;  %v3907_v6 = vld [vmem:[#allocation3 + $0x98] sm:$0xf0] }
 0x33f   : > { %v2470_v13 = vadd.f32 %v2469_v23, %v5739_v8  ;;  %v4366_v4 = vld [vmem:[#allocation3 + $0x8c] sm:$0xf]  ;;  %v4166_v5 = vor.u32 %v4430_v17, %v4163_v18  ;;  %v3308_v23 = vmax.f32 %v5689_v32, 0.0 }
 0x340   : > { %v2675_v52 = vadd.f32 %v2674_v48, %v2606_v53  ;;  %v4462_v48 = vld [vmem:[#allocation3 + $0x38c] sm:$0xf]  ;;  %v4291_v53 = vld [vmem:[#allocation3 + $0x398] sm:$0xf0] }
 0x341   : > { %v2539_v25 = vadd.f32 %v2538_v21, %v2470_v13  ;;  %v3910_v13 = vor.u32 %v4366_v4, %v3907_v6  ;;  %v4294_v20 = vor.u32 %v4462_v48, %v4291_v53  ;;  %3121 = vmatpush.bf16.msrb.mxu2 %v4166_v5  ;;  %v4398_v32 = vld [vmem:[#allocation3 + $0x18c] sm:$0xf]  ;;  %v6581_v5 = vld [vmem:[#allocation24_spill] sm:$0xff] }
 0x342   : > { %v3305_v35 = vmax.f32 %v2675_v52, 0.0  ;;  %v3312_v53 = vmax.f32 %v6581_v5, 0.0 }
 0x343   : > { %2983 = vmatpush.bf16.msrb.mxu0 %v3910_v13  ;;  %3190 = vmatpush.bf16.msrb.mxu3 %v4294_v20 }
 0x344   : > { %v3411_v63 = vmul.f32 %v5759_v42, %v3305_v35  ;;  %v3418_v20 = vmul.f32 %v5756_v37, %v3312_v53  ;;  %v6587_v53 = vld [vmem:[#allocation78_spill] sm:$0xff] }
 0x345   : > { %v2607_v34 = vpop.f32.mrf.mxu2  ;;  %v2676_v31 = vpop.f32.mrf.mxu3 }
 0x346   : > { %v5859_v33 = vadd.f32 %v3411_v63, %v3410_v47  ;;  %v2608_v26 = vadd.f32 %v2607_v34, %v2539_v25  ;;  %v2472_v0 = vpop.f32.mrf.mxu0  ;;  %v2541_v55 = vpop.f32.mrf.mxu1  ;;  %v6577_v25 = vld [vmem:[#allocation9_spill] sm:$0xff]  ;;  %v6578_v47 = vld [vmem:[#allocation10_spill] sm:$0xff]  ;;  %v6579_v63 = vld [vmem:[#allocation79_spill] sm:$0xff]  ;;  %v3414_v34 = vmul.f32 %v5756_v37, %v3308_v23 }
 0x347   : > { %v2473_v24 = vadd.f32 %v2472_v0, %v5739_v8 }
 0x348   : > { %v2677_v21 = vadd.f32 %v2676_v31, %v2608_v26  ;;  %2796 = vmatmul.bf16.gmra.mxu1 %v6577_v25  ;;  %v4035_v31 = vld [vmem:[#allocation3 + $0x198] sm:$0xf0] }
 0x349   : > { %v2542_v52 = vadd.f32 %v2541_v55, %v2473_v24  ;;  %2727 = vmatmul.bf16.gmra.mxu0 %v6543_v57  ;;  %v4038_v17 = vor.u32 %v4398_v32, %v4035_v31 }
 0x34a   : > { %v3309_v35 = vmax.f32 %v2677_v21, 0.0  ;;  %2865 = vmatmul.bf16.gmra.mxu2 %v6578_v47  ;;  %2934 = vmatmul.bf16.gmra.mxu3 %v6579_v63 }
 0x34b   : > { %3052 = vmatpush.bf16.msrb.mxu1 %v4038_v17 }
 0x34c   : > { %v3415_v0 = vmul.f32 %v5759_v42, %v3309_v35 }
 0x34d   : > { %v2610_v26 = vpop.f32.mrf.mxu2  ;;  %v2679_v55 = vpop.f32.mrf.mxu3 }
 0x34e   : > { %v2611_v18 = vadd.f32 %v2610_v26, %v2542_v52  ;;  %v2474_v4 = vpop.f32.mrf.mxu0  ;;  %v2543_v24 = vpop.f32.mrf.mxu1  ;;  %v5869_v6 = vadd.f32 %v3415_v0, %v3414_v34  ;;  %v6583_v26 = vld [vmem:[#allocation29_spill] sm:$0xff] }
 0x34f   : > { %v2475_v48 = vadd.f32 %v2474_v4, %v5739_v8  ;;  %v3316_v17 = vmax.f32 %v6583_v26, 0.0 }
 0x350   : > { %6580 = vst [vmem:[#allocation42_spill] sm:$0xff] %v5869_v6  ;;  %v2680_v21 = vadd.f32 %v2679_v55, %v2611_v18  ;;  %v6584_v55 = vld [vmem:[#allocation7_spill] sm:$0xff]  ;;  %v6585_v18 = vld [vmem:[#allocation77_spill] sm:$0xff] }
 0x351   : > { %v2544_v23 = vadd.f32 %v2543_v24, %v2475_v48  ;;  %v6586_v48 = vld [vmem:[#allocation8_spill] sm:$0xff] }
 0x352   : > { %v3313_v13 = vmax.f32 %v2680_v21, 0.0  ;;  %v3422_v21 = vmul.f32 %v5756_v37, %v3316_v17 }
 0x354   : > { %v3419_v35 = vmul.f32 %v5759_v42, %v3313_v13  ;;  %v4147_v13 = vld [vmem:[#allocation3 + $0x278] sm:$0xf0] }
 0x355   : > { %v2612_v63 = vpop.f32.mrf.mxu2  ;;  %v2681_v47 = vpop.f32.mrf.mxu3 }
 0x356   : > { %v5875_v32 = vadd.f32 %v3419_v35, %v3418_v20  ;;  %v2613_v52 = vadd.f32 %v2612_v63, %v2544_v23  ;;  %v2477_v31 = vpop.f32.mrf.mxu0  ;;  %v2546_v34 = vpop.f32.mrf.mxu1  ;;  %v4426_v23 = vld [vmem:[#allocation3 + $0x26c] sm:$0xf] }
 0x357   : > { %v2478_v0 = vadd.f32 %v2477_v31, %v5739_v8  ;;  %v4362_v20 = vld [vmem:[#allocation3 + $0x6c] sm:$0xf] }
 0x358   : > { %6582 = vst [vmem:[#allocation43_spill] sm:$0xff] %v5875_v32  ;;  %v2682_v4 = vadd.f32 %v2681_v47, %v2613_v52  ;;  %2801 = vmatmul.bf16.gmra.mxu1 %v6585_v18  ;;  %v4150_v47 = vor.u32 %v4426_v23, %v4147_v13  ;;  %v3891_v52 = vld [vmem:[#allocation3 + $0x78] sm:$0xf0] }
 0x359   : > { %v2547_v5 = vadd.f32 %v2546_v34, %v2478_v0  ;;  %2732 = vmatmul.bf16.gmra.mxu0 %v6584_v55  ;;  %v4458_v34 = vld [vmem:[#allocation3 + $0x36c] sm:$0xf]  ;;  %v4275_v0 = vld [vmem:[#allocation3 + $0x378] sm:$0xf0]  ;;  %v3894_v55 = vor.u32 %v4362_v20, %v3891_v52 }
 0x35a   : > { %v3317_v24 = vmax.f32 %v2682_v4, 0.0  ;;  %2870 = vmatmul.bf16.gmra.mxu2 %v6586_v48  ;;  %2939 = vmatmul.bf16.gmra.mxu3 %v6587_v53  ;;  %v4278_v48 = vor.u32 %v4458_v34, %v4275_v0 }
 0x35b   : > { %3122 = vmatpush.bf16.msrb.mxu2 %v4150_v47  ;;  %2984 = vmatpush.bf16.msrb.mxu0 %v3894_v55  ;;  %v4019_v47 = vld [vmem:[#allocation3 + $0x178] sm:$0xf0] }
 0x35c   : > { %v3423_v63 = vmul.f32 %v5759_v42, %v3317_v24  ;;  %v6588_v24 = vld [vmem:[#allocation30_spill] sm:$0xff]  ;;  %3191 = vmatpush.bf16.msrb.mxu3 %v4278_v48  ;;  %v6590_v55 = vld [vmem:[#allocation33_spill] sm:$0xff] }
 0x35d   : > { %v2615_v35 = vpop.f32.mrf.mxu2  ;;  %v2684_v31 = vpop.f32.mrf.mxu3  ;;  %v3320_v53 = vmax.f32 %v6588_v24, 0.0  ;;  %v3324_v48 = vmax.f32 %v6590_v55, 0.0  ;;  %v6594_v24 = vld [vmem:[#allocation17_spill] sm:$0xff] }
 0x35e   : > { %v2616_v26 = vadd.f32 %v2615_v35, %v2547_v5  ;;  %v2479_v18 = vpop.f32.mrf.mxu0  ;;  %v2548_v4 = vpop.f32.mrf.mxu1  ;;  %v5885_v32 = vadd.f32 %v3423_v63, %v3422_v21 }
 0x35f   : > { %v2480_v17 = vadd.f32 %v2479_v18, %v5739_v8  ;;  %v3426_v13 = vmul.f32 %v5756_v37, %v3320_v53  ;;  %v4394_v18 = vld [vmem:[#allocation3 + $0x16c] sm:$0xf]  ;;  %v6592_v53 = vld [vmem:[#allocation12_spill] sm:$0xff] }
 0x360   : > { %v2685_v6 = vadd.f32 %v2684_v31, %v2616_v26  ;;  %v4022_v31 = vor.u32 %v4394_v18, %v4019_v47  ;;  %v6591_v26 = vld [vmem:[#allocation11_spill] sm:$0xff]  ;;  %v6596_v18 = vld [vmem:[#allocation34_spill] sm:$0xff] }
 0x361   : > { %v2549_v25 = vadd.f32 %v2548_v4, %v2480_v17  ;;  %v6593_v17 = vld [vmem:[#allocation80_spill] sm:$0xff]  ;;  %v3328_v47 = vmax.f32 %v6596_v18, 0.0 }
 0x362   : > { %v3321_v23 = vmax.f32 %v2685_v6, 0.0  ;;  %3053 = vmatpush.bf16.msrb.mxu1 %v4022_v31 }
 0x363   : > { %v3434_v31 = vmul.f32 %v5756_v37, %v3328_v47 }
 0x364   : > { %v3427_v5 = vmul.f32 %v5759_v42, %v3321_v23 }
 0x365   : > { %v2617_v35 = vpop.f32.mrf.mxu2  ;;  %v2686_v57 = vpop.f32.mrf.mxu3 }
 0x366   : > { %v5891_v20 = vadd.f32 %v3427_v5, %v3426_v13  ;;  %v2618_v21 = vadd.f32 %v2617_v35, %v2549_v25  ;;  %v2482_v63 = vpop.f32.mrf.mxu0  ;;  %v2551_v52 = vpop.f32.mrf.mxu1  ;;  %v3430_v25 = vmul.f32 %v5756_v37, %v3324_v48 }
 0x367   : > { %v2483_v34 = vadd.f32 %v2482_v63, %v5739_v8 }
 0x368   : > { %6589 = vst [vmem:[#allocation44_spill] sm:$0xff] %v5891_v20  ;;  %v2687_v0 = vadd.f32 %v2686_v57, %v2618_v21  ;;  %2806 = vmatmul.bf16.gmra.mxu1 %v6592_v53 }
 0x369   : > { %v2552_v6 = vadd.f32 %v2551_v52, %v2483_v34  ;;  %2737 = vmatmul.bf16.gmra.mxu0 %v6591_v26 }
 0x36a   : > { %v3325_v4 = vmax.f32 %v2687_v0, 0.0  ;;  %2875 = vmatmul.bf16.gmra.mxu2 %v6593_v17  ;;  %2944 = vmatmul.bf16.gmra.mxu3 %v6594_v24 }
 0x36c   : > { %v3431_v23 = vmul.f32 %v5759_v42, %v3325_v4 }
 0x36d   : > { %v2620_v13 = vpop.f32.mrf.mxu2  ;;  %v2689_v5 = vpop.f32.mrf.mxu3 }
 0x36e   : > { %v2621_v35 = vadd.f32 %v2620_v13, %v2552_v6  ;;  %v2484_v63 = vpop.f32.mrf.mxu0  ;;  %v2553_v57 = vpop.f32.mrf.mxu1  ;;  %v5901_v21 = vadd.f32 %v3431_v23, %v3430_v25  ;;  %v4422_v25 = vld [vmem:[#allocation3 + $0x24c] sm:$0xf]  ;;  %v4131_v23 = vld [vmem:[#allocation3 + $0x258] sm:$0xf0] }
 0x36f   : > { %v2485_v52 = vadd.f32 %v2484_v63, %v5739_v8  ;;  %v4134_v18 = vor.u32 %v4422_v25, %v4131_v23 }
 0x370   : > { %6595 = vst [vmem:[#allocation37_spill] sm:$0xff] %v5901_v21  ;;  %v2690_v34 = vadd.f32 %v2689_v5, %v2621_v35  ;;  %v4358_v21 = vld [vmem:[#allocation3 + $0x4c] sm:$0xf]  ;;  %v3875_v5 = vld [vmem:[#allocation3 + $0x58] sm:$0xf0] }
 0x371   : > { %v2554_v55 = vadd.f32 %v2553_v57, %v2485_v52  ;;  %v4454_v35 = vld [vmem:[#allocation3 + $0x34c] sm:$0xf]  ;;  %v4259_v57 = vld [vmem:[#allocation3 + $0x358] sm:$0xf0]  ;;  %3123 = vmatpush.bf16.msrb.mxu2 %v4134_v18  ;;  %v6604_v18 = vld [vmem:[#allocation32_spill] sm:$0xff] }
 0x372   : > { %v3329_v0 = vmax.f32 %v2690_v34, 0.0  ;;  %v6598_v52 = vld [vmem:[#allocation31_spill] sm:$0xff]  ;;  %v4262_v26 = vor.u32 %v4454_v35, %v4259_v57 }
 0x373   : > { %v3332_v47 = vmax.f32 %v6598_v52, 0.0 }
 0x374   : > { %v3435_v48 = vmul.f32 %v5759_v42, %v3329_v0  ;;  %v3878_v0 = vor.u32 %v4358_v21, %v3875_v5  ;;  %3192 = vmatpush.bf16.msrb.mxu3 %v4262_v26  ;;  %v4003_v21 = vld [vmem:[#allocation3 + $0x158] sm:$0xf0] }
 0x375   : > { %v2622_v24 = vpop.f32.mrf.mxu2  ;;  %v2691_v4 = vpop.f32.mrf.mxu3 }
 0x376   : > { %v5907_v17 = vadd.f32 %v3435_v48, %v3434_v31  ;;  %v2623_v6 = vadd.f32 %v2622_v24, %v2554_v55  ;;  %v2487_v13 = vpop.f32.mrf.mxu0  ;;  %v2556_v53 = vpop.f32.mrf.mxu1  ;;  %v6599_v31 = vld [vmem:[#allocation18_spill] sm:$0xff]  ;;  %v6600_v24 = vld [vmem:[#allocation19_spill] sm:$0xff]  ;;  %v6601_v48 = vld [vmem:[#allocation20_spill] sm:$0xff]  ;;  %2985 = vmatpush.bf16.msrb.mxu0 %v3878_v0 }
 0x377   : > { %v2488_v63 = vadd.f32 %v2487_v13, %v5739_v8  ;;  %v3438_v13 = vmul.f32 %v5756_v37, %v3332_v47 }
 0x378   : > { %6597 = vst [vmem:[#allocation38_spill] sm:$0xff] %v5907_v17  ;;  %v2692_v34 = vadd.f32 %v2691_v4, %v2623_v6  ;;  %2811 = vmatmul.bf16.gmra.mxu1 %v6600_v24  ;;  %v6602_v17 = vld [vmem:[#allocation13_spill] sm:$0xff]  ;;  %v4390_v4 = vld [vmem:[#allocation3 + $0x14c] sm:$0xf] }
 0x379   : > { %v2557_v20 = vadd.f32 %v2556_v53, %v2488_v63  ;;  %2742 = vmatmul.bf16.gmra.mxu0 %v6599_v31  ;;  %v4006_v23 = vor.u32 %v4390_v4, %v4003_v21 }
 0x37a   : > { %v3333_v55 = vmax.f32 %v2692_v34, 0.0  ;;  %2880 = vmatmul.bf16.gmra.mxu2 %v6601_v48  ;;  %2949 = vmatmul.bf16.gmra.mxu3 %v6602_v17  ;;  %v3336_v34 = vmax.f32 %v6604_v18, 0.0 }
 0x37b   : > { %3054 = vmatpush.bf16.msrb.mxu1 %v4006_v23 }
 0x37c   : > { %v3439_v25 = vmul.f32 %v5759_v42, %v3333_v55  ;;  %v3442_v26 = vmul.f32 %v5756_v37, %v3336_v34 }
 0x37d   : > { %v2625_v6 = vpop.f32.mrf.mxu2  ;;  %v2694_v53 = vpop.f32.mrf.mxu3 }
 0x37e   : > { %v2626_v63 = vadd.f32 %v2625_v6, %v2557_v20  ;;  %v2489_v5 = vpop.f32.mrf.mxu0  ;;  %v2558_v35 = vpop.f32.mrf.mxu1  ;;  %v5917_v57 = vadd.f32 %v3439_v25, %v3438_v13  ;;  %v6606_v6 = vld [vmem:[#allocation35_spill] sm:$0xff] }
 0x37f   : > { %v2490_v52 = vadd.f32 %v2489_v5, %v5739_v8  ;;  %v3340_v23 = vmax.f32 %v6606_v6, 0.0 }
 0x380   : > { %6603 = vst [vmem:[#allocation39_spill] sm:$0xff] %v5917_v57  ;;  %v2695_v0 = vadd.f32 %v2694_v53, %v2626_v63  ;;  %v6607_v53 = vld [vmem:[#allocation14_spill] sm:$0xff]  ;;  %v6608_v63 = vld [vmem:[#allocation15_spill] sm:$0xff] }
 0x381   : > { %v2559_v47 = vadd.f32 %v2558_v35, %v2490_v52  ;;  %v6609_v52 = vld [vmem:[#allocation16_spill] sm:$0xff]  ;;  %v3446_v34 = vmul.f32 %v5756_v37, %v3340_v23 }
 0x382   : > { %v3337_v17 = vmax.f32 %v2695_v0, 0.0  ;;  %v4418_v0 = vld [vmem:[#allocation3 + $0x22c] sm:$0xf] }
 0x384   : > { %v3443_v55 = vmul.f32 %v5759_v42, %v3337_v17  ;;  %v6610_v17 = vld [vmem:[#allocation25_spill] sm:$0xff] }
 0x385   : > { %v2627_v48 = vpop.f32.mrf.mxu2  ;;  %v2696_v24 = vpop.f32.mrf.mxu3 }
 0x386   : > { %v5923_v4 = vadd.f32 %v3443_v55, %v3442_v26  ;;  %v2628_v20 = vadd.f32 %v2627_v48, %v2559_v47  ;;  %v2492_v21 = vpop.f32.mrf.mxu0  ;;  %v2561_v13 = vpop.f32.mrf.mxu1  ;;  %v4115_v47 = vld [vmem:[#allocation3 + $0x238] sm:$0xf0]  ;;  %v4354_v26 = vld [vmem:[#allocation3 + $0x2c] sm:$0xf] }
 0x387   : > { %v2493_v25 = vadd.f32 %v2492_v21, %v5739_v8 }
 0x388   : > { %6605 = vst [vmem:[#allocation40_spill] sm:$0xff] %v5923_v4  ;;  %v2697_v5 = vadd.f32 %v2696_v24, %v2628_v20  ;;  %2816 = vmatmul.bf16.gmra.mxu1 %v6608_v63  ;;  %v4118_v24 = vor.u32 %v4418_v0, %v4115_v47  ;;  %v3859_v20 = vld [vmem:[#allocation3 + $0x38] sm:$0xf0] }
 0x389   : > { %v2562_v18 = vadd.f32 %v2561_v13, %v2493_v25  ;;  %2747 = vmatmul.bf16.gmra.mxu0 %v6607_v53  ;;  %v4450_v13 = vld [vmem:[#allocation3 + $0x32c] sm:$0xf]  ;;  %v4243_v25 = vld [vmem:[#allocation3 + $0x338] sm:$0xf0]  ;;  %v3862_v53 = vor.u32 %v4354_v26, %v3859_v20  ;;  %v6611_v20 = vld [vmem:[#allocation36_spill] sm:$0xff] }
 0x38a   : > { %v3341_v35 = vmax.f32 %v2697_v5, 0.0  ;;  %2885 = vmatmul.bf16.gmra.mxu2 %v6609_v52  ;;  %2954 = vmatmul.bf16.gmra.mxu3 %v6610_v17  ;;  %v4246_v52 = vor.u32 %v4450_v13, %v4243_v25  ;;  %v3348_v13 = vmax.f32 %v6611_v20, 0.0 }
 0x38b   : > { %3124 = vmatpush.bf16.msrb.mxu2 %v4118_v24  ;;  %2986 = vmatpush.bf16.msrb.mxu0 %v3862_v53 }
 0x38c   : > { %v3447_v48 = vmul.f32 %v5759_v42, %v3341_v35  ;;  %v3344_v35 = vmax.f32 %v5736_v49, 0.0  ;;  %3193 = vmatpush.bf16.msrb.mxu3 %v4246_v52 }
 0x38d   : > { %v2630_v55 = vpop.f32.mrf.mxu2  ;;  %v2699_v21 = vpop.f32.mrf.mxu3 }
 0x38e   : > { %v2631_v6 = vadd.f32 %v2630_v55, %v2562_v18  ;;  %v2494_v63 = vpop.f32.mrf.mxu0  ;;  %v2563_v5 = vpop.f32.mrf.mxu1  ;;  %v5933_v4 = vadd.f32 %v3447_v48, %v3446_v34  ;;  %v5940_v18 = vld [vmem:[%s6310_s6] sm:$0xf]  ;;  %v3450_v34 = vmul.f32 %v5756_v37, %v3344_v35  ;;  %v3987_v48 = vld [vmem:[#allocation3 + $0x138] sm:$0xf0] }
 0x38f   : > { %v2495_v23 = vadd.f32 %v2494_v63, %v5739_v8  ;;  %v5943_v47 = vperm.slane %v5940_v18, 2  ;;  %v4386_v63 = vld [vmem:[#allocation3 + $0x12c] sm:$0xf] }
 0x390   : > { %v2700_v17 = vadd.f32 %v2699_v21, %v2631_v6  ;;  %v3990_v53 = vor.u32 %v4386_v63, %v3987_v48  ;;  %v6615_v63 = vld [vmem:[#allocation22_spill] sm:$0xff] }
 0x391   : > { %v2564_v57 = vadd.f32 %v2563_v5, %v2495_v23  ;;  %v6612_v5 = vld [vmem:[#allocation27_spill] sm:$0xff]  ;;  %v6613_v23 = vld [vmem:[#allocation28_spill] sm:$0xff] }
 0x392   : > { %v3345_v0 = vmax.f32 %v2700_v17, 0.0  ;;  %3055 = vmatpush.bf16.msrb.mxu1 %v3990_v53 }
 0x394   : > { %v3451_v8 = vmul.f32 %v5759_v42, %v3345_v0  ;;  %v6614_v0 = vld [vmem:[#allocation21_spill] sm:$0xff] }
 0x395   : > { %v2632_v49 = vpop.f32.mrf.mxu2  ;;  %v2701_v26 = vpop.f32.mrf.mxu3 }
 0x396   : > { %v5947_v52 = vadd.f32 %v3451_v8, %v3450_v34  ;;  %v2633_v17 = vadd.f32 %v2632_v49, %v2564_v57  ;;  %v2713_v55 = vpop.f32.mrf.mxu0  ;;  %v2782_v21 = vpop.f32.mrf.mxu1  ;;  %v3454_v57 = vmul.f32 %v5756_v37, %v3348_v13  ;;  %v4414_v37 = vld [vmem:[#allocation3 + $0x20c] sm:$0xf]  ;;  %v4099_v13 = vld [vmem:[#allocation3 + $0x218] sm:$0xf0] }
 0x397   : > { %v2714_v24 = vadd.f32 %v2713_v55, %v5943_v47 }
 0x398   : > { %v2702_v25 = vadd.f32 %v2701_v26, %v2633_v17  ;;  %2821 = vmatmul.bf16.gmra.mxu1 %v6613_v23 }
 0x399   : > { %v2783_v6 = vadd.f32 %v2782_v21, %v2714_v24  ;;  %2752 = vmatmul.bf16.gmra.mxu0 %v6612_v5  ;;  %v6617_v24 = vld [vmem:[#allocation41_spill] sm:$0xff]  ;;  %v4446_v5 = vld [vmem:[#allocation3 + $0x30c] sm:$0xf] }
 0x39a   : > { %v3349_v35 = vmax.f32 %v2702_v25, 0.0  ;;  %2890 = vmatmul.bf16.gmra.mxu2 %v6614_v0  ;;  %2959 = vmatmul.bf16.gmra.mxu3 %v6615_v63  ;;  %v5961_v20 = vperm.slane %v6617_v24, 2 }
 0x39c   : > { %v3455_v34 = vmul.f32 %v5759_v42, %v3349_v35  ;;  %v4350_v42 = vld [vmem:[#allocation3 + $0xc] sm:$0xf] }
 0x39d   : > { %v2851_v8 = vpop.f32.mrf.mxu2  ;;  %v2920_v48 = vpop.f32.mrf.mxu3 }
 0x39e   : > { %v2852_v49 = vadd.f32 %v2851_v8, %v2783_v6  ;;  %v2715_v53 = vpop.f32.mrf.mxu0  ;;  %v2784_v55 = vpop.f32.mrf.mxu1  ;;  %v5957_v26 = vadd.f32 %v3455_v34, %v3454_v57  ;;  %v4102_v6 = vor.u32 %v4414_v37, %v4099_v13  ;;  %v3843_v8 = vld [vmem:[#allocation3 + $0x18] sm:$0xf0] }
 0x39f   : > { %v2716_v17 = vadd.f32 %v2715_v53, %v5943_v47  ;;  %v4227_v57 = vld [vmem:[#allocation3 + $0x318] sm:$0xf0] }
 0x3a0   : > { %6616 = vst [vmem:[#allocation49_spill] sm:$0xff] %v5957_v26  ;;  %v2921_v21 = vadd.f32 %v2920_v48, %v2852_v49  ;;  %v3846_v48 = vor.u32 %v4350_v42, %v3843_v8  ;;  %v4230_v49 = vor.u32 %v4446_v5, %v4227_v57  ;;  %3125 = vmatpush.bf16.msrb.mxu2 %v4102_v6 }
 0x3a1   : > { %v2785_v25 = vadd.f32 %v2784_v55, %v2716_v17 }
 0x3a2   : > { %v3258_v0 = vmax.f32 %v2921_v21, 0.0  ;;  %2987 = vmatpush.bf16.msrb.mxu0 %v3846_v48  ;;  %3194 = vmatpush.bf16.msrb.mxu3 %v4230_v49 }
 0x3a4   : > { %v3364_v63 = vmul.f32 %v5961_v20, %v3258_v0 }
 0x3a5   : > { %v2853_v35 = vpop.f32.mrf.mxu2  ;;  %v2922_v23 = vpop.f32.mrf.mxu3 }
 0x3a6   : > { %v2854_v34 = vadd.f32 %v2853_v35, %v2785_v25  ;;  %v2718_v26 = vpop.f32.mrf.mxu0  ;;  %v2787_v53 = vpop.f32.mrf.mxu1  ;;  %v5965_v24 = vadd.f32 %v5763_v11, %v3364_v63  ;;  %v4382_v11 = vld [vmem:[#allocation3 + $0x10c] sm:$0xf]  ;;  %v3971_v63 = vld [vmem:[#allocation3 + $0x118] sm:$0xf0] }
 0x3a7   : > { %v2719_v55 = vadd.f32 %v2718_v26, %v5943_v47  ;;  %v3974_v37 = vor.u32 %v4382_v11, %v3971_v63 }
 0x3a8   : > { %v2923_v0 = vadd.f32 %v2922_v23, %v2854_v34  ;;  %2826 = vmatmul.bf16.gmra.mxu1 %v5558_v28 }
 0x3a9   : > { %v2788_v17 = vadd.f32 %v2787_v53, %v2719_v55  ;;  %2757 = vmatmul.bf16.gmra.mxu0 %v5556_v39  ;;  %3056 = vmatpush.bf16.msrb.mxu1 %v3974_v37 }
 0x3aa   : > { %v3262_v21 = vmax.f32 %v2923_v0, 0.0  ;;  %2895 = vmatmul.bf16.gmra.mxu2 %v5561_v58  ;;  %2964 = vmatmul.bf16.gmra.mxu3 %v5563_v29 }
 0x3ac   : > { %v3368_v5 = vmul.f32 %v5961_v20, %v3262_v21 }
 0x3ad   : > { %v2856_v25 = vpop.f32.mrf.mxu2  ;;  %v2925_v26 = vpop.f32.mrf.mxu3 }
 0x3ae   : > { %v2857_v23 = vadd.f32 %v2856_v25, %v2788_v17  ;;  %v2720_v13 = vpop.f32.mrf.mxu0  ;;  %v2789_v42 = vpop.f32.mrf.mxu1  ;;  %v5974_v35 = vadd.f32 %v5773_v7, %v3368_v5  ;;  %v6618_v25 = vld [vmem:[#allocation23_spill] sm:$0xff] }
 0x3af   : > { %v2721_v6 = vadd.f32 %v2720_v13, %v5943_v47 }
 0x3b0   : > { %v2926_v8 = vadd.f32 %v2925_v26, %v2857_v23 }
 0x3b1   : > { %v2790_v57 = vadd.f32 %v2789_v42, %v2721_v6 }
 0x3b2   : > { %v3266_v34 = vmax.f32 %v2926_v8, 0.0 }
 0x3b4   : > { %v3372_v53 = vmul.f32 %v5961_v20, %v3266_v34 }
 0x3b5   : > { %v2858_v48 = vpop.f32.mrf.mxu2  ;;  %v2927_v49 = vpop.f32.mrf.mxu3 }
 0x3b6   : > { %v2859_v55 = vadd.f32 %v2858_v48, %v2790_v57  ;;  %v2723_v0 = vpop.f32.mrf.mxu0  ;;  %v2792_v21 = vpop.f32.mrf.mxu1  ;;  %v5979_v17 = vadd.f32 %v5779_v60, %v3372_v53 }
 0x3b7   : > { %v2724_v11 = vadd.f32 %v2723_v0, %v5943_v47 }
 0x3b8   : > { %v2928_v7 = vadd.f32 %v2927_v49, %v2859_v55  ;;  %2831 = vmatmul.bf16.gmra.mxu1 %v5600_v2 }
 0x3b9   : > { %v2793_v5 = vadd.f32 %v2792_v21, %v2724_v11  ;;  %2762 = vmatmul.bf16.gmra.mxu0 %v5598_v16 }
 0x3ba   : > { %v3270_v63 = vmax.f32 %v2928_v7, 0.0  ;;  %2900 = vmatmul.bf16.gmra.mxu2 %v5603_v10  ;;  %2969 = vmatmul.bf16.gmra.mxu3 %v6618_v25 }
 0x3bc   : > { %v3376_v26 = vmul.f32 %v5961_v20, %v3270_v63 }
 0x3bd   : > { %v2861_v37 = vpop.f32.mrf.mxu2  ;;  %v2930_v23 = vpop.f32.mrf.mxu3 }
 0x3be   : > { %v2862_v13 = vadd.f32 %v2861_v37, %v2793_v5  ;;  %v2725_v60 = vpop.f32.mrf.mxu0  ;;  %v2794_v42 = vpop.f32.mrf.mxu1  ;;  %v5988_v6 = vadd.f32 %v5789_v38, %v3376_v26 }
 0x3bf   : > { %v2726_v8 = vadd.f32 %v2725_v60, %v5943_v47 }
 0x3c0   : > { %v2931_v57 = vadd.f32 %v2930_v23, %v2862_v13 }
 0x3c1   : > { %v2795_v34 = vadd.f32 %v2794_v42, %v2726_v8 }
 0x3c2   : > { %v3274_v53 = vmax.f32 %v2931_v57, 0.0 }
 0x3c4   : > { %v3380_v48 = vmul.f32 %v5961_v20, %v3274_v53 }
 0x3c5   : > { %v2863_v49 = vpop.f32.mrf.mxu2  ;;  %v2932_v55 = vpop.f32.mrf.mxu3 }
 0x3c6   : > { %v2864_v0 = vadd.f32 %v2863_v49, %v2795_v34  ;;  %v2728_v21 = vpop.f32.mrf.mxu0  ;;  %v2797_v11 = vpop.f32.mrf.mxu1  ;;  %v5993_v7 = vadd.f32 %v5795_v50, %v3380_v48 }
 0x3c7   : > { %v2729_v5 = vadd.f32 %v2728_v21, %v5943_v47 }
 0x3c8   : > { %v2933_v63 = vadd.f32 %v2932_v55, %v2864_v0  ;;  %2836 = vmatmul.bf16.gmra.mxu1 %v5642_v51 }
 0x3c9   : > { %v2798_v38 = vadd.f32 %v2797_v11, %v2729_v5  ;;  %2767 = vmatmul.bf16.gmra.mxu0 %v5640_v14 }
 0x3ca   : > { %v3278_v26 = vmax.f32 %v2933_v63, 0.0  ;;  %2905 = vmatmul.bf16.gmra.mxu2 %v5645_v45  ;;  %2974 = vmatmul.bf16.gmra.mxu3 %v5647_v36 }
 0x3cc   : > { %v3384_v37 = vmul.f32 %v5961_v20, %v3278_v26 }
 0x3cd   : > { %v2866_v23 = vpop.f32.mrf.mxu2  ;;  %v2935_v13 = vpop.f32.mrf.mxu3 }
 0x3ce   : > { %v2867_v60 = vadd.f32 %v2866_v23, %v2798_v38  ;;  %v2730_v50 = vpop.f32.mrf.mxu0  ;;  %v2799_v42 = vpop.f32.mrf.mxu1  ;;  %v6002_v8 = vadd.f32 %v5805_v22, %v3384_v37 }
 0x3cf   : > { %v2731_v57 = vadd.f32 %v2730_v50, %v5943_v47 }
 0x3d0   : > { %v2936_v34 = vadd.f32 %v2935_v13, %v2867_v60 }
 0x3d1   : > { %v2800_v53 = vadd.f32 %v2799_v42, %v2731_v57 }
 0x3d2   : > { %v3282_v48 = vmax.f32 %v2936_v34, 0.0 }
 0x3d4   : > { %v3388_v49 = vmul.f32 %v5961_v20, %v3282_v48 }
 0x3d5   : > { %v2868_v55 = vpop.f32.mrf.mxu2  ;;  %v2937_v0 = vpop.f32.mrf.mxu3 }
 0x3d6   : > { %v2869_v21 = vadd.f32 %v2868_v55, %v2800_v53  ;;  %v2733_v11 = vpop.f32.mrf.mxu0  ;;  %v2802_v5 = vpop.f32.mrf.mxu1  ;;  %v6007_v63 = vadd.f32 %v5811_v56, %v3388_v49 }
 0x3d7   : > { %v2734_v38 = vadd.f32 %v2733_v11, %v5943_v47 }
 0x3d8   : > { %v2938_v26 = vadd.f32 %v2937_v0, %v2869_v21  ;;  %3057 = vmatmul.bf16.vlgmr.msrb.gmra.mxu1 %v5098_v61 }
 0x3d9   : > { %v2803_v22 = vadd.f32 %v2802_v5, %v2734_v38  ;;  %2988 = vmatmul.bf16.vlgmr.msrb.gmra.mxu0 %v5096_v30 }
 0x3da   : > { %v3286_v37 = vmax.f32 %v2938_v26, 0.0  ;;  %3126 = vmatmul.bf16.vlgmr.msrb.gmra.mxu2 %v5100_v59  ;;  %3195 = vmatmul.bf16.vlgmr.msrb.gmra.mxu3 %v5102_v15 }
 0x3dc   : > { %v3392_v23 = vmul.f32 %v5961_v20, %v3286_v37 }
 0x3dd   : > { %v2871_v13 = vpop.f32.mrf.mxu2  ;;  %v2940_v60 = vpop.f32.mrf.mxu3 }
 0x3de   : > { %v2872_v50 = vadd.f32 %v2871_v13, %v2803_v22  ;;  %v2735_v56 = vpop.f32.mrf.mxu0  ;;  %v2804_v42 = vpop.f32.mrf.mxu1  ;;  %v6016_v57 = vadd.f32 %v5821_v3, %v3392_v23 }
 0x3df   : > { %v2736_v34 = vadd.f32 %v2735_v56, %v5943_v47 }
 0x3e0   : > { %v2941_v30 = vadd.f32 %v2940_v60, %v2872_v50 }
 0x3e1   : > { %v2805_v53 = vadd.f32 %v2804_v42, %v2736_v34 }
 0x3e2   : > { %v3290_v61 = vmax.f32 %v2941_v30, 0.0 }
 0x3e4   : > { %v3396_v48 = vmul.f32 %v5961_v20, %v3290_v61 }
 0x3e5   : > { %v2873_v59 = vpop.f32.mrf.mxu2  ;;  %v2942_v49 = vpop.f32.mrf.mxu3 }
 0x3e6   : > { %v2874_v15 = vadd.f32 %v2873_v59, %v2805_v53  ;;  %v2738_v55 = vpop.f32.mrf.mxu0  ;;  %v2807_v0 = vpop.f32.mrf.mxu1  ;;  %v6021_v21 = vadd.f32 %v5827_v40, %v3396_v48 }
 0x3e7   : > { %v2739_v11 = vadd.f32 %v2738_v55, %v5943_v47 }
 0x3e8   : > { %v2943_v5 = vadd.f32 %v2942_v49, %v2874_v15  ;;  %3062 = vmatmul.bf16.gmra.mxu1 %v5150_v41 }
 0x3e9   : > { %v2808_v3 = vadd.f32 %v2807_v0, %v2739_v11  ;;  %2993 = vmatmul.bf16.gmra.mxu0 %v5148_v54 }
 0x3ea   : > { %v3294_v38 = vmax.f32 %v2943_v5, 0.0  ;;  %3131 = vmatmul.bf16.gmra.mxu2 %v5152_v44  ;;  %3200 = vmatmul.bf16.gmra.mxu3 %v5154_v43 }
 0x3ec   : > { %v3400_v26 = vmul.f32 %v5961_v20, %v3294_v38 }
 0x3ed   : > { %v2876_v22 = vpop.f32.mrf.mxu2  ;;  %v2945_v37 = vpop.f32.mrf.mxu3 }
 0x3ee   : > { %v2877_v23 = vadd.f32 %v2876_v22, %v2808_v3  ;;  %v2740_v40 = vpop.f32.mrf.mxu0  ;;  %v2809_v13 = vpop.f32.mrf.mxu1  ;;  %v6030_v60 = vadd.f32 %v5837_v12, %v3400_v26 }
 0x3ef   : > { %v2741_v50 = vadd.f32 %v2740_v40, %v5943_v47 }
 0x3f0   : > { %v2946_v54 = vadd.f32 %v2945_v37, %v2877_v23 }
 0x3f1   : > { %v2810_v56 = vadd.f32 %v2809_v13, %v2741_v50 }
 0x3f2   : > { %v3298_v41 = vmax.f32 %v2946_v54, 0.0 }
 0x3f4   : > { %v3404_v42 = vmul.f32 %v5961_v20, %v3298_v41  ;;  %v6620_v41 = vld [vmem:[#allocation9_spill] sm:$0xff] }
 0x3f5   : > { %v2878_v44 = vpop.f32.mrf.mxu2  ;;  %v2947_v34 = vpop.f32.mrf.mxu3 }
 0x3f6   : > { %v2879_v43 = vadd.f32 %v2878_v44, %v2810_v56  ;;  %v2743_v30 = vpop.f32.mrf.mxu0  ;;  %v2812_v53 = vpop.f32.mrf.mxu1  ;;  %v6035_v61 = vadd.f32 %v5843_v62, %v3404_v42  ;;  %v6619_v56 = vld [vmem:[#allocation6_spill] sm:$0xff] }
 0x3f7   : > { %v2744_v48 = vadd.f32 %v2743_v30, %v5943_v47  ;;  %v6621_v44 = vld [vmem:[#allocation10_spill] sm:$0xff] }
 0x3f8   : > { %v2948_v59 = vadd.f32 %v2947_v34, %v2879_v43  ;;  %3067 = vmatmul.bf16.gmra.mxu1 %v5202_v46  ;;  %v6622_v34 = vld [vmem:[#allocation79_spill] sm:$0xff] }
 0x3f9   : > { %v2813_v12 = vadd.f32 %v2812_v53, %v2744_v48  ;;  %2998 = vmatmul.bf16.gmra.mxu0 %v5200_v1 }
 0x3fa   : > { %v3302_v49 = vmax.f32 %v2948_v59, 0.0  ;;  %3136 = vmatmul.bf16.gmra.mxu2 %v5204_v27  ;;  %3205 = vmatmul.bf16.gmra.mxu3 %v5206_v19 }
 0x3fc   : > { %v3408_v15 = vmul.f32 %v5961_v20, %v3302_v49 }
 0x3fd   : > { %v2881_v55 = vpop.f32.mrf.mxu2  ;;  %v2950_v0 = vpop.f32.mrf.mxu3 }
 0x3fe   : > { %v2882_v11 = vadd.f32 %v2881_v55, %v2813_v12  ;;  %v2745_v62 = vpop.f32.mrf.mxu0  ;;  %v2814_v5 = vpop.f32.mrf.mxu1  ;;  %v6044_v3 = vadd.f32 %v5853_v9, %v3408_v15  ;;  %v6623_v12 = vld [vmem:[#allocation42_spill] sm:$0xff] }
 0x3ff   : > { %v2746_v38 = vadd.f32 %v2745_v62, %v5943_v47 }
 0x400   : > { %v2951_v1 = vadd.f32 %v2950_v0, %v2882_v11 }
 0x401   : > { %v2815_v26 = vadd.f32 %v2814_v5, %v2746_v38 }
 0x402   : > { %v3306_v46 = vmax.f32 %v2951_v1, 0.0 }
 0x404   : > { %v3412_v22 = vmul.f32 %v5961_v20, %v3306_v46 }
 0x405   : > { %v2883_v27 = vpop.f32.mrf.mxu2  ;;  %v2952_v37 = vpop.f32.mrf.mxu3 }
 0x406   : > { %v2884_v19 = vadd.f32 %v2883_v27, %v2815_v26  ;;  %v2748_v23 = vpop.f32.mrf.mxu0  ;;  %v2817_v40 = vpop.f32.mrf.mxu1  ;;  %v6049_v13 = vadd.f32 %v5859_v33, %v3412_v22  ;;  %v6624_v22 = vld [vmem:[#allocation43_spill] sm:$0xff] }
 0x407   : > { %v2749_v50 = vadd.f32 %v2748_v23, %v5943_v47 }
 0x408   : > { %v2953_v54 = vadd.f32 %v2952_v37, %v2884_v19  ;;  %3072 = vmatmul.bf16.gmra.mxu1 %v6620_v41 }
 0x409   : > { %v2818_v9 = vadd.f32 %v2817_v40, %v2749_v50  ;;  %3003 = vmatmul.bf16.gmra.mxu0 %v6619_v56  ;;  %v6625_v40 = vld [vmem:[#allocation7_spill] sm:$0xff]  ;;  %v6626_v50 = vld [vmem:[#allocation77_spill] sm:$0xff]  ;;  %v6628_v56 = vld [vmem:[#allocation78_spill] sm:$0xff] }
 0x40a   : > { %v3310_v42 = vmax.f32 %v2953_v54, 0.0  ;;  %3141 = vmatmul.bf16.gmra.mxu2 %v6621_v44  ;;  %3210 = vmatmul.bf16.gmra.mxu3 %v6622_v34 }
 0x40c   : > { %v3416_v43 = vmul.f32 %v5961_v20, %v3310_v42 }
 0x40d   : > { %v2886_v30 = vpop.f32.mrf.mxu2  ;;  %v2955_v53 = vpop.f32.mrf.mxu3 }
 0x40e   : > { %v2887_v48 = vadd.f32 %v2886_v30, %v2818_v9  ;;  %v2750_v33 = vpop.f32.mrf.mxu0  ;;  %v2819_v59 = vpop.f32.mrf.mxu1  ;;  %v6058_v49 = vadd.f32 %v6623_v12, %v3416_v43  ;;  %v6627_v9 = vld [vmem:[#allocation8_spill] sm:$0xff] }
 0x40f   : > { %v2751_v15 = vadd.f32 %v2750_v33, %v5943_v47 }
 0x410   : > { %v2956_v55 = vadd.f32 %v2955_v53, %v2887_v48 }
 0x411   : > { %v2820_v0 = vadd.f32 %v2819_v59, %v2751_v15 }
 0x412   : > { %v3314_v11 = vmax.f32 %v2956_v55, 0.0 }
 0x414   : > { %v3420_v62 = vmul.f32 %v5961_v20, %v3314_v11 }
 0x415   : > { %v2888_v5 = vpop.f32.mrf.mxu2  ;;  %v2957_v38 = vpop.f32.mrf.mxu3 }
 0x416   : > { %v2889_v1 = vadd.f32 %v2888_v5, %v2820_v0  ;;  %v2753_v26 = vpop.f32.mrf.mxu0  ;;  %v2822_v46 = vpop.f32.mrf.mxu1  ;;  %v6063_v27 = vadd.f32 %v6624_v22, %v3420_v62  ;;  %v6630_v22 = vld [vmem:[#allocation11_spill] sm:$0xff] }
 0x417   : > { %v2754_v37 = vadd.f32 %v2753_v26, %v5943_v47 }
 0x418   : > { %v2958_v19 = vadd.f32 %v2957_v38, %v2889_v1  ;;  %3077 = vmatmul.bf16.gmra.mxu1 %v6626_v50  ;;  %v6629_v38 = vld [vmem:[#allocation44_spill] sm:$0xff] }
 0x419   : > { %v2823_v23 = vadd.f32 %v2822_v46, %v2754_v37  ;;  %3008 = vmatmul.bf16.gmra.mxu0 %v6625_v40  ;;  %v6631_v37 = vld [vmem:[#allocation12_spill] sm:$0xff]  ;;  %v6633_v40 = vld [vmem:[#allocation17_spill] sm:$0xff] }
 0x41a   : > { %v3318_v54 = vmax.f32 %v2958_v19, 0.0  ;;  %3146 = vmatmul.bf16.gmra.mxu2 %v6627_v9  ;;  %3215 = vmatmul.bf16.gmra.mxu3 %v6628_v56 }
 0x41c   : > { %v3424_v41 = vmul.f32 %v5961_v20, %v3318_v54 }
 0x41d   : > { %v2891_v42 = vpop.f32.mrf.mxu2  ;;  %v2960_v44 = vpop.f32.mrf.mxu3 }
 0x41e   : > { %v2892_v34 = vadd.f32 %v2891_v42, %v2823_v23  ;;  %v2755_v43 = vpop.f32.mrf.mxu0  ;;  %v2824_v30 = vpop.f32.mrf.mxu1  ;;  %v6072_v53 = vadd.f32 %v5885_v32, %v3424_v41  ;;  %v6632_v23 = vld [vmem:[#allocation80_spill] sm:$0xff] }
 0x41f   : > { %v2756_v48 = vadd.f32 %v2755_v43, %v5943_v47 }
 0x420   : > { %v2961_v33 = vadd.f32 %v2960_v44, %v2892_v34  ;;  %v6634_v44 = vld [vmem:[#allocation37_spill] sm:$0xff] }
 0x421   : > { %v2825_v59 = vadd.f32 %v2824_v30, %v2756_v48 }
 0x422   : > { %v3322_v12 = vmax.f32 %v2961_v33, 0.0 }
 0x424   : > { %v3428_v15 = vmul.f32 %v5961_v20, %v3322_v12 }
 0x425   : > { %v2893_v55 = vpop.f32.mrf.mxu2  ;;  %v2962_v0 = vpop.f32.mrf.mxu3 }
 0x426   : > { %v2894_v11 = vadd.f32 %v2893_v55, %v2825_v59  ;;  %v2758_v62 = vpop.f32.mrf.mxu0  ;;  %v2827_v5 = vpop.f32.mrf.mxu1  ;;  %v6077_v1 = vadd.f32 %v6629_v38, %v3428_v15 }
 0x427   : > { %v2759_v26 = vadd.f32 %v2758_v62, %v5943_v47  ;;  %v6635_v62 = vld [vmem:[#allocation38_spill] sm:$0xff] }
 0x428   : > { %v2963_v46 = vadd.f32 %v2962_v0, %v2894_v11  ;;  %3082 = vmatmul.bf16.gmra.mxu1 %v6631_v37  ;;  %v6637_v37 = vld [vmem:[#allocation20_spill] sm:$0xff] }
 0x429   : > { %v2828_v32 = vadd.f32 %v2827_v5, %v2759_v26  ;;  %3013 = vmatmul.bf16.gmra.mxu0 %v6630_v22 }
 0x42a   : > { %v3326_v19 = vmax.f32 %v2963_v46, 0.0  ;;  %3151 = vmatmul.bf16.gmra.mxu2 %v6632_v23  ;;  %3220 = vmatmul.bf16.gmra.mxu3 %v6633_v40 }
 0x42c   : > { %v3432_v50 = vmul.f32 %v5961_v20, %v3326_v19  ;;  %v6638_v19 = vld [vmem:[#allocation13_spill] sm:$0xff] }
 0x42d   : > { %v2896_v54 = vpop.f32.mrf.mxu2  ;;  %v2965_v9 = vpop.f32.mrf.mxu3 }
 0x42e   : > { %v2897_v56 = vadd.f32 %v2896_v54, %v2828_v32  ;;  %v2760_v41 = vpop.f32.mrf.mxu0  ;;  %v2829_v42 = vpop.f32.mrf.mxu1  ;;  %v6086_v34 = vadd.f32 %v6634_v44, %v3432_v50  ;;  %v6636_v32 = vld [vmem:[#allocation19_spill] sm:$0xff] }
 0x42f   : > { %v2761_v43 = vadd.f32 %v2760_v41, %v5943_v47  ;;  %v6639_v41 = vld [vmem:[#allocation39_spill] sm:$0xff] }
 0x430   : > { %v2966_v30 = vadd.f32 %v2965_v9, %v2897_v56 }
 0x431   : > { %v2830_v48 = vadd.f32 %v2829_v42, %v2761_v43 }
 0x432   : > { %v3330_v33 = vmax.f32 %v2966_v30, 0.0 }
 0x434   : > { %v3436_v59 = vmul.f32 %v5961_v20, %v3330_v33 }
 0x435   : > { %v2898_v12 = vpop.f32.mrf.mxu2  ;;  %v2967_v15 = vpop.f32.mrf.mxu3 }
 0x436   : > { %v2899_v55 = vadd.f32 %v2898_v12, %v2830_v48  ;;  %v2763_v0 = vpop.f32.mrf.mxu0  ;;  %v2832_v11 = vpop.f32.mrf.mxu1  ;;  %v6091_v5 = vadd.f32 %v6635_v62, %v3436_v59 }
 0x437   : > { %v2764_v38 = vadd.f32 %v2763_v0, %v5943_v47  ;;  %v6640_v0 = vld [vmem:[#allocation40_spill] sm:$0xff] }
 0x438   : > { %v2968_v26 = vadd.f32 %v2967_v15, %v2899_v55  ;;  %3087 = vmatmul.bf16.gmra.mxu1 %v6636_v32  ;;  %v6642_v32 = vld [vmem:[#allocation15_spill] sm:$0xff] }
 0x439   : > { %v2833_v46 = vadd.f32 %v2832_v11, %v2764_v38  ;;  %3018 = vmatmul.bf16.gmra.mxu0 %v6599_v31 }
 0x43a   : > { %v3334_v22 = vmax.f32 %v2968_v26, 0.0  ;;  %3156 = vmatmul.bf16.gmra.mxu2 %v6637_v37  ;;  %3225 = vmatmul.bf16.gmra.mxu3 %v6638_v19  ;;  %v6643_v37 = vld [vmem:[#allocation16_spill] sm:$0xff]  ;;  %v6644_v19 = vld [vmem:[#allocation25_spill] sm:$0xff] }
 0x43c   : > { %v3440_v23 = vmul.f32 %v5961_v20, %v3334_v22 }
 0x43d   : > { %v2901_v40 = vpop.f32.mrf.mxu2  ;;  %v2970_v50 = vpop.f32.mrf.mxu3 }
 0x43e   : > { %v2902_v54 = vadd.f32 %v2901_v40, %v2833_v46  ;;  %v2765_v9 = vpop.f32.mrf.mxu0  ;;  %v2834_v56 = vpop.f32.mrf.mxu1  ;;  %v6100_v42 = vadd.f32 %v6639_v41, %v3440_v23  ;;  %v6641_v46 = vld [vmem:[#allocation14_spill] sm:$0xff] }
 0x43f   : > { %v2766_v44 = vadd.f32 %v2765_v9, %v5943_v47 }
 0x440   : > { %v2971_v31 = vadd.f32 %v2970_v50, %v2902_v54 }
 0x441   : > { %v2835_v43 = vadd.f32 %v2834_v56, %v2766_v44 }
 0x442   : > { %v3338_v30 = vmax.f32 %v2971_v31, 0.0 }
 0x444   : > { %v3444_v48 = vmul.f32 %v5961_v20, %v3338_v30 }
 0x445   : > { %v2903_v33 = vpop.f32.mrf.mxu2  ;;  %v2972_v59 = vpop.f32.mrf.mxu3 }
 0x446   : > { %v2904_v12 = vadd.f32 %v2903_v33, %v2835_v43  ;;  %v2768_v15 = vpop.f32.mrf.mxu0  ;;  %v2837_v55 = vpop.f32.mrf.mxu1  ;;  %v6105_v11 = vadd.f32 %v6640_v0, %v3444_v48  ;;  %v6119_v33 = vperm.slane %v5940_v18, 3  ;;  %v6648_v18 = vld [vmem:[#allocation22_spill] sm:$0xff] }
 0x447   : > { %v2769_v62 = vadd.f32 %v2768_v15, %v5943_v47 }
 0x448   : > { %v2973_v38 = vadd.f32 %v2972_v59, %v2904_v12  ;;  %3092 = vmatmul.bf16.gmra.mxu1 %v6642_v32  ;;  %v6647_v32 = vld [vmem:[#allocation21_spill] sm:$0xff] }
 0x449   : > { %v2838_v26 = vadd.f32 %v2837_v55, %v2769_v62  ;;  %3023 = vmatmul.bf16.gmra.mxu0 %v6641_v46 }
 0x44a   : > { %v3342_v22 = vmax.f32 %v2973_v38, 0.0  ;;  %3161 = vmatmul.bf16.gmra.mxu2 %v6643_v37  ;;  %3230 = vmatmul.bf16.gmra.mxu3 %v6644_v19 }
 0x44c   : > { %v3448_v23 = vmul.f32 %v5961_v20, %v3342_v22 }
 0x44d   : > { %v2906_v40 = vpop.f32.mrf.mxu2  ;;  %v2975_v50 = vpop.f32.mrf.mxu3 }
 0x44e   : > { %v2907_v54 = vadd.f32 %v2906_v40, %v2838_v26  ;;  %v2770_v9 = vpop.f32.mrf.mxu0  ;;  %v2839_v56 = vpop.f32.mrf.mxu1  ;;  %v6114_v41 = vadd.f32 %v5933_v4, %v3448_v23  ;;  %v6646_v26 = vld [vmem:[#allocation28_spill] sm:$0xff] }
 0x44f   : > { %v2771_v44 = vadd.f32 %v2770_v9, %v5943_v47  ;;  %v6645_v47 = vld [vmem:[#allocation27_spill] sm:$0xff] }
 0x450   : > { %v2976_v31 = vadd.f32 %v2975_v50, %v2907_v54  ;;  %v6649_v54 = vld [vmem:[#allocation49_spill] sm:$0xff] }
 0x451   : > { %v2840_v43 = vadd.f32 %v2839_v56, %v2771_v44 }
 0x452   : > { %v3346_v30 = vmax.f32 %v2976_v31, 0.0  ;;  %v4499_v31 = vld [vmem:[%s6311_s7] sm:$0xf] }
 0x454   : > { %v3452_v48 = vmul.f32 %v5961_v20, %v3346_v30 }
 0x455   : > { %v2908_v59 = vpop.f32.mrf.mxu2  ;;  %v2977_v12 = vpop.f32.mrf.mxu3 }
 0x456   : > { %v2909_v15 = vadd.f32 %v2908_v59, %v2840_v43  ;;  %v2989_v55 = vpop.f32.mrf.mxu0  ;;  %v3058_v0 = vpop.f32.mrf.mxu1  ;;  %v6122_v62 = vadd.f32 %v5947_v52, %v3452_v48  ;;  %v6137_v43 = vperm.slane %v4499_v31, 3 }
 0x457   : > { %v2990_v38 = vadd.f32 %v2989_v55, %v6119_v33 }
 0x458   : > { %v2978_v4 = vadd.f32 %v2977_v12, %v2909_v15  ;;  %3097 = vmatmul.bf16.gmra.mxu1 %v6646_v26 }
 0x459   : > { %3028 = vmatmul.bf16.gmra.mxu0 %v6645_v47  ;;  %v3059_v37 = vadd.f32 %v3058_v0, %v2990_v38 }
 0x45a   : > { %v3350_v46 = vmax.f32 %v2978_v4, 0.0  ;;  %3166 = vmatmul.bf16.gmra.mxu2 %v6647_v32  ;;  %3235 = vmatmul.bf16.gmra.mxu3 %v6648_v18 }
 0x45c   : > { %v3456_v22 = vmul.f32 %v5961_v20, %v3350_v46 }
 0x45d   : > { %v3127_v19 = vpop.f32.mrf.mxu2  ;;  %v3196_v23 = vpop.f32.mrf.mxu3 }
 0x45e   : > { %v3128_v40 = vadd.f32 %v3127_v19, %v3059_v37  ;;  %v2991_v52 = vpop.f32.mrf.mxu0  ;;  %v3060_v50 = vpop.f32.mrf.mxu1  ;;  %v6131_v9 = vadd.f32 %v6649_v54, %v3456_v22 }
 0x45f   : > { %v2992_v44 = vadd.f32 %v2991_v52, %v6119_v33 }
 0x460   : > { %v3197_v56 = vadd.f32 %v3196_v23, %v3128_v40 }
 0x461   : > { %v3061_v20 = vadd.f32 %v3060_v50, %v2992_v44 }
 0x462   : > { %v3259_v30 = vmax.f32 %v3197_v56, 0.0 }
 0x464   : > { %v3365_v48 = vmul.f32 %v6137_v43, %v3259_v30 }
 0x465   : > { %v3129_v59 = vpop.f32.mrf.mxu2  ;;  %v3198_v12 = vpop.f32.mrf.mxu3 }
 0x466   : > { %v3130_v15 = vadd.f32 %v3129_v59, %v3061_v20  ;;  %v2994_v55 = vpop.f32.mrf.mxu0  ;;  %v3063_v0 = vpop.f32.mrf.mxu1  ;;  %v3460_v4 = vadd.f32 %v5965_v24, %v3365_v48 }
 0x467   : > { %v2995_v47 = vadd.f32 %v2994_v55, %v6119_v33 }
 0x468   : > { %v3199_v38 = vadd.f32 %v3198_v12, %v3130_v15  ;;  %3461 = vadd.xlane.f32.xlu0 %v3460_v4  ;;  %3102 = vmatmul.bf16.gmra.mxu1 %v5558_v28 }
 0x469   : > { %3033 = vmatmul.bf16.gmra.mxu0 %v5556_v39  ;;  %v3064_v32 = vadd.f32 %v3063_v0, %v2995_v47 }
 0x46a   : > { %v3263_v26 = vmax.f32 %v3199_v38, 0.0  ;;  %3171 = vmatmul.bf16.gmra.mxu2 %v5561_v58  ;;  %3240 = vmatmul.bf16.gmra.mxu3 %v5563_v29 }
 0x46c   : > { %v3369_v46 = vmul.f32 %v6137_v43, %v3263_v26 }
 0x46d   : > { %v3132_v18 = vpop.f32.mrf.mxu2  ;;  %v3201_v22 = vpop.f32.mrf.mxu3 }
 0x46e   : > { %v3133_v37 = vadd.f32 %v3132_v18, %v3064_v32  ;;  %v2996_v24 = vpop.f32.mrf.mxu0  ;;  %v3065_v19 = vpop.f32.mrf.mxu1  ;;  %v3465_v23 = vadd.f32 %v5974_v35, %v3369_v46 }
 0x46f   : > { %v2997_v39 = vadd.f32 %v2996_v24, %v6119_v33 }
 0x470   : > { %v3202_v40 = vadd.f32 %v3201_v22, %v3133_v37  ;;  %3466 = vadd.xlane.f32.xlu0 %v3465_v23 }
 0x471   : > { %v3066_v52 = vadd.f32 %v3065_v19, %v2997_v39 }
 0x472   : > { %v3267_v28 = vmax.f32 %v3202_v40, 0.0 }
 0x474   : > { %v3373_v58 = vmul.f32 %v6137_v43, %v3267_v28 }
 0x475   : > { %v3134_v50 = vpop.f32.mrf.mxu2  ;;  %v3203_v29 = vpop.f32.mrf.mxu3 }
 0x476   : > { %v3135_v54 = vadd.f32 %v3134_v50, %v3066_v52  ;;  %v2999_v56 = vpop.f32.mrf.mxu0  ;;  %v3068_v44 = vpop.f32.mrf.mxu1  ;;  %v3470_v31 = vadd.f32 %v5979_v17, %v3373_v58 }
 0x477   : > { %v3000_v20 = vadd.f32 %v2999_v56, %v6119_v33 }
 0x478   : > { %v3204_v30 = vadd.f32 %v3203_v29, %v3135_v54  ;;  %3471 = vadd.xlane.f32.xlu1 %v3470_v31  ;;  %3107 = vmatmul.bf16.gmra.mxu1 %v5600_v2 }
 0x479   : > { %3038 = vmatmul.bf16.gmra.mxu0 %v5598_v16  ;;  %v3069_v59 = vadd.f32 %v3068_v44, %v3000_v20 }
 0x47a   : > { %v3271_v35 = vmax.f32 %v3204_v30, 0.0  ;;  %3176 = vmatmul.bf16.gmra.mxu2 %v5603_v10  ;;  %3245 = vmatmul.bf16.gmra.mxu3 %v6618_v25 }
 0x47c   : > { %v3377_v48 = vmul.f32 %v6137_v43, %v3271_v35 }
 0x47d   : > { %v3137_v12 = vpop.f32.mrf.mxu2  ;;  %v3206_v15 = vpop.f32.mrf.mxu3 }
 0x47e   : > { %v3138_v55 = vadd.f32 %v3137_v12, %v3069_v59  ;;  %v3001_v17 = vpop.f32.mrf.mxu0  ;;  %v3070_v0 = vpop.f32.mrf.mxu1  ;;  %v3475_v4 = vadd.f32 %v5988_v6, %v3377_v48 }
 0x47f   : > { %v3002_v16 = vadd.f32 %v3001_v17, %v6119_v33 }
 0x480   : > { %v3207_v38 = vadd.f32 %v3206_v15, %v3138_v55  ;;  %3476 = vadd.xlane.f32.xlu1 %v3475_v4 }
 0x481   : > { %v3071_v47 = vadd.f32 %v3070_v0, %v3002_v16 }
 0x482   : > { %v3275_v2 = vmax.f32 %v3207_v38, 0.0 }
 0x484   : > { %v3381_v10 = vmul.f32 %v6137_v43, %v3275_v2 }
 0x485   : > { %v3139_v26 = vpop.f32.mrf.mxu2  ;;  %v3208_v25 = vpop.f32.mrf.mxu3 }
 0x486   : > { %v3140_v46 = vadd.f32 %v3139_v26, %v3071_v47  ;;  %v3004_v32 = vpop.f32.mrf.mxu0  ;;  %v3073_v18 = vpop.f32.mrf.mxu1  ;;  %v3480_v22 = vadd.f32 %v5993_v7, %v3381_v10 }
 0x487   : > { %v3005_v24 = vadd.f32 %v3004_v32, %v6119_v33 }
 0x488   : > { %v3209_v37 = vadd.f32 %v3208_v25, %v3140_v46  ;;  %3481 = vadd.xlane.f32.xlu2 %v3480_v22  ;;  %3112 = vmatmul.bf16.gmra.mxu1 %v5642_v51 }
 0x489   : > { %3043 = vmatmul.bf16.gmra.mxu0 %v5640_v14  ;;  %v3074_v23 = vadd.f32 %v3073_v18, %v3005_v24 }
 0x48a   : > { %v3279_v6 = vmax.f32 %v3209_v37, 0.0  ;;  %3181 = vmatmul.bf16.gmra.mxu2 %v5645_v45  ;;  %3250 = vmatmul.bf16.gmra.mxu3 %v5647_v36 }
 0x48c   : > { %v3385_v19 = vmul.f32 %v6137_v43, %v3279_v6 }
 0x48d   : > { %v3142_v40 = vpop.f32.mrf.mxu2  ;;  %v3211_v39 = vpop.f32.mrf.mxu3 }
 0x48e   : > { %v3143_v28 = vadd.f32 %v3142_v40, %v3074_v23  ;;  %v3006_v7 = vpop.f32.mrf.mxu0  ;;  %v3075_v52 = vpop.f32.mrf.mxu1  ;;  %v3485_v58 = vadd.f32 %v6002_v8, %v3385_v19 }
 0x48f   : > { %v3007_v14 = vadd.f32 %v3006_v7, %v6119_v33 }
 0x490   : > { %v3212_v50 = vadd.f32 %v3211_v39, %v3143_v28  ;;  %3486 = vadd.xlane.f32.xlu2 %v3485_v58 }
 0x491   : > { %v3076_v45 = vadd.f32 %v3075_v52, %v3007_v14 }
 0x492   : > { %v3283_v51 = vmax.f32 %v3212_v50, 0.0 }
 0x494   : > { %v3389_v29 = vmul.f32 %v6137_v43, %v3283_v51 }
 0x495   : > { %v3144_v54 = vpop.f32.mrf.mxu2  ;;  %v3213_v36 = vpop.f32.mrf.mxu3 }
 0x496   : > { %v3145_v56 = vadd.f32 %v3144_v54, %v3076_v45  ;;  %v3009_v44 = vpop.f32.mrf.mxu0  ;;  %v3078_v31 = vpop.f32.mrf.mxu1  ;;  %v3490_v30 = vadd.f32 %v6007_v63, %v3389_v29 }
 0x497   : > { %v3010_v35 = vadd.f32 %v3009_v44, %v6119_v33 }
 0x498   : > { %v3214_v20 = vadd.f32 %v3213_v36, %v3145_v56  ;;  %3491 = vadd.xlane.f32.xlu0 %v3490_v30 }
 0x499   : > { %v3079_v59 = vadd.f32 %v3078_v31, %v3010_v35 }
 0x49a   : > { %v3287_v8 = vmax.f32 %v3214_v20, 0.0 }
 0x49c   : > { %v3393_v48 = vmul.f32 %v6137_v43, %v3287_v8 }
 0x49d   : > { %v3147_v12 = vpop.f32.mrf.mxu2  ;;  %v3216_v15 = vpop.f32.mrf.mxu3 }
 0x49e   : > { %v3148_v55 = vadd.f32 %v3147_v12, %v3079_v59  ;;  %v3011_v17 = vpop.f32.mrf.mxu0  ;;  %v3080_v0 = vpop.f32.mrf.mxu1  ;;  %v3495_v4 = vadd.f32 %v6016_v57, %v3393_v48 }
 0x49f   : > { %v3012_v16 = vadd.f32 %v3011_v17, %v6119_v33 }
 0x4a0   : > { %v3217_v38 = vadd.f32 %v3216_v15, %v3148_v55  ;;  %3496 = vadd.xlane.f32.xlu1 %v3495_v4 }
 0x4a1   : > { %v3081_v47 = vadd.f32 %v3080_v0, %v3012_v16 }
 0x4a2   : > { %v3291_v63 = vmax.f32 %v3217_v38, 0.0 }
 0x4a4   : > { %v3397_v2 = vmul.f32 %v6137_v43, %v3291_v63 }
 0x4a5   : > { %v3149_v10 = vpop.f32.mrf.mxu2  ;;  %v3218_v26 = vpop.f32.mrf.mxu3 }
 0x4a6   : > { %v3150_v25 = vadd.f32 %v3149_v10, %v3081_v47  ;;  %v3014_v46 = vpop.f32.mrf.mxu0  ;;  %v3083_v32 = vpop.f32.mrf.mxu1  ;;  %v3500_v18 = vadd.f32 %v6021_v21, %v3397_v2 }
 0x4a7   : > { %v3015_v37 = vadd.f32 %v3014_v46, %v6119_v33 }
 0x4a8   : > { %v3219_v22 = vadd.f32 %v3218_v26, %v3150_v25  ;;  %3501 = vadd.xlane.f32.xlu2 %v3500_v18 }
 0x4a9   : > { %v3084_v6 = vadd.f32 %v3083_v32, %v3015_v37 }
 0x4aa   : > { %v3295_v57 = vmax.f32 %v3219_v22, 0.0 }
 0x4ac   : > { %v3401_v24 = vmul.f32 %v6137_v43, %v3295_v57 }
 0x4ad   : > { %v3152_v19 = vpop.f32.mrf.mxu2  ;;  %v3221_v23 = vpop.f32.mrf.mxu3 }
 0x4ae   : > { %v3153_v40 = vadd.f32 %v3152_v19, %v3084_v6  ;;  %v3016_v39 = vpop.f32.mrf.mxu0  ;;  %v3085_v28 = vpop.f32.mrf.mxu1  ;;  %v3505_v7 = vadd.f32 %v6030_v60, %v3401_v24 }
 0x4af   : > { %v3017_v58 = vadd.f32 %v3016_v39, %v6119_v33 }
 0x4b0   : > { %v3222_v52 = vadd.f32 %v3221_v23, %v3153_v40  ;;  %3506 = vadd.xlane.f32.xlu0 %v3505_v7 }
 0x4b1   : > { %v3086_v14 = vadd.f32 %v3085_v28, %v3017_v58 }
 0x4b2   : > { %v3299_v21 = vmax.f32 %v3222_v52, 0.0 }
 0x4b4   : > { %v3405_v50 = vmul.f32 %v6137_v43, %v3299_v21 }
 0x4b5   : > { %v3154_v51 = vpop.f32.mrf.mxu2  ;;  %v3223_v29 = vpop.f32.mrf.mxu3 }
 0x4b6   : > { %v3155_v45 = vadd.f32 %v3154_v51, %v3086_v14  ;;  %v3019_v54 = vpop.f32.mrf.mxu0  ;;  %v3088_v36 = vpop.f32.mrf.mxu1  ;;  %v3510_v56 = vadd.f32 %v6035_v61, %v3405_v50  ;;  %v6196_v51 = vstv %s3578_s16 }
 0x4b7   : > { %v3020_v31 = vadd.f32 %v3019_v54, %v6119_v33 }
 0x4b8   : > { %v3224_v44 = vadd.f32 %v3223_v29, %v3155_v45  ;;  %3511 = vadd.xlane.f32.xlu1 %v3510_v56 }
 0x4b9   : > { %v3089_v20 = vadd.f32 %v3088_v36, %v3020_v31 }
 0x4ba   : > { %v3303_v60 = vmax.f32 %v3224_v44, 0.0 }
 0x4bc   : > { %v3409_v30 = vmul.f32 %v6137_v43, %v3303_v60 }
 0x4bd   : > { %v3157_v35 = vpop.f32.mrf.mxu2  ;;  %v3226_v8 = vpop.f32.mrf.mxu3 }
 0x4be   : > { %v3158_v48 = vadd.f32 %v3157_v35, %v3089_v20  ;;  %v3021_v59 = vpop.f32.mrf.mxu0  ;;  %v3090_v12 = vpop.f32.mrf.mxu1  ;;  %v3515_v15 = vadd.f32 %v6044_v3, %v3409_v30 }
 0x4bf   : > { %v3022_v17 = vadd.f32 %v3021_v59, %v6119_v33 }
 0x4c0   : > { %v3227_v55 = vadd.f32 %v3226_v8, %v3158_v48  ;;  %3516 = vadd.xlane.f32.xlu2 %v3515_v15 }
 0x4c1   : > { %v3091_v4 = vadd.f32 %v3090_v12, %v3022_v17 }
 0x4c2   : > { %v3307_v61 = vmax.f32 %v3227_v55, 0.0 }
 0x4c4   : > { %v3413_v0 = vmul.f32 %v6137_v43, %v3307_v61 }
 0x4c5   : > { %v3159_v38 = vpop.f32.mrf.mxu2  ;;  %v3228_v16 = vpop.f32.mrf.mxu3 }
 0x4c6   : > { %v3160_v63 = vadd.f32 %v3159_v38, %v3091_v4  ;;  %v3024_v2 = vpop.f32.mrf.mxu0  ;;  %v3093_v47 = vpop.f32.mrf.mxu1  ;;  %v3520_v10 = vadd.f32 %v6049_v13, %v3413_v0 }
 0x4c7   : > { %v3025_v25 = vadd.f32 %v3024_v2, %v6119_v33 }
 0x4c8   : > { %v3229_v26 = vadd.f32 %v3228_v16, %v3160_v63  ;;  %3521 = vadd.xlane.f32.xlu0 %v3520_v10 }
 0x4c9   : > { %v3094_v32 = vadd.f32 %v3093_v47, %v3025_v25 }
 0x4ca   : > { %v3311_v3 = vmax.f32 %v3229_v26, 0.0 }
 0x4cc   : > { %v3417_v46 = vmul.f32 %v6137_v43, %v3311_v3 }
 0x4cd   : > { %v3162_v18 = vpop.f32.mrf.mxu2  ;;  %v3231_v22 = vpop.f32.mrf.mxu3 }
 0x4ce   : > { %v3163_v37 = vadd.f32 %v3162_v18, %v3094_v32  ;;  %v3026_v57 = vpop.f32.mrf.mxu0  ;;  %v3095_v24 = vpop.f32.mrf.mxu1  ;;  %v3525_v6 = vadd.f32 %v6058_v49, %v3417_v46 }
 0x4cf   : > { %v3027_v23 = vadd.f32 %v3026_v57, %v6119_v33 }
 0x4d0   : > { %v3232_v19 = vadd.f32 %v3231_v22, %v3163_v37  ;;  %3526 = vadd.xlane.f32.xlu1 %v3525_v6 }
 0x4d1   : > { %v3096_v39 = vadd.f32 %v3095_v24, %v3027_v23 }
 0x4d2   : > { %v3315_v13 = vmax.f32 %v3232_v19, 0.0 }
 0x4d4   : > { %v3421_v40 = vmul.f32 %v6137_v43, %v3315_v13 }
 0x4d5   : > { %v3164_v28 = vpop.f32.mrf.mxu2  ;;  %v3233_v7 = vpop.f32.mrf.mxu3 }
 0x4d6   : > { %v3165_v52 = vadd.f32 %v3164_v28, %v3096_v39  ;;  %v3029_v58 = vpop.f32.mrf.mxu0  ;;  %v3098_v21 = vpop.f32.mrf.mxu1  ;;  %v3530_v50 = vadd.f32 %v6063_v27, %v3421_v40 }
 0x4d7   : > { %v3030_v49 = vadd.f32 %v3029_v58, %v6119_v33 }
 0x4d8   : > { %v3234_v14 = vadd.f32 %v3233_v7, %v3165_v52  ;;  %3531 = vadd.xlane.f32.xlu2 %v3530_v50 }
 0x4d9   : > { %v3099_v36 = vadd.f32 %v3098_v21, %v3030_v49 }
 0x4da   : > { %v3319_v29 = vmax.f32 %v3234_v14, 0.0 }
 0x4db   : > { %v3462_v45 = vpop.xlane.xlu0 %3461 }
 0x4dc   : > { %v3425_v54 = vmul.f32 %v6137_v43, %v3319_v29  ;;  %v3580_v27 = vadd.f32 %v6196_v51, %v3462_v45 }
 0x4dd   : > { %v3167_v56 = vpop.f32.mrf.mxu2  ;;  %v3236_v44 = vpop.f32.mrf.mxu3 }
 0x4de   : > { %3605 = vst.msk [vmem:[%s6202_s19] sm:$0xff] %vm3604_vm3, %v3580_v27  ;;  %v3168_v31 = vadd.f32 %v3167_v56, %v3099_v36  ;;  %v3031_v60 = vpop.f32.mrf.mxu0  ;;  %v3100_v30 = vpop.f32.mrf.mxu1  ;;  %v3535_v20 = vadd.f32 %v6072_v53, %v3425_v54 }
 0x4df   : > { %v3032_v8 = vadd.f32 %v3031_v60, %v6119_v33 }
 0x4e0   : > { %v3237_v35 = vadd.f32 %v3236_v44, %v3168_v31  ;;  %3536 = vadd.xlane.f32.xlu0 %v3535_v20 }
 0x4e1   : > { %v3101_v15 = vadd.f32 %v3100_v30, %v3032_v8 }
 0x4e2   : > { %v3323_v48 = vmax.f32 %v3237_v35, 0.0 }
 0x4e3   : > { %v3467_v59 = vpop.xlane.xlu0 %3466 }
 0x4e4   : > { %v3429_v12 = vmul.f32 %v6137_v43, %v3323_v48  ;;  %v3581_v55 = vadd.f32 %v6196_v51, %v3467_v59 }
 0x4e5   : > { %v3169_v17 = vpop.f32.mrf.mxu2  ;;  %v3238_v61 = vpop.f32.mrf.mxu3 }
 0x4e6   : > { %3606 = vst.msk [vmem:[%s6202_s19 + $0x8] sm:$0xff] %vm3604_vm3, %v3581_v55  ;;  %v3170_v0 = vadd.f32 %v3169_v17, %v3101_v15  ;;  %v3034_v4 = vpop.f32.mrf.mxu0  ;;  %v3103_v38 = vpop.f32.mrf.mxu1  ;;  %v3540_v53 = vadd.f32 %v6077_v1, %v3429_v12 }
 0x4e7   : > { %v3035_v63 = vadd.f32 %v3034_v4, %v6119_v33 }
 0x4e8   : > { %v3239_v16 = vadd.f32 %v3238_v61, %v3170_v0  ;;  %3541 = vadd.xlane.f32.xlu1 %v3540_v53 }
 0x4e9   : > { %v3104_v26 = vadd.f32 %v3103_v38, %v3035_v63 }
 0x4ea   : > { %v3327_v2 = vmax.f32 %v3239_v16, 0.0 }
 0x4eb   : > { %v3472_v47 = vpop.xlane.xlu1 %3471 }
 0x4ec   : > { %v3433_v10 = vmul.f32 %v6137_v43, %v3327_v2  ;;  %v3582_v25 = vadd.f32 %v6196_v51, %v3472_v47 }
 0x4ed   : > { %v3172_v3 = vpop.f32.mrf.mxu2  ;;  %v3241_v46 = vpop.f32.mrf.mxu3 }
 0x4ee   : > { %3607 = vst.msk [vmem:[%s6202_s19 + $0x10] sm:$0xff] %vm3604_vm3, %v3582_v25  ;;  %v3173_v32 = vadd.f32 %v3172_v3, %v3104_v26  ;;  %v3036_v18 = vpop.f32.mrf.mxu0  ;;  %v3105_v22 = vpop.f32.mrf.mxu1  ;;  %v3545_v1 = vadd.f32 %v6086_v34, %v3433_v10 }
 0x4ef   : > { %v3037_v57 = vadd.f32 %v3036_v18, %v6119_v33 }
 0x4f0   : > { %v3242_v37 = vadd.f32 %v3241_v46, %v3173_v32  ;;  %3546 = vadd.xlane.f32.xlu2 %v3545_v1 }
 0x4f1   : > { %v3106_v23 = vadd.f32 %v3105_v22, %v3037_v57 }
 0x4f2   : > { %v3331_v24 = vmax.f32 %v3242_v37, 0.0 }
 0x4f3   : > { %v3477_v6 = vpop.xlane.xlu1 %3476 }
 0x4f4   : > { %v3437_v19 = vmul.f32 %v6137_v43, %v3331_v24  ;;  %v3583_v13 = vadd.f32 %v6196_v51, %v3477_v6 }
 0x4f5   : > { %v3174_v40 = vpop.f32.mrf.mxu2  ;;  %v3243_v39 = vpop.f32.mrf.mxu3 }
 0x4f6   : > { %3608 = vst.msk [vmem:[%s6202_s19 + $0x18] sm:$0xff] %vm3604_vm3, %v3583_v13  ;;  %v3175_v28 = vadd.f32 %v3174_v40, %v3106_v23  ;;  %v3039_v7 = vpop.f32.mrf.mxu0  ;;  %v3108_v52 = vpop.f32.mrf.mxu1  ;;  %v3550_v34 = vadd.f32 %v6091_v5, %v3437_v19 }
 0x4f7   : > { %v3040_v21 = vadd.f32 %v3039_v7, %v6119_v33 }
 0x4f8   : > { %v3244_v58 = vadd.f32 %v3243_v39, %v3175_v28  ;;  %3551 = vadd.xlane.f32.xlu0 %v3550_v34 }
 0x4f9   : > { %v3109_v29 = vadd.f32 %v3108_v52, %v3040_v21 }
 0x4fa   : > { %v3335_v50 = vmax.f32 %v3244_v58, 0.0 }
 0x4fb   : > { %v3482_v14 = vpop.xlane.xlu2 %3481 }
 0x4fc   : > { %v3441_v49 = vmul.f32 %v6137_v43, %v3335_v50  ;;  %v3584_v45 = vadd.f32 %v6196_v51, %v3482_v14 }
 0x4fd   : > { %v3177_v54 = vpop.f32.mrf.mxu2  ;;  %v3246_v36 = vpop.f32.mrf.mxu3 }
 0x4fe   : > { %3609 = vst.msk [vmem:[%s6202_s19 + $0x20] sm:$0xff] %vm3604_vm3, %v3584_v45  ;;  %v3178_v27 = vadd.f32 %v3177_v54, %v3109_v29  ;;  %v3041_v56 = vpop.f32.mrf.mxu0  ;;  %v3555_v5 = vadd.f32 %v6100_v42, %v3441_v49  ;;  %v3110_v44 = vpop.f32.mrf.mxu1 }
 0x4ff   : > { %v3042_v60 = vadd.f32 %v3041_v56, %v6119_v33 }
 0x500   : > { %v3247_v31 = vadd.f32 %v3246_v36, %v3178_v27  ;;  %3556 = vadd.xlane.f32.xlu1 %v3555_v5 }
 0x501   : > { %v3111_v8 = vadd.f32 %v3110_v44, %v3042_v60 }
 0x502   : > { %v3339_v30 = vmax.f32 %v3247_v31, 0.0 }
 0x503   : > { %v3487_v20 = vpop.xlane.xlu2 %3486 }
 0x504   : > { %v3445_v35 = vmul.f32 %v6137_v43, %v3339_v30  ;;  %v3585_v48 = vadd.f32 %v6196_v51, %v3487_v20 }
 0x505   : > { %v3179_v59 = vpop.f32.mrf.mxu2  ;;  %v3248_v12 = vpop.f32.mrf.mxu3 }
 0x506   : > { %3610 = vst.msk [vmem:[%s6202_s19 + $0x28] sm:$0xff] %vm3604_vm3, %v3585_v48  ;;  %v3180_v15 = vadd.f32 %v3179_v59, %v3111_v8  ;;  %v3044_v55 = vpop.f32.mrf.mxu0  ;;  %v3560_v42 = vadd.f32 %v6105_v11, %v3445_v35  ;;  %v3113_v0 = vpop.f32.mrf.mxu1 }
 0x507   : > { %v3045_v61 = vadd.f32 %v3044_v55, %v6119_v33 }
 0x508   : > { %v3249_v17 = vadd.f32 %v3248_v12, %v3180_v15  ;;  %3561 = vadd.xlane.f32.xlu2 %v3560_v42 }
 0x509   : > { %v3114_v16 = vadd.f32 %v3113_v0, %v3045_v61 }
 0x50a   : > { %v3343_v4 = vmax.f32 %v3249_v17, 0.0 }
 0x50b   : > { %v3492_v38 = vpop.xlane.xlu0 %3491 }
 0x50c   : > { %v3449_v53 = vmul.f32 %v6137_v43, %v3343_v4  ;;  %v3586_v63 = vadd.f32 %v6196_v51, %v3492_v38 }
 0x50d   : > { %v3182_v2 = vpop.f32.mrf.mxu2  ;;  %v3251_v47 = vpop.f32.mrf.mxu3 }
 0x50e   : > { %3611 = vst.msk [vmem:[%s6202_s19 + $0x30] sm:$0xff] %vm3604_vm3, %v3586_v63  ;;  %v3183_v10 = vadd.f32 %v3182_v2, %v3114_v16  ;;  %v3046_v26 = vpop.f32.mrf.mxu0  ;;  %v3565_v11 = vadd.f32 %v6114_v41, %v3449_v53  ;;  %v3115_v32 = vpop.f32.mrf.mxu1 }
 0x50f   : > { %v3047_v3 = vadd.f32 %v3046_v26, %v6119_v33 }
 0x510   : > { %v3252_v25 = vadd.f32 %v3251_v47, %v3183_v10  ;;  %3566 = vadd.xlane.f32.xlu0 %v3565_v11 }
 0x511   : > { %v3116_v1 = vadd.f32 %v3115_v32, %v3047_v3 }
 0x512   : > { %v3347_v46 = vmax.f32 %v3252_v25, 0.0 }
 0x513   : > { %v3497_v18 = vpop.xlane.xlu1 %3496 }
 0x514   : > { %v3453_v22 = vmul.f32 %v6137_v43, %v3347_v46  ;;  %v3587_v37 = vadd.f32 %v6196_v51, %v3497_v18 }
 0x515   : > { %v3184_v57 = vpop.f32.mrf.mxu2  ;;  %v3253_v6 = vpop.f32.mrf.mxu3 }
 0x516   : > { %3612 = vst.msk [vmem:[%s6202_s19 + $0x38] sm:$0xff] %vm3604_vm3, %v3587_v37  ;;  %v3185_v24 = vadd.f32 %v3184_v57, %v3116_v1  ;;  %v3570_v41 = vadd.f32 %v6122_v62, %v3453_v22 }
 0x518   : > { %v3254_v33 = vadd.f32 %v3253_v6, %v3185_v24  ;;  %3571 = vadd.xlane.f32.xlu1 %v3570_v41 }
 0x51a   : > { %v3351_v19 = vmax.f32 %v3254_v33, 0.0 }
 0x51b   : > { %v3502_v23 = vpop.xlane.xlu2 %3501 }
 0x51c   : > { %v3457_v13 = vmul.f32 %v6137_v43, %v3351_v19  ;;  %v3588_v40 = vadd.f32 %v6196_v51, %v3502_v23 }
 0x51e   : > { %3613 = vst.msk [vmem:[%s6202_s19 + $0x40] sm:$0xff] %vm3604_vm3, %v3588_v40  ;;  %v3575_v39 = vadd.f32 %v6131_v9, %v3457_v13 }
 0x520   : > { %3576 = vadd.xlane.f32.xlu2 %v3575_v39 }
 0x523   : > { %v3507_v28 = vpop.xlane.xlu0 %3506 }
 0x524   : > { %v3589_v62 = vadd.f32 %v6196_v51, %v3507_v28 }
 0x526   : > { %3614 = vst.msk [vmem:[%s6202_s19 + $0x48] sm:$0xff] %vm3604_vm3, %v3589_v62 }
 0x52b   : > { %v3512_v7 = vpop.xlane.xlu1 %3511 }
 0x52c   : > { %v3590_v52 = vadd.f32 %v6196_v51, %v3512_v7 }
 0x52e   : > { %3615 = vst.msk [vmem:[%s6202_s19 + $0x50] sm:$0xff] %vm3604_vm3, %v3590_v52 }
 0x533   : > { %v3517_v43 = vpop.xlane.xlu2 %3516 }
 0x534   : > { %v3591_v34 = vadd.f32 %v6196_v51, %v3517_v43 }
 0x536   : > { %3616 = vst.msk [vmem:[%s6202_s19 + $0x58] sm:$0xff] %vm3604_vm3, %v3591_v34 }
 0x53b   : > { %v3522_v9 = vpop.xlane.xlu0 %3521 }
 0x53c   : > { %v3592_v58 = vadd.f32 %v6196_v51, %v3522_v9 }
 0x53e   : > { %3617 = vst.msk [vmem:[%s6202_s19 + $0x60] sm:$0xff] %vm3604_vm3, %v3592_v58 }
 0x543   : > { %v3527_v21 = vpop.xlane.xlu1 %3526 }
 0x544   : > { %v3593_v50 = vadd.f32 %v6196_v51, %v3527_v21 }
 0x546   : > { %3618 = vst.msk [vmem:[%s6202_s19 + $0x68] sm:$0xff] %vm3604_vm3, %v3593_v50 }
 0x54b   : > { %v3532_v14 = vpop.xlane.xlu2 %3531 }
 0x54c   : > { %v3594_v49 = vadd.f32 %v6196_v51, %v3532_v14 }
 0x54e   : > { %3619 = vst.msk [vmem:[%s6202_s19 + $0x70] sm:$0xff] %vm3604_vm3, %v3594_v49 }
 0x553   : > { %v3537_v29 = vpop.xlane.xlu0 %3536 }
 0x554   : > { %v3595_v45 = vadd.f32 %v6196_v51, %v3537_v29 }
 0x556   : > { %3620 = vst.msk [vmem:[%s6202_s19 + $0x78] sm:$0xff] %vm3604_vm3, %v3595_v45 }
 0x55b   : > { %v3542_v54 = vpop.xlane.xlu1 %3541 }
 0x55c   : > { %v3596_v36 = vadd.f32 %v6196_v51, %v3542_v54 }
 0x55e   : > { %3621 = vst.msk [vmem:[%s6202_s19 + $0x80] sm:$0xff] %vm3604_vm3, %v3596_v36 }
 0x563   : > { %v3547_v27 = vpop.xlane.xlu2 %3546 }
 0x564   : > { %v3597_v56 = vadd.f32 %v6196_v51, %v3547_v27 }
 0x566   : > { %3622 = vst.msk [vmem:[%s6202_s19 + $0x88] sm:$0xff] %vm3604_vm3, %v3597_v56 }
 0x56b   : > { %v3552_v5 = vpop.xlane.xlu0 %3551 }
 0x56c   : > { %v3598_v44 = vadd.f32 %v6196_v51, %v3552_v5 }
 0x56e   : > { %3623 = vst.msk [vmem:[%s6202_s19 + $0x90] sm:$0xff] %vm3604_vm3, %v3598_v44 }
 0x573   : > { %v3557_v31 = vpop.xlane.xlu1 %3556 }
 0x574   : > { %v3599_v60 = vadd.f32 %v6196_v51, %v3557_v31 }
 0x576   : > { %3624 = vst.msk [vmem:[%s6202_s19 + $0x98] sm:$0xff] %vm3604_vm3, %v3599_v60 }
 0x57b   : > { %v3562_v30 = vpop.xlane.xlu2 %3561 }
 0x57c   : > { %v3600_v20 = vadd.f32 %v6196_v51, %v3562_v30 }
 0x57e   : > { %3625 = vst.msk [vmem:[%s6202_s19 + $0xa0] sm:$0xff] %vm3604_vm3, %v3600_v20 }
 0x583   : > { %v3567_v35 = vpop.xlane.xlu0 %3566 }
 0x584   : > { %v3601_v8 = vadd.f32 %v6196_v51, %v3567_v35 }
 0x586   : > { %3626 = vst.msk [vmem:[%s6202_s19 + $0xa8] sm:$0xff] %vm3604_vm3, %v3601_v8 }
 0x58b   : > { %v3572_v48 = vpop.xlane.xlu1 %3571 }
 0x58c   : > { %v3602_v59 = vadd.f32 %v6196_v51, %v3572_v48 }
 0x58e   : > { %3627 = vst.msk [vmem:[%s6202_s19 + $0xb0] sm:$0xff] %vm3604_vm3, %v3602_v59 }
 0x593   : > { %v3577_v12 = vpop.xlane.xlu2 %3576 }
 0x594   : > { %v3603_v15 = vadd.f32 %v6196_v51, %v3577_v12 }
 0x596   : > { %3628 = vst.msk [vmem:[%s6202_s19 + $0xb8] sm:$0xff] %vm3604_vm3, %v3603_v15 }
 0x597 PF: > { %s21_s11 = sadd.s32 1, %s4540_s11  }
 0x598   : > { %p18_p7 = scmp.ge.s32.totalorder %s21_s11, 4  }
 0x59a   :  { %20 = sbr.rel (!%p18_p7) target bundleno = 3 (0x3), region = 94 }
 0x59f   :  { %3651 = vsyncpa [#allocation4], 1 }
 0x5a0   :  { %3653 = vsyncpa [#allocation4 + $0x1], 1 }

</bundles_post_ra>
